<compile_context>
chip_gen: v6e
topology: v6e:2x2x1
jax: 0.10.0
libtpu: 0.0.40
codegen_flags: <defaults>
</compile_context>

<pallas_src>
import math
import functools

import jax
import jax.numpy as jnp
from jax.experimental import pallas as pl
from jax.experimental.pallas import tpu as pltpu


def _mha_kernel(x_ref, wqkv_ref, bqkv_ref, wpt_ref, bp_ref, o_ref, *, T, H, d):
    """One batch element per grid step: fused QKV -> head-batched attention -> fused concat+projection."""
    dim = H * d

    x = x_ref[...]                                                     # (T, dim) f32

    # Fused QKV projection (1/sqrt(d) already folded into the q columns/bias).
    qkv = jnp.dot(x, wqkv_ref[...], preferred_element_type=jnp.float32) + bqkv_ref[...]  # (T, 3*dim)

    # Single relayout: split lanes into (3H, d) and bring the head axis to the front.
    qkv = jnp.swapaxes(qkv.reshape(T, 3 * H, d), 0, 1)                 # (3H, T, d)
    q = qkv[0:H]                                                       # (H, T, d) static leading-dim slices
    k = qkv[H:2 * H]
    v = qkv[2 * H:3 * H]

    # Head-batched q @ k^T (leading batch dim -> canonical batched dot_general form).
    att = jnp.einsum('hqd,hkd->hqk', q, k, preferred_element_type=jnp.float32)  # (H, Tq, Tk)

    # torch.softmax(att, dim=1) on (B, Tq, Tk) == softmax over the *query* axis (axis=1 here).
    m = jnp.max(att, axis=1, keepdims=True)
    e = jnp.exp(att - m)
    denom = jnp.sum(e, axis=1, keepdims=True)
    p = e * pl.reciprocal(denom, approx=False)                         # exact: keeps 1e-5 atol parity

    o = jnp.einsum('hqk,hkd->hqd', p, v, preferred_element_type=jnp.float32)    # (H, T, d)

    # Fold the head-concat into the output projection: per-head (T,d) @ (d,dim) then sum
    # over heads (no lane-axis concat, no scratch, no masked 8-lane stores).
    out_h = jnp.einsum('hqj,hjn->hqn', o, wpt_ref[...], preferred_element_type=jnp.float32)  # (H, T, dim)
    out = jnp.sum(out_h, axis=0) + bp_ref[...]                         # (T, dim)
    o_ref[...] = out.astype(o_ref.dtype)


def _pack_params(params):
    """Wrapper-side repack: pre-transposed, head-fused weights so the kernel never transposes weights.

    Returns
      wqkv : (dim, 3*dim)   columns = [q head0..H-1 | k head0..H-1 | v head0..H-1]; 1/sqrt(d) folded into q
      bqkv : (1, 3*dim)
      wpt  : (H, d, dim)    wpt[h, j, :] == Wp[:, h*d + j]  (so out = sum_h o_h @ wpt[h])
      bp   : (1, dim)
    """
    H, d, dim = params["wq"].shape
    scale = 1.0 / math.sqrt(d)

    def to_cols(w):   # (H, d, dim) -> (dim, H*d); column h*d+j == w[h, j, :]
        return jnp.transpose(w, (2, 0, 1)).reshape(dim, H * d)

    wqkv = jnp.concatenate(
        [to_cols(params["wq"]) * scale, to_cols(params["wk"]), to_cols(params["wv"])], axis=1)
    bqkv = jnp.concatenate(
        [params["bq"].reshape(H * d) * scale,
         params["bk"].reshape(H * d),
         params["bv"].reshape(H * d)]).reshape(1, 3 * dim)
    wpt = params["wp"].T.reshape(H, d, dim)
    bp = params["bp"].reshape(1, dim)
    return wqkv, bqkv, wpt, bp


def multi_head_attention(x, params):
    """x: (B, T, dim) float32.  params: dict of stacked per-head weights (see init_params)."""
    B, T, dim = x.shape
    H, d, _ = params["wq"].shape
    wqkv, bqkv, wpt, bp = _pack_params(params)

    x2 = x.reshape(B * T, dim)
    kernel = functools.partial(_mha_kernel, T=T, H=H, d=d)

    out2 = pl.pallas_call(
        kernel,
        out_shape=jax.ShapeDtypeStruct((B * T, dim), x.dtype),
        grid_spec=pltpu.PrefetchScalarGridSpec(
            num_scalar_prefetch=0,
            grid=(B,),                                              # batch axis -> parallel (2nd TC on v7x)
            in_specs=[
                pl.BlockSpec((T, dim), lambda b: (b, 0)),           # x rows of this batch element
                pl.BlockSpec((dim, 3 * dim), lambda b: (0, 0)),     # fused, pre-transposed qkv weight
                pl.BlockSpec((1, 3 * dim), lambda b: (0, 0)),       # fused qkv bias
                pl.BlockSpec((H, d, dim), lambda b: (0, 0, 0)),     # output projection as (H, d, dim)
                pl.BlockSpec((1, dim), lambda b: (0, 0)),           # output bias
            ],
            out_specs=pl.BlockSpec((T, dim), lambda b: (b, 0)),
        ),
        compiler_params=pltpu.CompilerParams(dimension_semantics=("parallel",)),
    )(x2, wqkv, bqkv, wpt, bp)
    return out2.reshape(B, T, dim)


def init_params(key, dim, heads):
    """Deterministic init mimicking nn.Linear default (uniform +/- 1/sqrt(fan_in))."""
    d = dim // heads
    keys = jax.random.split(key, 8)
    bound_in = 1.0 / math.sqrt(dim)

    def u(k, shape, bound):
        return jax.random.uniform(k, shape, jnp.float32, -bound, bound)

    return {
        "wq": u(keys[0], (heads, d, dim), bound_in),
        "bq": u(keys[1], (heads, d), bound_in),
        "wk": u(keys[2], (heads, d, dim), bound_in),
        "bk": u(keys[3], (heads, d), bound_in),
        "wv": u(keys[4], (heads, d, dim), bound_in),
        "bv": u(keys[5], (heads, d), bound_in),
        "wp": u(keys[6], (dim, dim), bound_in),
        "bp": u(keys[7], (1, dim), bound_in),
    }


def reference_mha(x, params):
    """Pure-JAX reference with the exact PyTorch semantics (softmax over dim=1)."""
    H, d, _ = params["wq"].shape
    outs = []
    for h in range(H):
        q = x @ params["wq"][h].T + params["bq"][h]
        k = x @ params["wk"][h].T + params["bk"][h]
        v = x @ params["wv"][h].T + params["bv"][h]
        att = (q @ jnp.swapaxes(k, 1, 2)) / math.sqrt(d)   # (B, Tq, Tk)
        p = jax.nn.softmax(att, axis=1)                    # dim=1, as in the PyTorch module
        outs.append(p @ v)
    cat = jnp.concatenate(outs, axis=-1)
    return cat @ params["wp"].T + params["bp"][0]


if __name__ == "__main__":
    # Keep the pure-JAX reference in true f32 so the tolerance check is meaningful.
    jax.config.update("jax_default_matmul_precision", "highest")

    B, T, dim, heads = 2, 16, 64, 8
    key = jax.random.PRNGKey(0)
    kx, kp = jax.random.split(key)
    x = jax.random.normal(kx, (B, T, dim), jnp.float32)
    params = init_params(kp, dim, heads)

    out = multi_head_attention(x, params)
    out = jax.block_until_ready(out)

    ref = reference_mha(x, params)
    assert out.shape == (B, T, dim)
    assert jnp.allclose(out, ref, rtol=1e-4, atol=1e-5), float(jnp.max(jnp.abs(out - ref)))
    print("KERNEL_OK")
</pallas_src>

<mosaic_0001>
module attributes {stable_mosaic.version = 11 : i64} {
  func.func @_mha_kernel(%arg0: i32, %arg1: memref<16x64xf32, #tpu.memory_space<vmem>>, %arg2: memref<64x192xf32, #tpu.memory_space<vmem>>, %arg3: memref<1x192xf32, #tpu.memory_space<vmem>>, %arg4: memref<8x8x64xf32, #tpu.memory_space<vmem>>, %arg5: memref<1x64xf32, #tpu.memory_space<vmem>>, %arg6: memref<16x64xf32, #tpu.memory_space<vmem>>) attributes {dimension_semantics = [#tpu.dimension_semantics<parallel>], iteration_bounds = array<i64: 2>, scalar_prefetch = 0 : i64, scratch_operands = 0 : i64, tpu.core_type = #tpu.core_type<tc>, window_params = [{transform_indices = @transform_0, window_bounds = array<i64: 16, 64>}, {pipeline_mode = #tpu.pipeline_mode<synchronous>, transform_indices = @transform_1, window_bounds = array<i64: 64, 192>}, {pipeline_mode = #tpu.pipeline_mode<synchronous>, transform_indices = @transform_2, window_bounds = array<i64: 1, 192>}, {pipeline_mode = #tpu.pipeline_mode<synchronous>, transform_indices = @transform_3, window_bounds = array<i64: 8, 8, 64>}, {pipeline_mode = #tpu.pipeline_mode<synchronous>, transform_indices = @transform_4, window_bounds = array<i64: 1, 64>}, {transform_indices = @transform_5, window_bounds = array<i64: 16, 64>}]} {
    %c0 = arith.constant 0 : index
    %c0_0 = arith.constant 0 : index
    %0 = vector.load %arg1[%c0, %c0_0] : memref<16x64xf32, #tpu.memory_space<vmem>>, vector<16x64xf32>
    %c0_1 = arith.constant 0 : index
    %c0_2 = arith.constant 0 : index
    %1 = vector.load %arg2[%c0_1, %c0_2] : memref<64x192xf32, #tpu.memory_space<vmem>>, vector<64x192xf32>
    %cst = arith.constant dense<0.000000e+00> : vector<16x192xf32>
    %2 = tpu.matmul %0, %1, %cst {dimension_numbers = #tpu.dot_dimension_numbers<[1], [0], [0], [1], [0, 0, 1, 1], [], []>, precision = #tpu.contract_precision<fp32>} : vector<16x64xf32>, vector<64x192xf32>, vector<16x192xf32> -> vector<16x192xf32>
    %c0_3 = arith.constant 0 : index
    %c0_4 = arith.constant 0 : index
    %3 = vector.load %arg3[%c0_3, %c0_4] : memref<1x192xf32, #tpu.memory_space<vmem>>, vector<1x192xf32>
    %4 = vector.broadcast %3 : vector<1x192xf32> to vector<16x192xf32>
    %5 = arith.addf %2, %4 : vector<16x192xf32>
    %6 = vector.shape_cast %5 : vector<16x192xf32> to vector<16x24x8xf32>
    %7 = tpu.transpose %6, [1, 0, 2] : vector<16x24x8xf32> -> vector<24x16x8xf32>
    %8 = vector.extract_strided_slice %7 {offsets = [0, 0, 0], sizes = [8, 16, 8], strides = [1, 1, 1]} : vector<24x16x8xf32> to vector<8x16x8xf32>
    %9 = vector.extract_strided_slice %7 {offsets = [8, 0, 0], sizes = [8, 16, 8], strides = [1, 1, 1]} : vector<24x16x8xf32> to vector<8x16x8xf32>
    %10 = vector.extract_strided_slice %7 {offsets = [16, 0, 0], sizes = [8, 16, 8], strides = [1, 1, 1]} : vector<24x16x8xf32> to vector<8x16x8xf32>
    "tpu.trace_start"() <{level = 10 : i32, message = "hqd,hkd->hqk"}> : () -> ()
    %cst_5 = arith.constant dense<0.000000e+00> : vector<8x16x16xf32>
    %11 = tpu.matmul %8, %9, %cst_5 {dimension_numbers = #tpu.dot_dimension_numbers<[2], [2], [1], [1], [0, 0, 0, 1, 1, 1], [0], [0]>, precision = #tpu.contract_precision<fp32>} : vector<8x16x8xf32>, vector<8x16x8xf32>, vector<8x16x16xf32> -> vector<8x16x16xf32>
    "tpu.trace_stop"() : () -> ()
    %cst_6 = arith.constant dense<0xFF800000> : vector<8x16xf32>
    %12 = vector.multi_reduction <maximumf>, %11, %cst_6 [1] : vector<8x16x16xf32> to vector<8x16xf32>
    %13 = vector.shape_cast %12 : vector<8x16xf32> to vector<8x1x16xf32>
    %14 = vector.broadcast %13 : vector<8x1x16xf32> to vector<8x16x16xf32>
    %15 = arith.subf %11, %14 : vector<8x16x16xf32>
    %16 = math.exp %15 : vector<8x16x16xf32>
    %cst_7 = arith.constant dense<0.000000e+00> : vector<8x16xf32>
    %17 = vector.multi_reduction <add>, %16, %cst_7 [1] : vector<8x16x16xf32> to vector<8x16xf32>
    %18 = vector.shape_cast %17 : vector<8x16xf32> to vector<8x1x16xf32>
    %19 = tpu.reciprocal %18 : vector<8x1x16xf32> -> vector<8x1x16xf32>
    %20 = vector.broadcast %19 : vector<8x1x16xf32> to vector<8x16x16xf32>
    %21 = arith.mulf %16, %20 : vector<8x16x16xf32>
    "tpu.trace_start"() <{level = 10 : i32, message = "hqk,hkd->hqd"}> : () -> ()
    %cst_8 = arith.constant dense<0.000000e+00> : vector<8x16x8xf32>
    %22 = tpu.matmul %21, %10, %cst_8 {dimension_numbers = #tpu.dot_dimension_numbers<[2], [1], [1], [2], [0, 0, 0, 1, 1, 2], [0], [0]>, precision = #tpu.contract_precision<fp32>} : vector<8x16x16xf32>, vector<8x16x8xf32>, vector<8x16x8xf32> -> vector<8x16x8xf32>
    "tpu.trace_stop"() : () -> ()
    %c0_9 = arith.constant 0 : index
    %c0_10 = arith.constant 0 : index
    %c0_11 = arith.constant 0 : index
    %23 = vector.load %arg4[%c0_9, %c0_10, %c0_11] : memref<8x8x64xf32, #tpu.memory_space<vmem>>, vector<8x8x64xf32>
    "tpu.trace_start"() <{level = 10 : i32, message = "hqj,hjn->hqn"}> : () -> ()
    %cst_12 = arith.constant dense<0.000000e+00> : vector<8x16x64xf32>
    %24 = tpu.matmul %22, %23, %cst_12 {dimension_numbers = #tpu.dot_dimension_numbers<[2], [1], [1], [2], [0, 0, 0, 1, 1, 2], [0], [0]>, precision = #tpu.contract_precision<fp32>} : vector<8x16x8xf32>, vector<8x8x64xf32>, vector<8x16x64xf32> -> vector<8x16x64xf32>
    "tpu.trace_stop"() : () -> ()
    %cst_13 = arith.constant dense<0.000000e+00> : vector<16x64xf32>
    %25 = vector.multi_reduction <add>, %24, %cst_13 [0] : vector<8x16x64xf32> to vector<16x64xf32>
    %c0_14 = arith.constant 0 : index
    %c0_15 = arith.constant 0 : index
    %26 = vector.load %arg5[%c0_14, %c0_15] : memref<1x64xf32, #tpu.memory_space<vmem>>, vector<1x64xf32>
    %27 = vector.broadcast %26 : vector<1x64xf32> to vector<16x64xf32>
    %28 = arith.addf %25, %27 : vector<16x64xf32>
    %c0_16 = arith.constant 0 : index
    %c0_17 = arith.constant 0 : index
    %29 = vector.load %arg6[%c0_16, %c0_17] : memref<16x64xf32, #tpu.memory_space<vmem>>, vector<16x64xf32>
    tpu.vector_store %arg6[%c0_16, %c0_17], %28 {strides = array<i32>} : memref<16x64xf32, #tpu.memory_space<vmem>>, vector<16x64xf32>,
    return
  }
  func.func @transform_0(%arg0: i32) -> (i32, i32) {
    %c0_i32 = arith.constant 0 : i32
    %c0_i32_0 = arith.constant 0 : i32
    return %arg0, %c0_i32 : i32, i32
  }
  func.func @transform_1(%arg0: i32) -> (i32, i32) {
    %c0_i32 = arith.constant 0 : i32
    %c0_i32_0 = arith.constant 0 : i32
    %c0_i32_1 = arith.constant 0 : i32
    return %c0_i32, %c0_i32_0 : i32, i32
  }
  func.func @transform_2(%arg0: i32) -> (i32, i32) {
    %c0_i32 = arith.constant 0 : i32
    %c0_i32_0 = arith.constant 0 : i32
    %c0_i32_1 = arith.constant 0 : i32
    return %c0_i32, %c0_i32_0 : i32, i32
  }
  func.func @transform_3(%arg0: i32) -> (i32, i32, i32) {
    %c0_i32 = arith.constant 0 : i32
    %c0_i32_0 = arith.constant 0 : i32
    %c0_i32_1 = arith.constant 0 : i32
    %c0_i32_2 = arith.constant 0 : i32
    return %c0_i32, %c0_i32_0, %c0_i32_1 : i32, i32, i32
  }
  func.func @transform_4(%arg0: i32) -> (i32, i32) {
    %c0_i32 = arith.constant 0 : i32
    %c0_i32_0 = arith.constant 0 : i32
    %c0_i32_1 = arith.constant 0 : i32
    return %c0_i32, %c0_i32_0 : i32, i32
  }
  func.func @transform_5(%arg0: i32) -> (i32, i32) {
    %c0_i32 = arith.constant 0 : i32
    %c0_i32_0 = arith.constant 0 : i32
    return %arg0, %c0_i32 : i32, i32
  }
}

</mosaic_0001>

<bundles_post_ra>
// kernel: tpu_custom_call.1
= control target key start
LH: loop header
LB: loop body
LE: loop exit
PB: predicated region body
PF: predicated region fallthrough
CT: control target
= control target key end

     0   :  { %10 = vsyncpa [#allocation3], 0  ;;  %s19880_s0 = inlined_call_operand.hbm [shape: f32[32,64], index: 0, kind: input, shape index: {}]   ;;  %s19881_s1 = inlined_call_operand.hbm [shape: f32[64,192], index: 1, kind: input, shape index: {}]   ;;  %s19882_s2 = inlined_call_operand.vmem [shape: f32[1,192], index: 2, kind: input, shape index: {}]   ;;  %s19883_s3 = inlined_call_operand.hbm [shape: f32[8,8,64], index: 3, kind: input, shape index: {}]   ;;  %s19884_s4 = inlined_call_operand.vmem [shape: f32[1,64], index: 4, kind: input, shape index: {}]   ;;  %s19885_s5 = inlined_call_operand.hbm [shape: f32[32,64], index: 5, kind: output, shape index: {}]  }
   0x1   :  { %12 = vsyncpa [#allocation3 + $0x1], 0 }
   0x2   :  { %13 = vsyncpa [#allocation6], 0 }
   0x3   :  { %14 = vsyncpa [#allocation4], 0 }
   0x4   :  { %16 = vsyncpa [#allocation4 + $0x1], 0  ;;  %s17138_s18 = smov 0   ;;  %s17140_s19 = smov 0  }
   0x5   :  { %s17142_s20 = smov 0   ;;  %s17144_s21 = smov 0  }
   0x6 LB: > { %s17159_s22 = sadd.s32 4294967295, %s17079_s21   ;;  %s15284_s23 = sadd.s32 4294967294, %s17079_s21   ;;  %s17079_s21 = sphi %s17144_s21, %s19956_s21   ;;  %s17075_s20 = sphi %s17142_s20, %s19955_s20   ;;  %s17071_s19 = sphi %s17140_s19, %s19954_s19   ;;  %s17067_s18 = sphi %s17138_s18, %s19953_s18  }
   0x7   : > { %p42_p0 = scmp.ne.s32.totalorder %s17071_s19, %s17067_s18  ;;  %p19886_p1 = scmp.eq.s32.totalorder %s17159_s22, 0 }
   0x8   : > { %p156_p3 = scmp.eq.s32.totalorder %s15284_s23, 1  ;;  %p15285_p5 = scmp.ge.s32.totalorder %s17079_s21, 1 }
   0x9   : > { %p17168_p4 = por %p19886_p1, %p42_p0  ;;  %p163_p7 = scmp.lt.s32.totalorder %s17079_s21, 3 }
   0xa   : > { %p17173_p6 = por %p156_p3, %p42_p0  ;;  %s17081_s27 = smov [#allocation5]  }
   0xb   : > { %s19891_s24 = scalar_select %p17168_p4, 1, 0 }
   0xc   : > { %s19892_s25 = scalar_select %p17173_p6, 1, 0 }
   0xd   : > { %p17178_p8 = pnand %p15285_p5, %p163_p7  ;;  %s175_s28 = sshll.u32 %s17081_s27, 4  ;;  %s176_s28 = int_to_ptr.vmem [resolvable:$true] %s175_s28 }
   0xe   : > { %s17082_s30 = smov [#allocation7]   ;;  %s16942_s7 = scalar_lea.vmem %s176_s28, 2048 }
   0xf   : > { %s19893_s26 = scalar_select %p17178_p8, 1, 0 }
  0x10   : > { %p16805_p9 = pneg %p17178_p8  ;;  %s191_s6 = sshll.u32 %s17082_s30, 4  ;;  %s192_s6 = int_to_ptr.vmem [resolvable:$true] %s191_s6 }
  0x11   : > { %p16943_p13 = scmp.ne.s32.totalorder %s176_s28, %s16942_s7  ;;  %p16950_p5 = scmp.lt.s32.totalorder %s176_s28, %s176_s28 }
  0x12   : > { %p17187_p11 = pnand %p16805_p9, %p19886_p1  ;;  %p16951_p7 = scmp.lt.s32.totalorder %s16942_s7, %s16942_s7 }
  0x14   : > { %p16933_p12 = pneg %p17187_p11  ;;  %p16952_p10 = por %p16951_p7, %p16950_p5 }
  0x16   : > { %p16945_p0 = pnand %p16943_p13, %p16933_p12 }
  0x18   : > { %p16946_p3 = pneg %p16945_p0 }
  0x1a   : > { %p16953_p9 = pnand %p16952_p10, %p16946_p3 }
  0x1c   : > { %16956 = shalt.err (!%p16953_p9)
}
  0x1d   : > { %s17083_s8 = smov 256   ;;  %s17084_s9 = smov 16  }
  0x1e   : > { %16808 = dma.hbm_to_vmem [thread:$0]  (!%p17187_p11), %s19881_s1, 2048, %s176_s28, [#allocation6], %s17083_s8, %s17083_s8, %s17084_s9  }
  0x1f   : > { %s16968_s12 = scalar_lea.vmem %s192_s6, 1024  ;;  %p16976_p2 = scmp.lt.s32.totalorder %s192_s6, %s192_s6 }
  0x20   : > { %p16969_p1 = scmp.ne.s32.totalorder %s192_s6, %s16968_s12  ;;  %p16977_p6 = scmp.lt.s32.totalorder %s16968_s12, %s16968_s12 }
  0x22   : > { %p16971_p13 = pnand %p16969_p1, %p16933_p12  ;;  %p16978_p5 = por %p16977_p6, %p16976_p2 }
  0x24   : > { %p16972_p0 = pneg %p16971_p13 }
  0x26   : > { %p16979_p10 = pnand %p16978_p5, %p16972_p0 }
  0x28   : > { %16982 = shalt.err (!%p16979_p10)
}
  0x29   : > { %s19887_s13 = smov 128   ;;  %s17086_s14 = smov 8  }
  0x2a   : > { %16811 = dma.hbm_to_vmem [thread:$0]  (!%p17187_p11), %s19883_s3, 1024, %s192_s6, [#allocation6], %s19887_s13, %s19887_s13, %s17086_s14  }
  0x2b   : > { %s17213_s17 = sadd.s32 1, %s17079_s21   ;;  %s29_s27 = sadd.s32 1, %s17075_s20 }
  0x2c   : > { %s26_s23 = ssub.s32 %s17079_s21, %s17213_s17  ;;  %p36_p2 = scmp.ne.s32.totalorder %s17075_s20, %s17071_s19 }
  0x2d   : > { %p27_p1 = scmp.eq.s32.totalorder %s26_s23, 0  ;;  %p37_p6 = scmp.eq.s32.totalorder %s17079_s21, 0 }
  0x2e   : > { %p19895_p3 = scmp.eq.s32.totalorder %s17159_s22, 1  ;;  %p16822_p9 = scmp.lt.s32.totalorder %s17079_s21, 2 }
  0x2f   : > { %s17222_s28 = scalar_select %p27_p1, %s17075_s20, %s29_s27  }
  0x30   : > { %p38_p12 = por %p37_p6, %p36_p2  ;;  %p17226_p7 = por %p19895_p3, %p36_p2 }
  0x31   : > { %s208_s30 = sand.u32 1, %s17075_s20   ;;  %s15351_s6 = sshll.u32 %s17079_s21, 8 }
  0x32   : > { %s19896_s29 = scalar_select %p17226_p7, 1, 0 }
  0x33   : > { %s15289_s7 = sshll.u32 %s208_s30, 4  ;;  %s17236_s10 = scalar_lea.hbm %s19880_s0, %s15351_s6 }
  0x34   : > { %s212_s11 = scalar_lea.vmem [#allocation2], %s15289_s7  ;;  %p17240_p11 = pnand %p16822_p9, %p38_p12 }
  0x35   : > { %s219_s12 = sshll.u32 %s212_s11, 4  ;;  %s17244_s16 = scalar_lea.sflag [#allocation3], %s208_s30  ;;  %s17238_s12 = int_to_ptr.vmem [resolvable:$true] %s219_s12 }
  0x36   : > { %s16983_s23 = scalar_lea.hbm %s17236_s10, 256  ;;  %p16985_p0 = pneg %p17240_p11 }
  0x37   : > { %p16984_p13 = scmp.ne.s32.totalorder %s17236_s10, %s16983_s23  ;;  %s16988_s7 = scalar_lea.hbm %s19880_s0, 512 }
  0x38   : > { %p16989_p1 = scmp.lt.s32.totalorder %s17236_s10, %s19880_s0  ;;  %p16990_p2 = scmp.lt.s32.totalorder %s16988_s7, %s16983_s23 }
  0x39   : > { %p16986_p5 = pnand %p16985_p0, %p16984_p13 }
  0x3a   : > { %p16991_p6 = por %p16990_p2, %p16989_p1 }
  0x3b   : > { %p16987_p10 = pneg %p16986_p5 }
  0x3d   : > { %p16992_p12 = pnand %p16991_p6, %p16987_p10 }
  0x3f   : > { %16995 = shalt.err (!%p16992_p12)
}
  0x40   : > { %s16996_s30 = scalar_lea.vmem %s17238_s12, 256  ;;  %s17087_s11 = smov [#allocation2]  }
  0x41   : > { %p16997_p3 = scmp.ne.s32.totalorder %s17238_s12, %s16996_s30  ;;  %s17001_s13 = sshll.u32 %s17087_s11, 4  ;;  %s17002_s13 = int_to_ptr.vmem [resolvable:$false] %s17001_s13 }
  0x42   : > { %s17003_s27 = scalar_lea.vmem %s17002_s13, 512  ;;  %p17004_p5 = scmp.lt.s32.totalorder %s17238_s12, %s17002_s13 }
  0x43   : > { %p16999_p9 = pnand %p16997_p3, %p16985_p0  ;;  %p17005_p7 = scmp.lt.s32.totalorder %s17003_s27, %s16996_s30 }
  0x45   : > { %p17000_p13 = pneg %p16999_p9  ;;  %p17006_p4 = por %p17005_p7, %p17004_p5 }
  0x47   : > { %p17007_p8 = pnand %p17006_p4, %p17000_p13 }
  0x49   : > { %17010 = shalt.err (!%p17007_p8)
}
  0x4a   : > { %s19898_s23 = smov 128   ;;  %p19899_p0 = scmp.ne.s32.totalorder %s19893_s26, 0 }
  0x4b   : > { %16815 = dma.hbm_to_vmem [thread:$0]  (!%p17240_p11), %s17236_s10, 256, %s17238_s12, %s17244_s16, %s19898_s23, %s19898_s23, %s17086_s14  }
  0x4c   : > { %231 = sbr.rel (%p19899_p0) target bundleno = 1445 (0x5a5), region = 40 }
  0x51   : > { %s17271_s6 = sand.u32 1, %s17071_s19   ;;  %p19900_p4 = scmp.ne.s32.totalorder %s19891_s24, 0 }
  0x52   : > { %s15293_s13 = sshll.u32 %s17271_s6, 4  ;;  %s234_s7 = scalar_lea.sflag [#allocation3], %s17271_s6 }
  0x53   : > { %s17277_s15 = scalar_lea.vmem [#allocation2], %s15293_s13 }
  0x54   : > { %17054 = dma.done.wait (%p19900_p4), %s234_s7, 256  }
  0x55   : > { %17056 = vsyncadd (%p19900_p4), %s234_s7, 4294967040  ;;  %p19901_p8 = scmp.eq.s32.totalorder %s17159_s22, 0 }
  0x57   : > { %17058 = dma.done.wait (%p19901_p8), [#allocation6], 3072   ;;  %p19902_p7 = pmov %p19901_p8 }
  0x58   : > { %v17088_v0 = vmov 0.0   ;;  %v291_v1 = vld [vmem:[#allocation5 + $0x78] sm:$0xff]  ;;  %v290_v2 = vld [vmem:[#allocation5 + $0x70] sm:$0xff]  ;;  %v289_v3 = vld [vmem:[#allocation5 + $0x68] sm:$0xff]  ;;  %vm304_vm0 = vcmask 523264   ;;  %s17089_s14 = smov 56  }
  0x59   : > { %17060 = vsyncadd (%p19902_p7), [#allocation6], 4294964224  ;;  %391 = vmatprep.mubr.f32.mxu0 %v17088_v0  ;;  %558 = vmatprep.mubr.f32.mxu1 %v17088_v0  ;;  %v17289_v4 = vand.u32 4294901760, %v291_v1  ;;  %v17291_v5 = vand.u32 4294901760, %v290_v2  ;;  %v17293_v6 = vand.u32 4294901760, %v289_v3  ;;  %v288_v7 = vld [vmem:[#allocation5 + $0x60] sm:$0xff] }
  0x5a   : > { %v287_v8 = vld [vmem:[#allocation5 + $0x58] sm:$0xff]  ;;  %v286_v9 = vld [vmem:[#allocation5 + $0x50] sm:$0xff]  ;;  %v17295_v10 = vand.u32 4294901760, %v288_v7  ;;  %v285_v13 = vld [vmem:[#allocation5 + $0x48] sm:$0xff]  ;;  %s17090_s10 = smov 64   ;;  %s17091_s12 = smov 40  }
  0x5b   : > { %v17297_v11 = vand.u32 4294901760, %v287_v8  ;;  %v17299_v12 = vand.u32 4294901760, %v286_v9  ;;  %v284_v14 = vld [vmem:[#allocation5 + $0x40] sm:$0xff]  ;;  %v283_v15 = vld [vmem:[#allocation5 + $0x38] sm:$0xff]  ;;  %328 = vmatprep.subr.mxu0 %v17289_v4  ;;  %v17302_v16 = vand.u32 4294901760, %v285_v13  ;;  %v17309_v19 = vsub.f32 %v291_v1, %v17289_v4  ;;  %v282_v20 = vld [vmem:[#allocation5 + $0x30] sm:$0xff] }
  0x5c   : > { %v17304_v17 = vand.u32 4294901760, %v284_v14  ;;  %v17306_v18 = vand.u32 4294901760, %v283_v15  ;;  %v17311_v21 = vld [vmem:[#allocation5 + $0x28] sm:$0xff]  ;;  %v17313_v22 = vld [vmem:[#allocation5 + $0x20] sm:$0xff]  ;;  %330 = vmatpush1.msra.mxu0 %v17291_v5  ;;  %v17316_v23 = vand.u32 4294901760, %v282_v20  ;;  %v17319_v24 = vsub.f32 %v290_v2, %v17291_v5  ;;  %v17327_v27 = vld [vmem:[#allocation5 + $0x18] sm:$0xff] }
  0x5d   : > { %v17322_v25 = vand.u32 4294901760, %v17311_v21  ;;  %v17325_v26 = vsub.f32 %v289_v3, %v17293_v6  ;;  %v17329_v28 = vld [vmem:[#allocation5 + $0x10] sm:$0xff]  ;;  %v17331_v29 = vld [vmem:[#allocation5 + $0x8] sm:$0xff]  ;;  %332 = vmatprep.subr.mxu0 %v17293_v6  ;;  %v432_v30 = vand.u32 4294901760, %v17309_v19  ;;  %v17336_v31 = vand.u32 4294901760, %v17313_v22  ;;  %v17353_v38 = vld [vmem:[#allocation5] sm:$0xff] }
  0x5e   : > { %v17339_v32 = vsub.f32 %v288_v7, %v17295_v10  ;;  %v17342_v33 = vand.u32 4294901760, %v17327_v27  ;;  %334 = vmatpush1.msra.mxu0 %v17295_v10  ;;  %v438_v34 = vand.u32 4294901760, %v17319_v24  ;;  %v17348_v36 = vsub.f32 %v287_v8, %v17297_v11  ;;  %v274_v51 = vld [vmem:[%s17277_s15] sm:$0xff]  ;;  %v275_v1 = vld [vmem:[%s17277_s15 + $0x8] sm:$0xff]  ;;  %s17092_s16 = smov 48   ;;  %s17093_s8 = smov 112  }
  0x5f   : > { %v444_v35 = vand.u32 4294901760, %v17325_v26  ;;  %v17351_v37 = vand.u32 4294901760, %v17329_v28  ;;  %336 = vmatprep.subr.mxu0 %v17297_v11  ;;  %v433_v39 = vsub.f32 %v17309_v19, %v432_v30  ;;  %v17361_v41 = vsub.f32 %v286_v9, %v17299_v12  ;;  %s17094_s9 = smov 120   ;;  %s17095_s30 = smov 104  }
  0x60   : > { %v450_v40 = vand.u32 4294901760, %v17339_v32  ;;  %v17364_v42 = vand.u32 4294901760, %v17331_v29  ;;  %338 = vmatpush1.msra.mxu0 %v17299_v12  ;;  %v439_v43 = vsub.f32 %v17319_v24, %v438_v34  ;;  %v456_v45 = vand.u32 4294901760, %v17348_v36  ;;  %s17096_s11 = smov 24   ;;  %s17097_s27 = smov 32  }
  0x61   : > { %v445_v44 = vsub.f32 %v17325_v26, %v444_v35  ;;  %v17375_v46 = vsub.f32 %v285_v13, %v17302_v16  ;;  %340 = vmatprep.subr.mxu0 %v17302_v16  ;;  %v434_v47 = vand.u32 4294901760, %v433_v39  ;;  %v462_v49 = vand.u32 4294901760, %v17361_v41  ;;  %s17098_s23 = smov 8   ;;  %s17099_s7 = smov 16  }
  0x62   : > { %v451_v48 = vsub.f32 %v17339_v32, %v450_v40  ;;  %v17383_v50 = vand.u32 4294901760, %v17353_v38  ;;  %342 = vmatpush1.msra.mxu0 %v17304_v17  ;;  %v440_v52 = vand.u32 4294901760, %v439_v43  ;;  %v457_v54 = vsub.f32 %v17348_v36, %v456_v45  ;;  %s17100_s15 = smov 88   ;;  %s17101_s24 = smov 96  }
  0x63   : > { %v446_v53 = vand.u32 4294901760, %v445_v44  ;;  %v468_v55 = vand.u32 4294901760, %v17375_v46  ;;  %344 = vmatprep.subr.mxu0 %v17306_v18  ;;  %435 = vmatprep.subr.mxu1 %v434_v47  ;;  %v463_v57 = vsub.f32 %v17361_v41, %v462_v49  ;;  %v17396_v58 = vsub.f32 %v284_v14, %v17304_v17  ;;  %s17102_s26 = smov 72   ;;  %p19950_p10 = scmp.ne.s32.totalorder %s19896_s29, 0 }
  0x64   : > { %v452_v56 = vand.u32 4294901760, %v451_v48  ;;  %v17399_v59 = vsub.f32 %v283_v15, %v17306_v18  ;;  %346 = vmatpush1.msra.mxu0 %v17316_v23  ;;  %441 = vmatpush1.msra.mxu1 %v440_v52  ;;  %v458_v60 = vand.u32 4294901760, %v457_v54  ;;  %v306_v62 = vsel %vm304_vm0, %v274_v51, 0 }
  0x65   : > { %v469_v61 = vsub.f32 %v17375_v46, %v468_v55  ;;  %v17407_v63 = vsub.f32 %v282_v20, %v17316_v23  ;;  %348 = vmatprep.subr.mxu0 %v17322_v25  ;;  %447 = vmatprep.subr.mxu1 %v446_v53  ;;  %v464_v2 = vand.u32 4294901760, %v463_v57  ;;  %v474_v3 = vand.u32 4294901760, %v17396_v58 }
  0x66   : > { %v480_v7 = vand.u32 4294901760, %v17399_v59  ;;  %v17413_v8 = vand.u32 4294901760, %v306_v62  ;;  %350 = vmatpush1.msra.mxu0 %v17336_v31  ;;  %453 = vmatpush1.msra.mxu1 %v452_v56  ;;  %v17419_v14 = vsub.f32 %v17311_v21, %v17322_v25  ;;  %v17423_v15 = vsub.f32 %v17313_v22, %v17336_v31 }
  0x67   : > { %v470_v9 = vand.u32 4294901760, %v469_v61  ;;  %v486_v13 = vand.u32 4294901760, %v17407_v63  ;;  %352 = vmatprep.subr.mxu0 %v17342_v33  ;;  %459 = vmatprep.subr.mxu1 %v458_v60  ;;  %v475_v20 = vsub.f32 %v17396_v58, %v474_v3  ;;  %v309_v21 = vsel %vm304_vm0, %v275_v1, 0 }
  0x68   : > { %v481_v39 = vsub.f32 %v17399_v59, %v480_v7  ;;  %v17433_v43 = vsub.f32 %v306_v62, %v17413_v8  ;;  %354 = vmatpush1.msra.mxu0 %v17351_v37  ;;  %465 = vmatpush1.msra.mxu1 %v464_v2  ;;  %v492_v44 = vand.u32 4294901760, %v17419_v14  ;;  %v498_v47 = vand.u32 4294901760, %v17423_v15 }
  0x69   : > { %v487_v22 = vsub.f32 %v17407_v63, %v486_v13  ;;  %v17444_v48 = vsub.f32 %v17327_v27, %v17342_v33  ;;  %356 = vmatprep.subr.mxu0 %v17364_v42  ;;  %471 = vmatprep.subr.mxu1 %v470_v9  ;;  %v476_v51 = vand.u32 4294901760, %v475_v20  ;;  %v17450_v54 = vsub.f32 %v17329_v28, %v17351_v37 }
  0x6a   : > { %v482_v52 = vand.u32 4294901760, %v481_v39  ;;  %v394_v53 = vand.u32 4294901760, %v17433_v43  ;;  %358 = vmatpush1.msra.mxu0 %v17383_v50  ;;  %v493_v57 = vsub.f32 %v17419_v14, %v492_v44  ;;  %v499_v27 = vsub.f32 %v17423_v15, %v498_v47 }
  0x6b   : > { %v488_v56 = vand.u32 4294901760, %v487_v22  ;;  %v504_v60 = vand.u32 4294901760, %v17444_v48  ;;  %477 = vmatpush1.msra.mxu1 %v476_v51  ;;  %591 = vmatprep.subr.mxu0 %v17309_v19  ;;  %v510_v61 = vand.u32 4294901760, %v17450_v54  ;;  %v17467_v62 = vsub.f32 %v17331_v29, %v17364_v42 }
  0x6c   : > { %v395_v28 = vsub.f32 %v17433_v43, %v394_v53  ;;  %v17471_v1 = vsub.f32 %v17353_v38, %v17383_v50  ;;  %483 = vmatprep.subr.mxu1 %v482_v52  ;;  %v494_v2 = vand.u32 4294901760, %v493_v57  ;;  %v500_v9 = vand.u32 4294901760, %v499_v27 }
  0x6d   : > { %v505_v20 = vsub.f32 %v17444_v48, %v504_v60  ;;  %v17476_v39 = vand.u32 4294901760, %v309_v21  ;;  %489 = vmatpush1.msra.mxu1 %v488_v56  ;;  %v511_v29 = vsub.f32 %v17450_v54, %v510_v61  ;;  %v516_v51 = vand.u32 4294901760, %v17467_v62 }
  0x6e   : > { %v396_v22 = vand.u32 4294901760, %v395_v28  ;;  %v522_v38 = vand.u32 4294901760, %v17471_v1  ;;  %495 = vmatprep.subr.mxu1 %v494_v2  ;;  %vm2775_vm1 = vcmask 64512   ;;  %vm6888_vm2 = vcmask 130048  }
  0x6f   : > { %v506_v52 = vand.u32 4294901760, %v505_v20  ;;  %v17484_v57 = vsub.f32 %v309_v21, %v17476_v39  ;;  %501 = vmatpush1.msra.mxu1 %v500_v9  ;;  %v512_v27 = vand.u32 4294901760, %v511_v29  ;;  %v517_v56 = vsub.f32 %v17467_v62, %v516_v51 }
  0x70   : > { %397 = vmatmul.mubr.f32.vlgmr.msra.gmra.mxu0 %v396_v22  ;;  %v523_v28 = vsub.f32 %v17471_v1, %v522_v38 }
  0x71   : > { %594 = vmatpush1.msra.mxu0 %v17319_v24  ;;  %507 = vmatprep.subr.mxu1 %v506_v52  ;;  %v405_v2 = vand.u32 4294901760, %v17484_v57  ;;  %v518_v21 = vand.u32 4294901760, %v517_v56  ;;  %v17105_v56 = vmov 1934713408  }
  0x72   : > { %597 = vmatprep.subr.mxu0 %v17325_v26  ;;  %513 = vmatpush1.msra.mxu1 %v512_v27  ;;  %v524_v20 = vand.u32 4294901760, %v523_v28  ;;  %v1210_v28 = vunpack.c.l.s4 %v17105_v56 }
  0x73   : > { %600 = vmatpush1.msra.mxu0 %v17339_v32  ;;  %402 = vmatprep.mubr.f32.mxu0 %v17088_v0  ;;  %v406_v9 = vsub.f32 %v17484_v57, %v405_v2 }
  0x74   : > { %603 = vmatprep.subr.mxu0 %v17348_v36  ;;  %519 = vmatprep.subr.mxu1 %v518_v21 }
  0x75   : > { %606 = vmatpush1.msra.mxu0 %v17361_v41  ;;  %525 = vmatpush1.msra.mxu1 %v524_v20  ;;  %v407_v22 = vand.u32 4294901760, %v406_v9  ;;  %v1211_v9 = vunpack.c.0.s8 %v1210_v28 }
  0x76   : > { %609 = vmatprep.subr.mxu0 %v17375_v46  ;;  %560 = vmatmul.mubr.f32.vlgmr.msra.gmra.mxu1 %v17413_v8 }
  0x77   : > { %612 = vmatpush1.msra.mxu0 %v17396_v58  ;;  %703 = vmatprep.subr.mxu1 %v17289_v4 }
  0x78   : > { %615 = vmatprep.subr.mxu0 %v17399_v59  ;;  %705 = vmatpush1.msra.mxu1 %v17291_v5 }
  0x79   : > { %618 = vmatpush1.msra.mxu0 %v17407_v63  ;;  %707 = vmatprep.subr.mxu1 %v17293_v6 }
  0x7a   : > { %621 = vmatprep.subr.mxu0 %v17419_v14  ;;  %709 = vmatpush1.msra.mxu1 %v17295_v10 }
  0x7b   : > { %624 = vmatpush1.msra.mxu0 %v17423_v15  ;;  %711 = vmatprep.subr.mxu1 %v17297_v11 }
  0x7c   : > { %408 = vmatmul.mubr.f32.gmra.mxu0 %v407_v22  ;;  %627 = vmatprep.subr.mxu0 %v17444_v48 }
  0x7d   : > { %630 = vmatpush1.msra.mxu0 %v17450_v54  ;;  %713 = vmatpush1.msra.mxu1 %v17299_v12 }
  0x7e   : > { %633 = vmatprep.subr.mxu0 %v17467_v62  ;;  %715 = vmatprep.subr.mxu1 %v17302_v16 }
  0x7f   : > { %636 = vmatpush1.msra.mxu0 %v17471_v1  ;;  %669 = vmatprep.mubr.f32.mxu0 %v17088_v0 }
  0x80   : > { %717 = vmatpush1.msra.mxu1 %v17304_v17  ;;  %672 = vmatmul.mubr.f32.vlgmr.msra.gmra.mxu0 %v17433_v43 }
  0x81   : > { %719 = vmatprep.subr.mxu1 %v17306_v18  ;;  %804 = vmatprep.subr.mxu0 %v432_v30 }
  0x82   : > { %721 = vmatpush1.msra.mxu1 %v17316_v23  ;;  %808 = vmatpush1.msra.mxu0 %v438_v34 }
  0x83   : > { %565 = vmatprep.mubr.f32.mxu1 %v17088_v0  ;;  %723 = vmatprep.subr.mxu1 %v17322_v25 }
  0x84   : > { %812 = vmatprep.subr.mxu0 %v444_v35  ;;  %567 = vmatmul.mubr.f32.gmra.mxu1 %v17476_v39 }
  0x85   : > { %725 = vmatpush1.msra.mxu1 %v17336_v31  ;;  %816 = vmatpush1.msra.mxu0 %v450_v40 }
  0x86   : > { %677 = vmatprep.mubr.f32.mxu0 %v17088_v0  ;;  %727 = vmatprep.subr.mxu1 %v17342_v33 }
  0x87   : > { %820 = vmatprep.subr.mxu0 %v456_v45  ;;  %680 = vmatmul.mubr.f32.gmra.mxu0 %v17484_v57  ;;  %v17104_v57 = vmov 1983009808  }
  0x88   : > { %729 = vmatpush1.msra.mxu1 %v17351_v37  ;;  %824 = vmatpush1.msra.mxu0 %v462_v49  ;;  %v1146_v27 = vunpack.c.l.s4 %v17104_v57 }
  0x89   : > { %731 = vmatprep.subr.mxu1 %v17364_v42  ;;  %828 = vmatprep.subr.mxu0 %v468_v55 }
  0x8a   : > { %733 = vmatpush1.msra.mxu1 %v17383_v50  ;;  %766 = vmatprep.mubr.f32.mxu1 %v17088_v0 }
  0x8b   : > { %832 = vmatpush1.msra.mxu0 %v474_v3  ;;  %770 = vmatmul.mubr.f32.vlgmr.msra.gmra.mxu1 %v394_v53 }
  0x8c   : > { %836 = vmatprep.subr.mxu0 %v480_v7  ;;  %929 = vmatprep.subr.mxu1 %v17289_v4 }
  0x8d   : > { %840 = vmatpush1.msra.mxu0 %v486_v13  ;;  %931 = vmatpush1.msra.mxu1 %v17291_v5 }
  0x8e   : > { %844 = vmatprep.subr.mxu0 %v492_v44  ;;  %933 = vmatprep.subr.mxu1 %v17293_v6 }
  0x8f   : > { %775 = vmatprep.mubr.f32.mxu1 %v17088_v0  ;;  %848 = vmatpush1.msra.mxu0 %v498_v47 }
  0x90   : > { %935 = vmatpush1.msra.mxu1 %v17295_v10  ;;  %852 = vmatprep.subr.mxu0 %v504_v60  ;;  %v294_v10 = vlaneseq }
  0x91   : > { %779 = vmatmul.mubr.f32.gmra.mxu1 %v405_v2  ;;  %937 = vmatprep.subr.mxu1 %v17297_v11  ;;  %v1147_v2 = vunpack.c.0.s8 %v1146_v27 }
  0x92   : > { %856 = vmatpush1.msra.mxu0 %v510_v61  ;;  %939 = vmatpush1.msra.mxu1 %v17299_v12 }
  0x93   : > { %860 = vmatprep.subr.mxu0 %v516_v51  ;;  %941 = vmatprep.subr.mxu1 %v17302_v16  ;;  %v17601_v16 = vshrl.u32 %v294_v10, 7 }
  0x94   : > { %864 = vmatpush1.msra.mxu0 %v522_v38  ;;  %897 = vmatprep.mubr.f32.mxu0 %v17088_v0 }
  0x95   : > { %943 = vmatpush1.msra.mxu1 %v17304_v17  ;;  %899 = vmatmul.mubr.f32.vlgmr.msra.gmra.mxu0 %v17413_v8  ;;  %v296_v19 = vsub.s32 0, %v17601_v16  ;;  %v300_v15 = vsub.s32 1, %v17601_v16  ;;  %v17715_v22 = vsub.s32 %v1147_v2, %v17601_v16 }
  0x96   : > { %945 = vmatprep.subr.mxu1 %v17306_v18  ;;  %904 = vmatprep.mubr.f32.mxu0 %v17088_v0 }
  0x97   : > { %947 = vmatpush1.msra.mxu1 %v17316_v23  ;;  %992 = vmatprep.mubr.f32.mxu1 %v17088_v0 }
  0x98   : > { %949 = vmatprep.subr.mxu1 %v17322_v25 }
  0x99   : > { %951 = vmatpush1.msra.mxu1 %v17336_v31  ;;  %906 = vmatmul.mubr.f32.gmra.mxu0 %v17476_v39 }
  0x9a   : > { %953 = vmatprep.subr.mxu1 %v17342_v33 }
  0x9b   : > { %955 = vmatpush1.msra.mxu1 %v17351_v37 }
  0x9c   : > { %957 = vmatprep.subr.mxu1 %v17364_v42 }
  0x9d   : > { %959 = vmatpush1.msra.mxu1 %v17383_v50 }
  0x9e   : > { %994 = vmatmul.mubr.f32.vlgmr.msra.gmra.mxu1 %v17413_v8 }
  0x9f   : > { %999 = vmatprep.mubr.f32.mxu1 %v17088_v0  ;;  %v17609_v0 = vld [vmem:[%s19882_s2] sm:$0x3] }
  0xa0   : > { %v297_v25 = vrot.slane %v17609_v0, %v296_v19  ;;  %v301_v43 = vrot.slane %v17609_v0, %v300_v15 }
  0xa2   : > { %1001 = vmatmul.mubr.f32.gmra.mxu1 %v17476_v39 }
 0x130   : > { %v398_v4 = vpop.f32.mrf.mxu0 }
 0x131   : > { %v399_v31 = vadd.f32 %v398_v4, %v297_v25 }
 0x132   : > { %v17597_v5 = vpop.f32.mrf.mxu0 }
 0x133   : > { %v401_v47 = vadd.f32 %v17597_v5, %v301_v43 }
 0x136   : > { %v561_v6 = vpop.f32.mrf.mxu1 }
 0x137   : > { %v562_v34 = vadd.f32 %v561_v6, %v399_v31 }
 0x138   : > { %v17599_v12 = vpop.f32.mrf.mxu1 }
 0x139   : > { %v564_v53 = vadd.f32 %v17599_v12, %v401_v47 }
 0x13c   : > { %v409_v11 = vpop.f32.mrf.mxu0 }
 0x13d   : > { %v410_v45 = vadd.f32 %v409_v11, %v297_v25 }
 0x13e   : > { %v17603_v17 = vpop.f32.mrf.mxu0 }
 0x13f   : > { %v412_v44 = vadd.f32 %v17603_v17, %v301_v43  ;;  %v17718_v17 = vsub.s32 %v1211_v9, %v17601_v16 }
 0x140   : > { %v673_v23 = vpop.f32.mrf.mxu0 }
 0x141   : > { %v674_v37 = vadd.f32 %v673_v23, %v562_v34 }
 0x142   : > { %v17614_v26 = vpop.f32.mrf.mxu0 }
 0x143   : > { %v676_v54 = vadd.f32 %v17614_v26, %v564_v53 }
 0x144   : > { %v568_v18 = vpop.f32.mrf.mxu1 }
 0x145   : > { %v569_v55 = vadd.f32 %v568_v18, %v410_v45 }
 0x146   : > { %v17611_v24 = vpop.f32.mrf.mxu1 }
 0x147   : > { %v681_v32 = vpop.f32.mrf.mxu0  ;;  %v571_v48 = vadd.f32 %v17611_v24, %v412_v44 }
 0x148   : > { %v682_v63 = vadd.f32 %v681_v32, %v569_v55 }
 0x149   : > { %v17618_v35 = vpop.f32.mrf.mxu0 }
 0x14a   : > { %v684_v60 = vadd.f32 %v17618_v35, %v571_v48 }
 0x14b   : > { %v771_v30 = vpop.f32.mrf.mxu1 }
 0x14c   : > { %v772_v41 = vadd.f32 %v771_v30, %v674_v37 }
 0x14d   : > { %v17616_v33 = vpop.f32.mrf.mxu1 }
 0x14e   : > { %v774_v62 = vadd.f32 %v17616_v33, %v676_v54 }
 0x151   : > { %v780_v36 = vpop.f32.mrf.mxu1 }
 0x152   : > { %v781_v7 = vadd.f32 %v780_v36, %v682_v63 }
 0x153   : > { %v17620_v42 = vpop.f32.mrf.mxu1 }
 0x154   : > { %v783_v1 = vadd.f32 %v17620_v42, %v684_v60 }
 0x155   : > { %v900_v40 = vpop.f32.mrf.mxu0 }
 0x156   : > { %v901_v46 = vadd.f32 %v900_v40, %v772_v41 }
 0x157   : > { %v902_v58 = vpop.f32.mrf.mxu0 }
 0x158   : > { %v903_v29 = vadd.f32 %v902_v58, %v774_v62 }
 0x159   : > { %v907_v3 = vpop.f32.mrf.mxu0 }
 0x15a   : > { %v908_v13 = vadd.f32 %v907_v3, %v781_v7 }
 0x15b   : > { %v909_v61 = vpop.f32.mrf.mxu0 }
 0x15c   : > { %v910_v51 = vadd.f32 %v909_v61, %v783_v1 }
 0x15e   : > { %v995_v49 = vpop.f32.mrf.mxu1 }
 0x15f   : > { %v17622_v50 = vadd.f32 %v995_v49, %v901_v46 }
 0x160   : > { %v997_v59 = vpop.f32.mrf.mxu1 }
 0x161   : > { %1057 = vrot.lane.b32.xlu1 %v17622_v50, %s17089_s14  ;;  %1051 = vrot.lane.b32.xlu0 %v17622_v50, %s17090_s10  ;;  %v17682_v38 = vadd.f32 %v997_v59, %v903_v29 }
 0x162   : > { %v1002_v8 = vpop.f32.mrf.mxu1 }
 0x163   : > { %v17632_v14 = vadd.f32 %v1002_v8, %v908_v13 }
 0x164   : > { %v1004_v39 = vpop.f32.mrf.mxu1 }
 0x165   : > { %1069 = vrot.lane.b32.xlu1 %v17622_v50, %s17091_s12  ;;  %1063 = vrot.lane.b32.xlu0 %v17622_v50, %s17092_s16  ;;  %v17684_v52 = vadd.f32 %v1004_v39, %v910_v51 }
 0x169   : > { %1015 = vrot.lane.b32.xlu1 %v17622_v50, %s17093_s8  ;;  %1009 = vrot.lane.b32.xlu0 %v17622_v50, %s17094_s9 }
 0x16d   : > { %1065 = vrot.lane.b32.xlu1 %v17632_v14, %s17092_s16  ;;  %1053 = vrot.lane.b32.xlu0 %v17632_v14, %s17090_s10  ;;  %s15352_s16 = sshll.u32 %s17159_s22, 8  ;;  %s15179_s22 = scalar_lea.sflag [#allocation4], %s17271_s6 }
 0x171   : > { %1071 = vrot.lane.b32.xlu1 %v17632_v14, %s17091_s12  ;;  %1059 = vrot.lane.b32.xlu0 %v17632_v14, %s17089_s14  ;;  %s17103_s14 = smov 80  }
 0x175   : > { %1011 = vrot.lane.b32.xlu1 %v17632_v14, %s17094_s9  ;;  %1021 = vrot.lane.b32.xlu0 %v17622_v50, %s17095_s30 }
 0x179   : > { %1023 = vrot.lane.b32.xlu1 %v17632_v14, %s17095_s30  ;;  %1017 = vrot.lane.b32.xlu0 %v17632_v14, %s17093_s8 }
 0x17d   : > { %1081 = vrot.lane.b32.xlu1 %v17622_v50, %s17096_s11  ;;  %1075 = vrot.lane.b32.xlu0 %v17622_v50, %s17097_s27 }
 0x181   : > { %1093 = vrot.lane.b32.xlu1 %v17622_v50, %s17098_s23  ;;  %1087 = vrot.lane.b32.xlu0 %v17622_v50, %s17099_s7 }
 0x185   : > { %1033 = vrot.lane.b32.xlu1 %v17622_v50, %s17100_s15  ;;  %1027 = vrot.lane.b32.xlu0 %v17622_v50, %s17101_s24 }
 0x189   : > { %1045 = vrot.lane.b32.xlu1 %v17622_v50, %s17102_s26  ;;  %1039 = vrot.lane.b32.xlu0 %v17622_v50, %s17103_s14 }
 0x18d   : > { %1083 = vrot.lane.b32.xlu1 %v17632_v14, %s17096_s11  ;;  %1077 = vrot.lane.b32.xlu0 %v17632_v14, %s17097_s27  ;;  %s19832_s27 = scalar_lea.hbm %s19885_s5, %s15352_s16 }
 0x191   : > { %1095 = vrot.lane.b32.xlu1 %v17632_v14, %s17098_s23  ;;  %1089 = vrot.lane.b32.xlu0 %v17632_v14, %s17099_s7  ;;  %s17106_s7 = smov [#allocation8]  }
 0x195   : > { %1035 = vrot.lane.b32.xlu1 %v17632_v14, %s17100_s15  ;;  %1029 = vrot.lane.b32.xlu0 %v17632_v14, %s17101_s24 }
 0x199   : > { %1047 = vrot.lane.b32.xlu1 %v17632_v14, %s17102_s26  ;;  %1041 = vrot.lane.b32.xlu0 %v17632_v14, %s17103_s14 }
 0x19d   : > { %1101 = vrot.lane.b32.xlu1 %v17682_v38, %s17094_s9  ;;  %1103 = vrot.lane.b32.xlu0 %v17684_v52, %s17094_s9 }
 0x1a1   : > { %1109 = vrot.lane.b32.xlu1 %v17684_v52, %s17093_s8  ;;  %1115 = vrot.lane.b32.xlu0 %v17684_v52, %s17095_s30 }
 0x1a5   : > { %1113 = vrot.lane.b32.xlu1 %v17682_v38, %s17095_s30  ;;  %1107 = vrot.lane.b32.xlu0 %v17682_v38, %s17093_s8  ;;  %s271_s8 = scalar_lea.vmem [#allocation8], %s15293_s13 }
 0x1a6   : > { %s15192_s9 = sshll.u32 %s271_s8, 4  ;;  %s19835_s9 = int_to_ptr.vmem [resolvable:$true] %s15192_s9 }
 0x1a7   : > { %s17011_s13 = scalar_lea.vmem %s19835_s9, 256 }
 0x1a8   : > { %p17012_p11 = scmp.ne.s32.totalorder %s19835_s9, %s17011_s13 }
 0x1a9   : > { %1125 = vrot.lane.b32.xlu1 %v17682_v38, %s17100_s15  ;;  %1119 = vrot.lane.b32.xlu0 %v17682_v38, %s17101_s24 }
 0x1aa   : > { %p17013_p1 = pnand %p17012_p11, %p19950_p10 }
 0x1ac   : > { %p17014_p2 = pneg %p17013_p1 }
 0x1ad   : > { %1127 = vrot.lane.b32.xlu1 %v17684_v52, %s17100_s15  ;;  %1121 = vrot.lane.b32.xlu0 %v17684_v52, %s17101_s24  ;;  %s17015_s15 = sshll.u32 %s17106_s7, 4  ;;  %s17016_s15 = int_to_ptr.vmem [resolvable:$false] %s17015_s15 }
 0x1ae   : > { %s17017_s24 = scalar_lea.vmem %s17016_s15, 512  ;;  %p17018_p6 = scmp.lt.s32.totalorder %s19835_s9, %s17016_s15 }
 0x1af   : > { %p17019_p12 = scmp.lt.s32.totalorder %s17017_s24, %s17011_s13 }
 0x1b1   : > { %1139 = vrot.lane.b32.xlu1 %v17684_v52, %s17102_s26  ;;  %1133 = vrot.lane.b32.xlu0 %v17684_v52, %s17103_s14  ;;  %p17020_p3 = por %p17019_p12, %p17018_p6 }
 0x1b3   : > { %p17021_p9 = pnand %p17020_p3, %p17014_p2 }
 0x1b5   : > { %1137 = vrot.lane.b32.xlu1 %v17682_v38, %s17102_s26  ;;  %1131 = vrot.lane.b32.xlu0 %v17682_v38, %s17103_s14 }
 0x1d3   : > { %v1058_v21 = vpop.permute.xlu1 %1057  ;;  %v1052_v20 = vpop.permute.xlu0 %1051 }
 0x1d7   : > { %v1070_v4 = vpop.permute.xlu1 %1069  ;;  %v1064_v5 = vpop.permute.xlu0 %1063 }
 0x1d8   : > { %v1295_v6 = vcombine.low %v1058_v21, %v1070_v4  ;;  %v1296_v10 = vcombine.high %v1058_v21, %v1070_v4  ;;  %v1279_v11 = vcombine.low %v1052_v20, %v1064_v5  ;;  %v1280_v12 = vcombine.high %v1052_v20, %v1064_v5 }
 0x1da   : > { %v1303_v18 = vrot.slane %v1295_v6, %v17715_v22  ;;  %v1310_v19 = vrot.slane %v1296_v10, %v17715_v22  ;;  %v1287_v0 = vrot.slane %v1279_v11, %v17715_v22  ;;  %v1294_v23 = vrot.slane %v1280_v12, %v17715_v22 }
 0x1db   : > { %v1016_v24 = vpop.permute.xlu1 %1015  ;;  %v17724_v25 = vpop.permute.xlu0 %1009 }
 0x1dc   : > { %v1343_v26 = vcombine.low %v1287_v0, %v1303_v18  ;;  %v1344_v30 = vcombine.high %v1287_v0, %v1303_v18  ;;  %v1359_v31 = vcombine.low %v1294_v23, %v1310_v19  ;;  %v1360_v32 = vcombine.high %v1294_v23, %v1310_v19 }
 0x1dd   : > { %v1143_v56 = vcombine.low %v17622_v50, %v1016_v24  ;;  %v1144_v28 = vcombine.high %v17622_v50, %v1016_v24 }
 0x1de   : > { %v1351_v33 = vrot.slane %v1343_v26, %v17718_v17  ;;  %v1358_v16 = vrot.slane %v1344_v30, %v17718_v17  ;;  %v1367_v34 = vrot.slane %v1359_v31, %v17718_v17  ;;  %v1374_v35 = vrot.slane %v1360_v32, %v17718_v17 }
 0x1df   : > { %v1066_v36 = vpop.permute.xlu1 %1065  ;;  %v1054_v37 = vpop.permute.xlu0 %1053  ;;  %v1151_v18 = vrot.slane %v1143_v56, %v17715_v22  ;;  %v1158_v50 = vrot.slane %v1144_v28, %v17715_v22 }
 0x1e0   : > { %v15313_v40 = vcombine.low %v1351_v33, %v1358_v16  ;;  %v15315_v41 = vcombine.high %v1351_v33, %v1358_v16  ;;  %v15317_v42 = vcombine.low %v1367_v34, %v1374_v35  ;;  %v15319_v45 = vcombine.high %v1367_v34, %v1374_v35 }
 0x1e1   : > { %v1687_v46 = vcombine.low %v1054_v37, %v1066_v36  ;;  %v1688_v49 = vcombine.high %v1054_v37, %v1066_v36 }
 0x1e2   : > { %v2239_v55 = vrot.slane %v15313_v40, %v17715_v22  ;;  %v2255_v58 = vrot.slane %v15315_v41, %v17715_v22  ;;  %v2271_v59 = vrot.slane %v15317_v42, %v17715_v22  ;;  %v2287_v63 = vrot.slane %v15319_v45, %v17715_v22 }
 0x1e3   : > { %v1072_v3 = vpop.permute.xlu1 %1071  ;;  %v1060_v7 = vpop.permute.xlu0 %1059  ;;  %v1695_v54 = vrot.slane %v1687_v46, %v17715_v22  ;;  %v1702_v60 = vrot.slane %v1688_v49, %v17715_v22 }
 0x1e4   : > { %v2295_v8 = vcombine.low %v2239_v55, %v2255_v58  ;;  %v2296_v13 = vcombine.high %v2239_v55, %v2255_v58  ;;  %v2327_v15 = vcombine.low %v2271_v59, %v2287_v63  ;;  %v2328_v43 = vcombine.high %v2271_v59, %v2287_v63 }
 0x1e5   : > { %v1703_v44 = vcombine.low %v1060_v7, %v1072_v3  ;;  %v1704_v47 = vcombine.high %v1060_v7, %v1072_v3 }
 0x1e6   : > { %v17735_v48 = vrot.slane %v2296_v13, %v17718_v17  ;;  %v17738_v53 = vrot.slane %v2328_v43, %v17718_v17  ;;  %v17743_v61 = vrot.slane %v2295_v8, %v17718_v17  ;;  %v17746_v62 = vrot.slane %v2327_v15, %v17718_v17 }
 0x1e7   : > { %v1711_v1 = vrot.slane %v1703_v44, %v17715_v22  ;;  %v1718_v39 = vrot.slane %v1704_v47, %v17715_v22  ;;  %v17750_v29 = vpop.permute.xlu1 %1011  ;;  %v1022_v51 = vpop.permute.xlu0 %1021 }
 0x1e8   : > { %v2361_v57 = vcombine.low %v17735_v48, %v17738_v53  ;;  %v2359_v4 = vcombine.low %v17743_v61, %v17746_v62  ;;  %v1159_v19 = vcombine.low %v17724_v25, %v1022_v51  ;;  %v1160_v0 = vcombine.high %v17724_v25, %v1022_v51 }
 0x1e9   : > { %v1751_v2 = vcombine.low %v1695_v54, %v1711_v1  ;;  %v1752_v21 = vcombine.high %v1695_v54, %v1711_v1  ;;  %v1767_v20 = vcombine.low %v1702_v60, %v1718_v39  ;;  %v1768_v9 = vcombine.high %v1702_v60, %v1718_v39 }
 0x1ea   : > { %v17769_v32 = vsel %vm2775_vm1, %v2359_v4, 0  ;;  %v1167_v33 = vrot.slane %v1159_v19, %v17715_v22  ;;  %v1174_v16 = vrot.slane %v1160_v0, %v17715_v22 }
 0x1eb   : > { %v1024_v5 = vpop.permute.xlu1 %1023  ;;  %v1759_v6 = vrot.slane %v1751_v2, %v17718_v17  ;;  %v1766_v10 = vrot.slane %v1752_v21, %v17718_v17  ;;  %v1775_v11 = vrot.slane %v1767_v20, %v17718_v17  ;;  %v1782_v12 = vrot.slane %v1768_v9, %v17718_v17  ;;  %v1018_v23 = vpop.permute.xlu0 %1017 }
 0x1ec   : > { %v1567_v34 = vcombine.low %v17750_v29, %v1024_v5  ;;  %v1207_v41 = vcombine.low %v1151_v18, %v1167_v33  ;;  %v1208_v42 = vcombine.high %v1151_v18, %v1167_v33  ;;  %v1223_v45 = vcombine.low %v1158_v50, %v1174_v16 }
 0x1ed   : > { %v15321_v24 = vcombine.low %v1759_v6, %v1766_v10  ;;  %v15323_v26 = vcombine.high %v1759_v6, %v1766_v10  ;;  %v15325_v30 = vcombine.low %v1775_v11, %v1782_v12  ;;  %v15327_v31 = vcombine.high %v1775_v11, %v1782_v12 }
 0x1ee   : > { %v1224_v46 = vcombine.high %v1158_v50, %v1174_v16  ;;  %v1215_v63 = vrot.slane %v1207_v41, %v17718_v17  ;;  %v1222_v3 = vrot.slane %v1208_v42, %v17718_v17  ;;  %v1231_v7 = vrot.slane %v1223_v45, %v17718_v17 }
 0x1ef   : > { %v17774_v35 = vpop.permute.xlu1 %1081  ;;  %v2375_v36 = vrot.slane %v15321_v24, %v17715_v22  ;;  %v2391_v25 = vrot.slane %v15323_v26, %v17715_v22  ;;  %v2407_v37 = vrot.slane %v15325_v30, %v17715_v22  ;;  %v2423_v40 = vrot.slane %v15327_v31, %v17715_v22  ;;  %v17784_v13 = vpop.permute.xlu0 %1075 }
 0x1f0   : > { %v1238_v8 = vrot.slane %v1224_v46, %v17718_v17  ;;  %v15297_v54 = vcombine.low %v1215_v63, %v1222_v3  ;;  %v15299_v60 = vcombine.high %v1215_v63, %v1222_v3  ;;  %v1568_v21 = vcombine.high %v17750_v29, %v1024_v5 }
 0x1f1   : > { %v2431_v49 = vcombine.low %v2375_v36, %v2391_v25  ;;  %v2432_v55 = vcombine.high %v2375_v36, %v2391_v25  ;;  %v2463_v58 = vcombine.low %v2407_v37, %v2423_v40  ;;  %v2464_v59 = vcombine.high %v2407_v37, %v2423_v40 }
 0x1f2   : > { %v15301_v1 = vcombine.low %v1231_v7, %v1238_v8  ;;  %v15303_v39 = vcombine.high %v1231_v7, %v1238_v8  ;;  %v17808_v20 = vrot.slane %v15297_v54, %v17715_v22  ;;  %v17811_v9 = vrot.slane %v15299_v60, %v17715_v22 }
 0x1f3   : > { %v17787_v15 = vrot.slane %v2431_v49, %v17718_v17  ;;  %v17790_v43 = vrot.slane %v2432_v55, %v17718_v17  ;;  %v17793_v44 = vrot.slane %v2463_v58, %v17718_v17  ;;  %v17796_v47 = vrot.slane %v2464_v59, %v17718_v17  ;;  %v17798_v51 = vpop.permute.xlu1 %1093  ;;  %v17822_v12 = vpop.permute.xlu0 %1087 }
 0x1f4   : > { %v17814_v4 = vrot.slane %v15301_v1, %v17715_v22  ;;  %v17817_v6 = vrot.slane %v15303_v39, %v17715_v22  ;;  %v17825_v29 = vand.u32 4294901760, %v17769_v32  ;;  %v1575_v50 = vrot.slane %v1567_v34, %v17715_v22 }
 0x1f5   : > { %v2495_v56 = vcombine.low %v17787_v15, %v17793_v44  ;;  %v2497_v28 = vcombine.low %v17790_v43, %v17796_v47  ;;  %v1582_v19 = vrot.slane %v1568_v21, %v17715_v22  ;;  %v1551_v0 = vcombine.low %v17632_v14, %v1018_v23 }
 0x1f6   : > { %v1552_v24 = vcombine.high %v17632_v14, %v1018_v23  ;;  %v2023_v60 = vcombine.low %v17808_v20, %v17811_v9  ;;  %v2055_v1 = vcombine.low %v17814_v4, %v17817_v6 }
 0x1f7   : > { %v2786_v10 = vsel %vm2775_vm1, %v2495_v56, 0  ;;  %v17835_v26 = vpop.permute.xlu1 %1033  ;;  %v1559_v30 = vrot.slane %v1551_v0, %v17715_v22  ;;  %v17842_v25 = vpop.permute.xlu0 %1027 }
 0x1f8   : > { %v17820_v11 = vand.u32 4294901760, %v2786_v10  ;;  %v1566_v31 = vrot.slane %v1552_v24, %v17715_v22  ;;  %v17878_v56 = vrot.slane %v2023_v60, %v17718_v17  ;;  %v17881_v21 = vrot.slane %v2055_v1, %v17718_v17 }
 0x1f9   : > { %v1615_v33 = vcombine.low %v1559_v30, %v1575_v50  ;;  %v1616_v16 = vcombine.high %v1559_v30, %v1575_v50 }
 0x1fa   : > { %15881 = vmatprep.subr.mxu0 %v17820_v11  ;;  %v1631_v34 = vcombine.low %v1566_v31, %v1582_v19  ;;  %v1632_v36 = vcombine.high %v1566_v31, %v1582_v19  ;;  %v2905_v50 = vsub.f32 %v2786_v10, %v17820_v11  ;;  %v2087_v30 = vcombine.low %v17878_v56, %v17881_v21 }
 0x1fb   : > { %15882 = vmatpush3.xpose.msra.mxu0 %v17820_v11  ;;  %v1623_v14 = vrot.slane %v1615_v33, %v17718_v17  ;;  %v1630_v23 = vrot.slane %v1616_v16, %v17718_v17  ;;  %v17849_v41 = vpop.permute.xlu1 %1045  ;;  %v17863_v3 = vpop.permute.xlu0 %1039 }
 0x1fc   : > { %15883 = vmatprep.subr.mxu0 %v17825_v29  ;;  %v1639_v37 = vrot.slane %v1631_v34, %v17718_v17  ;;  %v1646_v40 = vrot.slane %v1632_v36, %v17718_v17  ;;  %v17892_v31 = vand.u32 4294901760, %v2905_v50  ;;  %v2777_v34 = vsel %vm2775_vm1, %v2087_v30, 0 }
 0x1fd   : > { %v15305_v42 = vcombine.low %v1623_v14, %v1630_v23  ;;  %v15307_v45 = vcombine.high %v1623_v14, %v1630_v23  ;;  %v2855_v23 = vand.u32 4294901760, %v2777_v34 }
 0x1fe   : > { %v15309_v46 = vcombine.low %v1639_v37, %v1646_v40  ;;  %v15311_v49 = vcombine.high %v1639_v37, %v1646_v40  ;;  %v2907_v36 = vsub.f32 %v2905_v50, %v17892_v31  ;;  %v2912_v40 = vsub.f32 %v17769_v32, %v17825_v29 }
 0x1ff   : > { %15884 = vmatpush3.xpose.msra.mxu0 %v17825_v29  ;;  %v17852_v55 = vrot.slane %v15305_v42, %v17715_v22  ;;  %v17855_v58 = vrot.slane %v15307_v45, %v17715_v22  ;;  %v17869_v54 = vpop.permute.xlu1 %1083  ;;  %v17875_v39 = vpop.permute.xlu0 %1077  ;;  %15892 = vmatprep.mubr.f32.mxu1 %v2855_v23 }
 0x200   : > { %v17858_v59 = vrot.slane %v15309_v46, %v17715_v22  ;;  %v17861_v63 = vrot.slane %v15311_v49, %v17715_v22  ;;  %15895 = vmatprep.subr.mxu0 %v2905_v50  ;;  %v2908_v37 = vand.u32 4294901760, %v2907_v36  ;;  %v17910_v45 = vand.u32 4294901760, %v2912_v40 }
 0x201   : > { %v2160_v7 = vcombine.high %v17852_v55, %v17855_v58  ;;  %v2159_v0 = vcombine.low %v17852_v55, %v17855_v58  ;;  %v2856_v46 = vsub.f32 %v2777_v34, %v2855_v23 }
 0x202   : > { %v2191_v24 = vcombine.low %v17858_v59, %v17861_v63  ;;  %15888 = vmatprep.subr.mxu1 %v2908_v37  ;;  %v2914_v60 = vsub.f32 %v2912_v40, %v17910_v45 }
 0x203   : > { %v17884_v19 = vpop.permute.xlu1 %1095  ;;  %v17894_v33 = vpop.permute.xlu0 %1089  ;;  %v17897_v16 = vrot.slane %v2159_v0, %v17718_v17  ;;  %15889 = vmatpush3.xpose.msra.mxu1 %v2908_v37  ;;  %v2857_v0 = vand.u32 4294901760, %v2856_v46 }
 0x204   : > { %v17900_v10 = vrot.slane %v2191_v24, %v17718_v17  ;;  %v2915_v30 = vand.u32 4294901760, %v2914_v60 }
 0x205   : > { %v2858_v32 = vsub.f32 %v2856_v46, %v2857_v0 }
 0x206   : > { %v2223_v42 = vcombine.low %v17897_v16, %v17900_v10  ;;  %15890 = vmatprep.subr.mxu1 %v2915_v30 }
 0x207   : > { %v17904_v14 = vpop.permute.xlu1 %1035  ;;  %v17912_v49 = vpop.permute.xlu0 %1029  ;;  %v2859_v5 = vand.u32 4294901760, %v2858_v32  ;;  %15891 = vmatpush3.xpose.msra.mxu1 %v2915_v30  ;;  %v2360_v30 = vcombine.high %v17743_v61, %v17746_v62 }
 0x208   : > { %v2780_v24 = vsel %vm2775_vm1, %v2223_v42, 0  ;;  %15902 = vmatprep.subr.mxu1 %v17820_v11 }
 0x209   : > { %v17918_v36 = vand.u32 4294901760, %v2780_v24  ;;  %15885 = vmatprep.mubr.f32.mxu0 %v2859_v5 }
 0x20b   : > { %v17915_v1 = vpop.permute.xlu1 %1047  ;;  %v17920_v18 = vpop.permute.xlu0 %1041  ;;  %v2866_v34 = vsub.f32 %v2780_v24, %v17918_v36  ;;  %15893 = vmatmul.mubr.f32.vlgmr.msra.gmra.mxu1 %v17918_v36  ;;  %v2496_v24 = vcombine.high %v17787_v15, %v17793_v44 }
 0x20c   : > { %15903 = vmatpush3.xpose.msra.mxu1 %v17820_v11  ;;  %15906 = vmatprep.mubr.f32.mxu1 %v2857_v0 }
 0x20d   : > { %v2867_v2 = vand.u32 4294901760, %v2866_v34  ;;  %15904 = vmatprep.subr.mxu1 %v17825_v29  ;;  %v3300_v32 = vsel %vm2775_vm1, %v2496_v24, 0 }
 0x20f   : > { %v1102_v37 = vpop.permute.xlu1 %1101  ;;  %v2868_v27 = vsub.f32 %v2866_v34, %v2867_v2  ;;  %v1104_v42 = vpop.permute.xlu0 %1103 }
 0x210   : > { %15905 = vmatpush3.xpose.msra.mxu1 %v17825_v29 }
 0x211   : > { %v2869_v60 = vand.u32 4294901760, %v2868_v27  ;;  %15916 = vmatprep.subr.mxu1 %v17820_v11 }
 0x213   : > { %v1110_v8 = vpop.permute.xlu1 %1109  ;;  %15886 = vmatmul.mubr.f32.vlgmr.msra.gmra.mxu0 %v2869_v60  ;;  %v1116_v27 = vpop.permute.xlu0 %1115  ;;  %15907 = vmatmul.mubr.f32.vlgmr.msra.gmra.mxu1 %v2867_v2  ;;  %v17944_v2 = vand.u32 4294901760, %v3300_v32 }
 0x214   : > { %15896 = vmatpush3.xpose.msra.mxu0 %v2905_v50  ;;  %15899 = vmatprep.mubr.f32.mxu0 %v2856_v46  ;;  %v1823_v5 = vcombine.low %v17684_v52, %v1110_v8  ;;  %v1824_v0 = vcombine.high %v17684_v52, %v1110_v8  ;;  %v17940_v50 = vsel %vm2775_vm1, %v2360_v30, 0  ;;  %v1839_v52 = vcombine.low %v1104_v42, %v1116_v27 }
 0x215   : > { %15897 = vmatprep.subr.mxu0 %v2912_v40  ;;  %15917 = vmatpush3.xpose.msra.mxu1 %v17820_v11  ;;  %v1840_v62 = vcombine.high %v1104_v42, %v1116_v27  ;;  %v17950_v60 = vand.u32 4294901760, %v17940_v50 }
 0x216   : > { %v1831_v15 = vrot.slane %v1823_v5, %v17715_v22  ;;  %15920 = vmatprep.mubr.f32.mxu1 %v2855_v23  ;;  %v1838_v61 = vrot.slane %v1824_v0, %v17715_v22  ;;  %15918 = vmatprep.subr.mxu1 %v17825_v29  ;;  %v1847_v11 = vrot.slane %v1839_v52, %v17715_v22 }
 0x217   : > { %v1114_v44 = vpop.permute.xlu1 %1113  ;;  %v1854_v8 = vrot.slane %v1840_v62, %v17715_v22  ;;  %v1108_v46 = vpop.permute.xlu0 %1107  ;;  %v17957_v0 = vsub.f32 %v3300_v32, %v17944_v2 }
 0x218   : > { %15898 = vmatpush3.xpose.msra.mxu0 %v2912_v40  ;;  %v1431_v40 = vcombine.low %v1102_v37, %v1114_v44  ;;  %v1432_v42 = vcombine.high %v1102_v37, %v1114_v44  ;;  %v1887_v24 = vcombine.low %v1831_v15, %v1847_v11  ;;  %v1888_v5 = vcombine.high %v1831_v15, %v1847_v11 }
 0x219   : > { %15909 = vmatprep.subr.mxu0 %v17892_v31  ;;  %15919 = vmatpush3.xpose.msra.mxu1 %v17825_v29  ;;  %v1904_v30 = vcombine.high %v1838_v61, %v1854_v8  ;;  %v1415_v27 = vcombine.low %v17682_v38, %v1108_v46  ;;  %v17967_v15 = vand.u32 4294901760, %v17957_v0  ;;  %v1416_v32 = vcombine.high %v17682_v38, %v1108_v46 }
 0x21a   : > { %v1895_v52 = vrot.slane %v1887_v24, %v17718_v17  ;;  %v1902_v62 = vrot.slane %v1888_v5, %v17718_v17 }
 0x21b   : > { %15900 = vmatmul.mubr.f32.vlgmr.msra.gmra.mxu0 %v2866_v34  ;;  %v1903_v34 = vcombine.low %v1838_v61, %v1854_v8  ;;  %v1918_v37 = vrot.slane %v1904_v30, %v17718_v17  ;;  %v1423_v44 = vrot.slane %v1415_v27, %v17715_v22  ;;  %v2088_v61 = vcombine.high %v17878_v56, %v17881_v21 }
 0x21c   : > { %15910 = vmatpush3.xpose.msra.mxu0 %v17892_v31  ;;  %15913 = vmatprep.mubr.f32.mxu0 %v2855_v23  ;;  %v1439_v31 = vrot.slane %v1431_v40, %v17715_v22  ;;  %v1446_v23 = vrot.slane %v1432_v42, %v17715_v22  ;;  %v15337_v11 = vcombine.low %v1895_v52, %v1902_v62 }
 0x21d   : > { %15911 = vmatprep.subr.mxu0 %v17910_v45  ;;  %v1911_v29 = vrot.slane %v1903_v34, %v17718_v17  ;;  %15921 = vmatmul.mubr.f32.vlgmr.msra.gmra.mxu1 %v17918_v36  ;;  %v15339_v8 = vcombine.high %v1895_v52, %v1902_v62  ;;  %v1430_v24 = vrot.slane %v1416_v32, %v17715_v22 }
 0x21e   : > { %v1479_v5 = vcombine.low %v1423_v44, %v1439_v31  ;;  %v1480_v34 = vcombine.high %v1423_v44, %v1439_v31  ;;  %v17979_v38 = vrot.slane %v15337_v11, %v17715_v22  ;;  %v1327_v11 = vcombine.low %v17774_v35, %v17798_v51 }
 0x21f   : > { %v15341_v40 = vcombine.low %v1911_v29, %v1918_v37  ;;  %v15343_v42 = vcombine.high %v1911_v29, %v1918_v37  ;;  %v17982_v46 = vrot.slane %v15339_v8, %v17715_v22  ;;  %v1496_v29 = vcombine.high %v1430_v24, %v1446_v23 }
 0x220   : > { %15912 = vmatpush3.xpose.msra.mxu0 %v17910_v45  ;;  %v3421_v45 = vsub.f32 %v17957_v0, %v17967_v15  ;;  %v1487_v27 = vrot.slane %v1479_v5, %v17718_v17  ;;  %v1494_v31 = vrot.slane %v1480_v34, %v17718_v17  ;;  %v1328_v8 = vcombine.high %v17774_v35, %v17798_v51 }
 0x221   : > { %15923 = vmatprep.subr.mxu0 %v17944_v2  ;;  %v17985_v56 = vrot.slane %v15341_v40, %v17715_v22  ;;  %v17988_v21 = vrot.slane %v15343_v42, %v17715_v22  ;;  %v1311_v40 = vcombine.low %v17784_v13, %v17822_v12  ;;  %v1510_v42 = vrot.slane %v1496_v29, %v17718_v17 }
 0x222   : > { %v3422_v30 = vand.u32 4294901760, %v3421_v45  ;;  %v15329_v32 = vcombine.low %v1487_v27, %v1494_v31  ;;  %v15331_v44 = vcombine.high %v1487_v27, %v1494_v31  ;;  %v1312_v5 = vcombine.high %v17784_v13, %v17822_v12 }
 0x223   : > { %15914 = vmatmul.mubr.f32.vlgmr.msra.gmra.mxu0 %v17918_v36  ;;  %v1495_v36 = vcombine.low %v1430_v24, %v1446_v23  ;;  %v3291_v24 = vsel %vm2775_vm1, %v2088_v61, 0  ;;  %v18020_v51 = vsub.f32 %v17940_v50, %v17950_v60  ;;  %v2224_v34 = vcombine.high %v17897_v16, %v17900_v10 }
 0x224   : > { %15924 = vmatpush3.xpose.msra.mxu0 %v17944_v2  ;;  %15930 = vmatprep.subr.mxu1 %v3422_v30  ;;  %v18007_v45 = vrot.slane %v15329_v32, %v17715_v22  ;;  %v18010_v23 = vrot.slane %v15331_v44, %v17715_v22  ;;  %v18016_v35 = vand.u32 4294901760, %v3291_v24  ;;  %v1335_v31 = vrot.slane %v1327_v11, %v17715_v22 }
 0x225   : > { %15925 = vmatprep.subr.mxu0 %v17950_v60  ;;  %v1503_v37 = vrot.slane %v1495_v36, %v17718_v17  ;;  %15931 = vmatpush3.xpose.msra.mxu1 %v3422_v30  ;;  %v18031_v12 = vand.u32 4294901760, %v18020_v51  ;;  %v3294_v50 = vsel %vm2775_vm1, %v2224_v34, 0  ;;  %v1342_v36 = vrot.slane %v1328_v8, %v17715_v22 }
 0x226   : > { %v3370_v13 = vsub.f32 %v3291_v24, %v18016_v35  ;;  %15934 = vmatprep.mubr.f32.mxu1 %v18016_v35  ;;  %v1319_v16 = vrot.slane %v1311_v40, %v17715_v22  ;;  %v18045_v11 = vand.u32 4294901760, %v3294_v50 }
 0x227   : > { %v15333_v30 = vcombine.low %v1503_v37, %v1510_v42  ;;  %v15335_v27 = vcombine.high %v1503_v37, %v1510_v42  ;;  %v1326_v37 = vrot.slane %v1312_v5, %v17715_v22  ;;  %v3428_v44 = vsub.f32 %v18020_v51, %v18031_v12 }
 0x228   : > { %15926 = vmatpush3.xpose.msra.mxu0 %v17950_v60  ;;  %v3371_v32 = vand.u32 4294901760, %v3370_v13  ;;  %v18050_v40 = vsub.f32 %v3294_v50, %v18045_v11  ;;  %v1375_v34 = vcombine.low %v1319_v16, %v1335_v31  ;;  %v1191_v50 = vcombine.low %v17835_v26, %v17849_v41 }
 0x229   : > { %15937 = vmatprep.subr.mxu0 %v17957_v0  ;;  %v18037_v10 = vrot.slane %v15333_v30, %v17715_v22  ;;  %v18040_v29 = vrot.slane %v15335_v27, %v17715_v22  ;;  %v3429_v24 = vand.u32 4294901760, %v3428_v44  ;;  %v1376_v30 = vcombine.high %v1319_v16, %v1335_v31 }
 0x22a   : > { %v3372_v8 = vsub.f32 %v3370_v13, %v3371_v32  ;;  %v1391_v27 = vcombine.low %v1326_v37, %v1342_v36  ;;  %v1392_v61 = vcombine.high %v1326_v37, %v1342_v36  ;;  %v3381_v5 = vand.u32 4294901760, %v18050_v40 }
 0x22b   : > { %15932 = vmatprep.subr.mxu1 %v3429_v24  ;;  %v1383_v42 = vrot.slane %v1375_v34, %v17718_v17  ;;  %v1390_v44 = vrot.slane %v1376_v30, %v17718_v17  ;;  %v1192_v37 = vcombine.high %v17835_v26, %v17849_v41  ;;  %v3814_v26 = vsel %vm2775_vm1, %v2497_v28, 0 }
 0x22c   : > { %v3373_v62 = vand.u32 4294901760, %v3372_v8  ;;  %15933 = vmatpush3.xpose.msra.mxu1 %v3429_v24  ;;  %v3382_v52 = vsub.f32 %v18050_v40, %v3381_v5  ;;  %v18060_v31 = vrot.slane %v1391_v27, %v17718_v17  ;;  %v18063_v36 = vrot.slane %v1392_v61, %v17718_v17 }
 0x22d   : > { %15944 = vmatprep.subr.mxu1 %v17944_v2  ;;  %v1176_v8 = vcombine.high %v17842_v25, %v17863_v3  ;;  %v3811_v61 = vsel %vm2775_vm1, %v2361_v57, 0  ;;  %v1735_v24 = vcombine.low %v17869_v54, %v17884_v19  ;;  %v1736_v57 = vcombine.high %v17869_v54, %v17884_v19 }
 0x22e   : > { %15927 = vmatprep.mubr.f32.mxu0 %v3373_v62  ;;  %v1175_v62 = vcombine.low %v17842_v25, %v17863_v3  ;;  %v3383_v16 = vand.u32 4294901760, %v3382_v52  ;;  %v1719_v52 = vcombine.low %v17875_v39, %v17894_v33  ;;  %v18087_v25 = vrot.slane %v1191_v50, %v17715_v22 }
 0x22f   : > { %15935 = vmatmul.mubr.f32.vlgmr.msra.gmra.mxu1 %v18045_v11  ;;  %v1720_v41 = vcombine.high %v17875_v39, %v17894_v33  ;;  %v15314_v3 = vcombine.low %v1383_v42, %v1390_v44  ;;  %v15318_v34 = vcombine.low %v18060_v31, %v18063_v36  ;;  %v18101_v28 = vrot.slane %v1192_v37, %v17715_v22 }
 0x230   : > { %15945 = vmatpush3.xpose.msra.mxu1 %v17944_v2  ;;  %15948 = vmatprep.mubr.f32.mxu1 %v3371_v32  ;;  %v15316_v32 = vcombine.high %v1383_v42, %v1390_v44  ;;  %v18097_v30 = vrot.slane %v1175_v62, %v17715_v22  ;;  %v18104_v54 = vrot.slane %v1176_v8, %v17715_v22  ;;  %v18107_v39 = vand.u32 4294901760, %v3814_v26 }
 0x231   : > { %15928 = vmatmul.mubr.f32.vlgmr.msra.gmra.mxu0 %v3383_v16  ;;  %15946 = vmatprep.subr.mxu1 %v17950_v60  ;;  %v1743_v19 = vrot.slane %v1735_v24, %v17715_v22  ;;  %v1727_v33 = vrot.slane %v1719_v52, %v17715_v22  ;;  %v1750_v42 = vrot.slane %v1736_v57, %v17715_v22 }
 0x232   : > { %15938 = vmatpush3.xpose.msra.mxu0 %v17957_v0  ;;  %15941 = vmatprep.mubr.f32.mxu0 %v3370_v13  ;;  %v18112_v0 = vand.u32 4294901760, %v3811_v61  ;;  %v15320_v13 = vcombine.high %v18060_v31, %v18063_v36  ;;  %v1734_v27 = vrot.slane %v1720_v41, %v17715_v22  ;;  %v18120_v44 = vrot.slane %v15314_v3, %v17715_v22 }
 0x233   : > { %15939 = vmatprep.subr.mxu0 %v18020_v51  ;;  %v18123_v50 = vrot.slane %v15316_v32, %v17715_v22  ;;  %v18126_v62 = vrot.slane %v15318_v34, %v17715_v22  ;;  %v1239_v16 = vcombine.low %v18097_v30, %v18087_v25  ;;  %v18135_v37 = vrot.slane %v2160_v7, %v17718_v17 }
 0x234   : > { %15947 = vmatpush3.xpose.msra.mxu1 %v17950_v60  ;;  %v1240_v24 = vcombine.high %v18097_v30, %v18087_v25  ;;  %v1255_v52 = vcombine.low %v18104_v54, %v18101_v28  ;;  %v19904_v57 = vcombine.high %v17735_v48, %v17738_v53  ;;  %v1783_v58 = vcombine.low %v1727_v33, %v1743_v19 }
 0x235   : > { %15958 = vmatprep.subr.mxu1 %v17944_v2  ;;  %v1784_v7 = vcombine.high %v1727_v33, %v1743_v19  ;;  %v1799_v41 = vcombine.low %v1734_v27, %v1750_v42  ;;  %v1800_v48 = vcombine.high %v1734_v27, %v1750_v42  ;;  %v19906_v53 = vcombine.high %v17808_v20, %v17811_v9 }
 0x236   : > { %15940 = vmatpush3.xpose.msra.mxu0 %v18020_v51  ;;  %v19903_v51 = vcombine.high %v17858_v59, %v17861_v63  ;;  %v18151_v55 = vsel %vm2775_vm1, %v19904_v57, 0  ;;  %v18156_v59 = vsub.f32 %v3814_v26, %v18107_v39  ;;  %v19905_v63 = vcombine.high %v17790_v43, %v17796_v47 }
 0x237   : > { %15951 = vmatprep.subr.mxu0 %v17967_v15  ;;  %15949 = vmatmul.mubr.f32.vlgmr.msra.gmra.mxu1 %v3381_v5  ;;  %v1256_v43 = vcombine.high %v18104_v54, %v18101_v28  ;;  %v1599_v9 = vcombine.low %v17904_v14, %v17915_v1  ;;  %v1600_v26 = vcombine.high %v17904_v14, %v17915_v1  ;;  %v18261_v30 = vand.u32 4294901760, %v18151_v55 }
 0x238   : > { %v18141_v8 = vrot.slane %v19903_v51, %v17718_v17  ;;  %15959 = vmatpush3.xpose.msra.mxu1 %v17944_v2  ;;  %v18162_v5 = vsel %vm2775_vm1, %v19905_v63, 0  ;;  %v18170_v2 = vrot.slane %v19906_v53, %v17718_v17  ;;  %15962 = vmatprep.mubr.f32.mxu1 %v18016_v35  ;;  %v18180_v47 = vand.u32 4294901760, %v18156_v59 }
 0x239   : > { %15942 = vmatmul.mubr.f32.vlgmr.msra.gmra.mxu0 %v18050_v40  ;;  %v18173_v40 = vrot.slane %v1239_v16, %v17718_v17  ;;  %15960 = vmatprep.subr.mxu1 %v17950_v60  ;;  %v18194_v3 = vsub.f32 %v3811_v61, %v18112_v0  ;;  %v1791_v32 = vrot.slane %v1783_v58, %v17718_v17  ;;  %v18228_v58 = vand.u32 4294901760, %v18162_v5 }
 0x23a   : > { %15952 = vmatpush3.xpose.msra.mxu0 %v17967_v15  ;;  %15955 = vmatprep.mubr.f32.mxu0 %v18016_v35  ;;  %v19907_v15 = vcombine.high %v17814_v4, %v17817_v6  ;;  %v2225_v35 = vcombine.low %v18135_v37, %v18141_v8  ;;  %v1798_v4 = vrot.slane %v1784_v7, %v17718_v17 }
 0x23b   : > { %15953 = vmatprep.subr.mxu0 %v18031_v12  ;;  %v3935_v6 = vsub.f32 %v18156_v59, %v18180_v47  ;;  %v1807_v1 = vrot.slane %v1799_v41, %v17718_v17  ;;  %v1814_v61 = vrot.slane %v1800_v48, %v17718_v17  ;;  %v18209_v34 = vand.u32 4294901760, %v18194_v3 }
 0x23c   : > { %v18186_v20 = vrot.slane %v19907_v15, %v17718_v17  ;;  %15961 = vmatpush3.xpose.msra.mxu1 %v17950_v60  ;;  %v3808_v19 = vsel %vm2775_vm1, %v2225_v35, 0  ;;  %v1583_v60 = vcombine.low %v17912_v49, %v17920_v18  ;;  %v1584_v16 = vcombine.high %v17912_v49, %v17920_v18 }
 0x23d   : > { %v3936_v33 = vand.u32 4294901760, %v3935_v6  ;;  %v18216_v27 = vand.u32 4294901760, %v3808_v19  ;;  %v3942_v51 = vsub.f32 %v18194_v3, %v18209_v34  ;;  %v15322_v7 = vcombine.low %v1791_v32, %v1798_v4 }
 0x23e   : > { %v2089_v14 = vcombine.low %v18170_v2, %v18186_v20  ;;  %15954 = vmatpush3.xpose.msra.mxu0 %v18031_v12  ;;  %v2090_v57 = vcombine.high %v18170_v2, %v18186_v20  ;;  %v2226_v18 = vcombine.high %v18135_v37, %v18141_v8  ;;  %v15324_v49 = vcombine.high %v1791_v32, %v1798_v4 }
 0x23f   : > { %15965 = vmatprep.subr.mxu0 %v18107_v39  ;;  %15963 = vmatmul.mubr.f32.vlgmr.msra.gmra.mxu1 %v18045_v11  ;;  %v18232_v63 = vsub.f32 %v3808_v19, %v18216_v27  ;;  %v15326_v41 = vcombine.low %v1807_v1, %v1814_v61  ;;  %v3943_v53 = vand.u32 4294901760, %v3942_v51  ;;  %v15328_v2 = vcombine.high %v1807_v1, %v1814_v61 }
 0x240   : > { %v3805_v42 = vsel %vm2775_vm1, %v2089_v14, 0  ;;  %15972 = vmatprep.subr.mxu1 %v3936_v33  ;;  %v1607_v15 = vrot.slane %v1599_v9, %v17715_v22  ;;  %v1591_v20 = vrot.slane %v1583_v60, %v17715_v22  ;;  %v1254_v35 = vrot.slane %v1240_v24, %v17718_v17 }
 0x241   : > { %v18221_v12 = vand.u32 4294901760, %v3805_v42  ;;  %15956 = vmatmul.mubr.f32.vlgmr.msra.gmra.mxu0 %v18045_v11  ;;  %15973 = vmatpush3.xpose.msra.mxu1 %v3936_v33  ;;  %v3895_v11 = vand.u32 4294901760, %v18232_v63  ;;  %v1614_v32 = vrot.slane %v1600_v26, %v17715_v22  ;;  %v1598_v4 = vrot.slane %v1584_v16, %v17715_v22 }
 0x242   : > { %15966 = vmatpush3.xpose.msra.mxu0 %v18107_v39  ;;  %15974 = vmatprep.subr.mxu1 %v3943_v53  ;;  %v1263_v9 = vrot.slane %v1255_v52, %v17718_v17  ;;  %v1270_v14 = vrot.slane %v1256_v43, %v17718_v17  ;;  %v18255_v1 = vrot.slane %v15322_v7, %v17715_v22  ;;  %v4319_v61 = vsel %vm2775_vm1, %v2090_v57, 0 }
 0x243   : > { %v3884_v48 = vsub.f32 %v3805_v42, %v18221_v12  ;;  %15967 = vmatprep.subr.mxu0 %v18112_v0  ;;  %15976 = vmatprep.mubr.f32.mxu1 %v18221_v12  ;;  %v3896_v25 = vsub.f32 %v18232_v63, %v3895_v11  ;;  %v18264_v24 = vrot.slane %v15324_v49, %v17715_v22  ;;  %v18292_v36 = vand.u32 4294901760, %v4319_v61 }
 0x244   : > { %v18267_v26 = vrot.slane %v15326_v41, %v17715_v22  ;;  %v18271_v54 = vrot.slane %v15328_v2, %v17715_v22  ;;  %v1647_v52 = vcombine.low %v1591_v20, %v1607_v15  ;;  %v1648_v43 = vcombine.high %v1591_v20, %v1607_v15 }
 0x245   : > { %v3885_v6 = vand.u32 4294901760, %v3884_v48  ;;  %15975 = vmatpush3.xpose.msra.mxu1 %v3943_v53  ;;  %v18280_v19 = vrot.slane %v15320_v13, %v17715_v22  ;;  %v1663_v60 = vcombine.low %v1598_v4, %v1614_v32  ;;  %v1664_v33 = vcombine.high %v1598_v4, %v1614_v32 }
 0x246   : > { %15968 = vmatpush3.xpose.msra.mxu0 %v18112_v0  ;;  %15986 = vmatprep.subr.mxu1 %v18107_v39  ;;  %v15298_v16 = vcombine.low %v18173_v40, %v1254_v35  ;;  %v15300_v51 = vcombine.high %v18173_v40, %v1254_v35  ;;  %v3897_v7 = vand.u32 4294901760, %v3896_v25  ;;  %v18287_v49 = vsub.f32 %v18162_v5, %v18228_v58 }
 0x247   : > { %v3886_v28 = vsub.f32 %v3884_v48, %v3885_v6  ;;  %15979 = vmatprep.subr.mxu0 %v18156_v59  ;;  %v15302_v57 = vcombine.low %v1263_v9, %v1270_v14  ;;  %v15304_v41 = vcombine.high %v1263_v9, %v1270_v14  ;;  %v2447_v31 = vcombine.low %v18255_v1, %v18264_v24 }
 0x248   : > { %15977 = vmatmul.mubr.f32.vlgmr.msra.gmra.mxu1 %v18216_v27  ;;  %v2479_v13 = vcombine.low %v18267_v26, %v18271_v54  ;;  %v1655_v40 = vrot.slane %v1647_v52, %v17718_v17  ;;  %v1662_v53 = vrot.slane %v1648_v43, %v17718_v17  ;;  %v2311_v5 = vcombine.low %v18120_v44, %v18123_v50 }
 0x249   : > { %v3887_v42 = vand.u32 4294901760, %v3886_v28  ;;  %15987 = vmatpush3.xpose.msra.mxu1 %v18107_v39  ;;  %15990 = vmatprep.mubr.f32.mxu1 %v3885_v6  ;;  %v1671_v2 = vrot.slane %v1663_v60, %v17718_v17  ;;  %v1678_v15 = vrot.slane %v1664_v33, %v17718_v17  ;;  %v2343_v20 = vcombine.low %v18126_v62, %v18280_v19 }
 0x24a   : > { %v18306_v35 = vrot.slane %v15298_v16, %v17715_v22  ;;  %15988 = vmatprep.subr.mxu1 %v18112_v0  ;;  %v18311_v32 = vand.u32 4294901760, %v18287_v49  ;;  %v18315_v4 = vsub.f32 %v18151_v55, %v18261_v30  ;;  %v18325_v6 = vsub.f32 %v4319_v61, %v18292_v36 }
 0x24b   : > { %15969 = vmatprep.mubr.f32.mxu0 %v3887_v42  ;;  %v4322_v9 = vsel %vm2775_vm1, %v2226_v18, 0  ;;  %v18332_v14 = vrot.slane %v15304_v41, %v17715_v22  ;;  %v18335_v55 = vrot.slane %v2447_v31, %v17718_v17  ;;  %v18338_v25 = vrot.slane %v2479_v13, %v17718_v17 }
 0x24c   : > { %15970 = vmatmul.mubr.f32.vlgmr.msra.gmra.mxu0 %v3897_v7  ;;  %v15306_v28 = vcombine.low %v1655_v40, %v1662_v53  ;;  %v15308_v52 = vcombine.high %v1655_v40, %v1662_v53  ;;  %v15310_v43 = vcombine.low %v1671_v2, %v1678_v15  ;;  %v15312_v61 = vcombine.high %v1671_v2, %v1678_v15 }
 0x24d   : > { %15980 = vmatpush3.xpose.msra.mxu0 %v18156_v59  ;;  %15983 = vmatprep.mubr.f32.mxu0 %v3884_v48  ;;  %v18318_v59 = vrot.slane %v15300_v51, %v17715_v22  ;;  %v18321_v48 = vrot.slane %v15302_v57, %v17715_v22  ;;  %v4449_v37 = vsub.f32 %v18287_v49, %v18311_v32  ;;  %v18348_v8 = vand.u32 4294901760, %v18315_v4 }
 0x24e   : > { %15981 = vmatprep.subr.mxu0 %v18194_v3  ;;  %15989 = vmatpush3.xpose.msra.mxu1 %v18112_v0  ;;  %v18350_v18 = vand.u32 4294901760, %v4322_v9  ;;  %v18353_v60 = vrot.slane %v2311_v5, %v17718_v17  ;;  %v18356_v33 = vrot.slane %v2343_v20, %v17718_v17  ;;  %v2499_v16 = vcombine.low %v18335_v55, %v18338_v25 }
 0x24f   : > { %16000 = vmatprep.subr.mxu1 %v18107_v39  ;;  %v2071_v42 = vcombine.low %v18321_v48, %v18332_v14  ;;  %v18368_v51 = vrot.slane %v15306_v28, %v17715_v22  ;;  %v18373_v7 = vrot.slane %v15308_v52, %v17715_v22  ;;  %v18379_v57 = vrot.slane %v15312_v61, %v17715_v22 }
 0x250   : > { %v2703_v41 = vcombine.low %v17979_v38, %v17982_v46  ;;  %v4456_v31 = vsub.f32 %v18315_v4, %v18348_v8  ;;  %v18389_v13 = vsub.f32 %v4322_v9, %v18350_v18  ;;  %v2735_v40 = vcombine.low %v17985_v56, %v17988_v21 }
 0x251   : > { %15982 = vmatpush3.xpose.msra.mxu0 %v18194_v3  ;;  %15991 = vmatmul.mubr.f32.vlgmr.msra.gmra.mxu1 %v3895_v11  ;;  %v2039_v3 = vcombine.low %v18306_v35, %v18318_v59  ;;  %v4399_v11 = vand.u32 4294901760, %v18325_v6  ;;  %v18405_v2 = vrot.slane %v2071_v42, %v17718_v17  ;;  %v2363_v15 = vcombine.low %v18353_v60, %v18356_v33 }
 0x252   : > { %15993 = vmatprep.subr.mxu0 %v18180_v47  ;;  %16001 = vmatpush3.xpose.msra.mxu1 %v18107_v39  ;;  %v18376_v39 = vrot.slane %v15310_v43, %v17715_v22  ;;  %v4842_v20 = vsel %vm2775_vm1, %v2499_v16, 0  ;;  %v2175_v9 = vcombine.low %v18368_v51, %v18373_v7  ;;  %v18416_v28 = vrot.slane %v2703_v41, %v17718_v17 }
 0x253   : > { %16004 = vmatprep.mubr.f32.mxu1 %v18221_v12  ;;  %16002 = vmatprep.subr.mxu1 %v18112_v0  ;;  %v4400_v53 = vsub.f32 %v18325_v6, %v4399_v11  ;;  %v18402_v5 = vrot.slane %v2039_v3, %v17718_v17  ;;  %v4457_v52 = vand.u32 4294901760, %v4456_v31  ;;  %v4409_v43 = vand.u32 4294901760, %v18389_v13 }
 0x254   : > { %15984 = vmatmul.mubr.f32.vlgmr.msra.gmra.mxu0 %v18232_v63  ;;  %v4450_v63 = vand.u32 4294901760, %v4449_v37  ;;  %v18422_v61 = vrot.slane %v2735_v40, %v17718_v17  ;;  %v4839_v16 = vsel %vm2775_vm1, %v2363_v15, 0  ;;  %v18435_v41 = vand.u32 4294901760, %v4842_v20 }
 0x255   : > { %15994 = vmatpush3.xpose.msra.mxu0 %v18180_v47  ;;  %15997 = vmatprep.mubr.f32.mxu0 %v18221_v12  ;;  %v2567_v47 = vcombine.low %v18007_v45, %v18010_v23  ;;  %v2599_v12 = vcombine.low %v18037_v10, %v18040_v29  ;;  %v4401_v3 = vand.u32 4294901760, %v4400_v53  ;;  %v2091_v42 = vcombine.low %v18402_v5, %v18405_v2 }
 0x256   : > { %15995 = vmatprep.subr.mxu0 %v18209_v34  ;;  %16003 = vmatpush3.xpose.msra.mxu1 %v18112_v0  ;;  %v2207_v0 = vcombine.low %v18376_v39, %v18379_v57  ;;  %v18438_v31 = vrot.slane %v2175_v9, %v17718_v17  ;;  %v4410_v53 = vsub.f32 %v18389_v13, %v4409_v43 }
 0x257   : > { %16014 = vmatprep.subr.mxu1 %v4450_v63  ;;  %v18425_v37 = vrot.slane %v2567_v47, %v17718_v17  ;;  %v19909_v47 = vcombine.high %v17985_v56, %v17988_v21  ;;  %v19910_v15 = vcombine.high %v18007_v45, %v18010_v23  ;;  %v4833_v21 = vsel %vm2775_vm1, %v2091_v42, 0 }
 0x258   : > { %v18473_v45 = vand.u32 4294901760, %v4839_v16  ;;  %v4411_v23 = vand.u32 4294901760, %v4410_v53 }
 0x259   : > { %15996 = vmatpush3.xpose.msra.mxu0 %v18209_v34  ;;  %16005 = vmatmul.mubr.f32.vlgmr.msra.gmra.mxu1 %v18216_v27  ;;  %v18428_v34 = vrot.slane %v2599_v12, %v17718_v17  ;;  %v2750_v12 = vrot.slane %v19909_v47, %v17718_v17  ;;  %v2582_v9 = vrot.slane %v19910_v15, %v17718_v17 }
 0x25a   : > { %16007 = vmatprep.subr.mxu0 %v18228_v58  ;;  %16015 = vmatpush3.xpose.msra.mxu1 %v4450_v63  ;;  %v18442_v63 = vrot.slane %v2207_v0, %v17718_v17  ;;  %v19911_v0 = vcombine.high %v18037_v10, %v18040_v29  ;;  %v18478_v10 = vsub.f32 %v4842_v20, %v18435_v41 }
 0x25b   : > { %16018 = vmatprep.mubr.f32.mxu1 %v18292_v36  ;;  %16016 = vmatprep.subr.mxu1 %v4457_v52  ;;  %v18468_v56 = vcombine.high %v18425_v37, %v18428_v34  ;;  %v18503_v47 = vsub.f32 %v4839_v16, %v18473_v45 }
 0x25c   : > { %15998 = vmatmul.mubr.f32.vlgmr.msra.gmra.mxu0 %v18216_v27  ;;  %v19908_v27 = vcombine.high %v17979_v38, %v17982_v46  ;;  %v2614_v38 = vrot.slane %v19911_v0, %v17718_v17  ;;  %v18464_v46 = vcombine.high %v18416_v28, %v18422_v61 }
 0x25d   : > { %16008 = vmatpush3.xpose.msra.mxu0 %v18228_v58  ;;  %16011 = vmatprep.mubr.f32.mxu0 %v4401_v3  ;;  %v2227_v3 = vcombine.low %v18438_v31, %v18442_v63 }
 0x25e   : > { %v2718_v40 = vrot.slane %v19908_v27, %v17718_v17  ;;  %16009 = vmatprep.subr.mxu0 %v18261_v30  ;;  %16017 = vmatpush3.xpose.msra.mxu1 %v4457_v52  ;;  %v18485_v52 = vand.u32 4294901760, %v4833_v21  ;;  %v18489_v42 = vcombine.low %v2582_v9, %v2614_v38  ;;  %v18496_v20 = vcombine.high %v2582_v9, %v2614_v38 }
 0x25f   : > { %16028 = vmatprep.subr.mxu1 %v18228_v58  ;;  %v2364_v9 = vcombine.high %v18353_v60, %v18356_v33 }
 0x260   : > { %v18480_v29 = vcombine.low %v2718_v40, %v2750_v12  ;;  %v18492_v27 = vcombine.high %v2718_v40, %v2750_v12  ;;  %v4912_v53 = vsub.f32 %v4833_v21, %v18485_v52  ;;  %v4836_v40 = vsel %vm2775_vm1, %v2227_v3, 0 }
 0x261   : > { %16010 = vmatpush3.xpose.msra.mxu0 %v18261_v30  ;;  %16019 = vmatmul.mubr.f32.vlgmr.msra.gmra.mxu1 %v18350_v18  ;;  %v18516_v16 = vand.u32 4294901760, %v4836_v40  ;;  %v2228_v21 = vcombine.high %v18438_v31, %v18442_v63  ;;  %v2480_v31 = vcombine.high %v18267_v26, %v18271_v54 }
 0x262   : > { %16021 = vmatprep.subr.mxu0 %v18287_v49  ;;  %16029 = vmatpush3.xpose.msra.mxu1 %v18228_v58  ;;  %v4913_v12 = vand.u32 4294901760, %v4912_v53 }
 0x263   : > { %16032 = vmatprep.mubr.f32.mxu1 %v4399_v11  ;;  %16030 = vmatprep.subr.mxu1 %v18261_v30  ;;  %v18500_v11 = vand.u32 4294901760, %v18478_v10  ;;  %v18528_v15 = vsub.f32 %v4836_v40, %v18516_v16  ;;  %v2448_v40 = vcombine.high %v18255_v1, %v18264_v24  ;;  %v2344_v1 = vcombine.high %v18126_v62, %v18280_v19 }
 0x264   : > { %16012 = vmatmul.mubr.f32.vlgmr.msra.gmra.mxu0 %v4411_v23  ;;  %v2040_v62 = vcombine.high %v18306_v35, %v18318_v59  ;;  %v2072_v19 = vcombine.high %v18321_v48, %v18332_v14 }
 0x265   : > { %16022 = vmatpush3.xpose.msra.mxu0 %v18287_v49  ;;  %16025 = vmatprep.mubr.f32.mxu0 %v18325_v6  ;;  %v4963_v49 = vsub.f32 %v18478_v10, %v18500_v11  ;;  %v18514_v6 = vand.u32 4294901760, %v18503_v47 }
 0x266   : > { %16023 = vmatprep.subr.mxu0 %v18315_v4  ;;  %16031 = vmatpush3.xpose.msra.mxu1 %v18261_v30 }
 0x267   : > { %16042 = vmatprep.subr.mxu1 %v18228_v58 }
 0x269   : > { %16024 = vmatpush3.xpose.msra.mxu0 %v18315_v4  ;;  %16033 = vmatmul.mubr.f32.vlgmr.msra.gmra.mxu1 %v4409_v43  ;;  %v4964_v4 = vand.u32 4294901760, %v4963_v49  ;;  %v4970_v43 = vsub.f32 %v18503_v47, %v18514_v6  ;;  %v18598_v49 = vrot.slane %v2448_v40, %v17718_v17 }
 0x26a   : > { %16035 = vmatprep.subr.mxu0 %v18311_v32  ;;  %16043 = vmatpush3.xpose.msra.mxu1 %v18228_v58  ;;  %v2500_v58 = vcombine.high %v18335_v55, %v18338_v25 }
 0x26b   : > { %16046 = vmatprep.mubr.f32.mxu1 %v18292_v36  ;;  %16044 = vmatprep.subr.mxu1 %v18261_v30 }
 0x26c   : > { %16026 = vmatmul.mubr.f32.vlgmr.msra.gmra.mxu0 %v18389_v13  ;;  %v4914_v13 = vsub.f32 %v4912_v53, %v4913_v12  ;;  %v5356_v0 = vsel %vm2775_vm1, %v2500_v58, 0  ;;  %v2176_v58 = vcombine.high %v18368_v51, %v18373_v7 }
 0x26d   : > { %16036 = vmatpush3.xpose.msra.mxu0 %v18311_v32  ;;  %16039 = vmatprep.mubr.f32.mxu0 %v18292_v36  ;;  %v4971_v36 = vand.u32 4294901760, %v4970_v43  ;;  %v4923_v32 = vand.u32 4294901760, %v18528_v15  ;;  %v18545_v55 = vand.u32 4294901760, %v5356_v0 }
 0x26e   : > { %16037 = vmatprep.subr.mxu0 %v18348_v8  ;;  %16045 = vmatpush3.xpose.msra.mxu1 %v18261_v30  ;;  %v4915_v38 = vand.u32 4294901760, %v4914_v13  ;;  %v2092_v30 = vcombine.high %v18402_v5, %v18405_v2  ;;  %v2208_v13 = vcombine.high %v18376_v39, %v18379_v57  ;;  %v18654_v39 = vrot.slane %v2176_v58, %v17718_v17 }
 0x26f   : > { %16056 = vmatprep.subr.mxu1 %v4964_v4  ;;  %v4924_v25 = vsub.f32 %v18528_v15, %v4923_v32  ;;  %v18558_v5 = vsub.f32 %v5356_v0, %v18545_v55 }
 0x270   : > { %v18657_v57 = vrot.slane %v2208_v13, %v17718_v17 }
 0x271   : > { %16038 = vmatpush3.xpose.msra.mxu0 %v18348_v8  ;;  %16047 = vmatmul.mubr.f32.vlgmr.msra.gmra.mxu1 %v18350_v18  ;;  %v5353_v8 = vsel %vm2775_vm1, %v2364_v9, 0  ;;  %v4925_v33 = vand.u32 4294901760, %v4924_v25  ;;  %v18569_v23 = vand.u32 4294901760, %v18558_v5 }
 0x272   : > { %16049 = vmatprep.subr.mxu0 %v18435_v41  ;;  %16057 = vmatpush3.xpose.msra.mxu1 %v4964_v4  ;;  %v18553_v60 = vand.u32 4294901760, %v5353_v8  ;;  %v2229_v25 = vcombine.low %v18654_v39, %v18657_v57 }
 0x273   : > { %16060 = vmatprep.mubr.f32.mxu1 %v18485_v52  ;;  %16058 = vmatprep.subr.mxu1 %v4971_v36  ;;  %v5477_v24 = vsub.f32 %v18558_v5, %v18569_v23 }
 0x274   : > { %16040 = vmatmul.mubr.f32.vlgmr.msra.gmra.mxu0 %v18350_v18  ;;  %v5347_v18 = vsel %vm2775_vm1, %v2092_v30, 0  ;;  %v18572_v3 = vsub.f32 %v5353_v8, %v18553_v60 }
 0x275   : > { %16050 = vmatpush3.xpose.msra.mxu0 %v18435_v41  ;;  %16053 = vmatprep.mubr.f32.mxu0 %v4915_v38  ;;  %v18561_v2 = vand.u32 4294901760, %v5347_v18  ;;  %v5478_v35 = vand.u32 4294901760, %v5477_v24 }
 0x276   : > { %16051 = vmatprep.subr.mxu0 %v18473_v45  ;;  %16059 = vmatpush3.xpose.msra.mxu1 %v4971_v36  ;;  %v18593_v26 = vand.u32 4294901760, %v18572_v3 }
 0x277   : > { %16070 = vmatprep.subr.mxu1 %v18435_v41  ;;  %v18580_v63 = vsub.f32 %v5347_v18, %v18561_v2 }
 0x278   : > { %v5484_v59 = vsub.f32 %v18572_v3, %v18593_v26 }
 0x279   : > { %16052 = vmatpush3.xpose.msra.mxu0 %v18473_v45  ;;  %16061 = vmatmul.mubr.f32.vlgmr.msra.gmra.mxu1 %v18516_v16 }
 0x27a   : > { %16063 = vmatprep.subr.mxu0 %v18478_v10  ;;  %16071 = vmatpush3.xpose.msra.mxu1 %v18435_v41  ;;  %v5485_v43 = vand.u32 4294901760, %v5484_v59  ;;  %v2230_v59 = vcombine.high %v18654_v39, %v18657_v57 }
 0x27b   : > { %16074 = vmatprep.mubr.f32.mxu1 %v4913_v12  ;;  %16072 = vmatprep.subr.mxu1 %v18473_v45  ;;  %v18632_v12 = vrot.slane %v2072_v19, %v17718_v17 }
 0x27c   : > { %16054 = vmatmul.mubr.f32.vlgmr.msra.gmra.mxu0 %v4925_v33 }
 0x27d   : > { %16064 = vmatpush3.xpose.msra.mxu0 %v18478_v10  ;;  %16067 = vmatprep.mubr.f32.mxu0 %v4912_v53  ;;  %v5350_v10 = vsel %vm2775_vm1, %v2228_v21, 0  ;;  %v2312_v53 = vcombine.high %v18120_v44, %v18123_v50  ;;  %v18601_v44 = vrot.slane %v2480_v31, %v17718_v17  ;;  %v5427_v50 = vand.u32 4294901760, %v18580_v63 }
 0x27e   : > { %16065 = vmatprep.subr.mxu0 %v18503_v47  ;;  %16073 = vmatpush3.xpose.msra.mxu1 %v18473_v45  ;;  %v18595_v54 = vand.u32 4294901760, %v5350_v10  ;;  %v5864_v21 = vsel %vm2775_vm1, %v2229_v25, 0 }
 0x27f   : > { %16084 = vmatprep.subr.mxu1 %v18435_v41  ;;  %v2501_v14 = vcombine.low %v18598_v49, %v18601_v44  ;;  %v18695_v31 = vand.u32 4294901760, %v5864_v21 }
 0x280   : > { %v5436_v48 = vsub.f32 %v5350_v10, %v18595_v54 }
 0x281   : > { %16066 = vmatpush3.xpose.msra.mxu0 %v18503_v47  ;;  %16075 = vmatmul.mubr.f32.vlgmr.msra.gmra.mxu1 %v4923_v32  ;;  %v18613_v47 = vrot.slane %v2312_v53, %v17718_v17  ;;  %v5950_v53 = vsub.f32 %v5864_v21, %v18695_v31 }
 0x282   : > { %16077 = vmatprep.subr.mxu0 %v18500_v11  ;;  %16085 = vmatpush3.xpose.msra.mxu1 %v18435_v41  ;;  %v18618_v41 = vrot.slane %v2344_v1, %v17718_v17 }
 0x283   : > { %16088 = vmatprep.mubr.f32.mxu1 %v18485_v52  ;;  %16086 = vmatprep.subr.mxu1 %v18473_v45 }
 0x284   : > { %16068 = vmatmul.mubr.f32.vlgmr.msra.gmra.mxu0 %v18528_v15  ;;  %v2365_v4 = vcombine.low %v18613_v47, %v18618_v41  ;;  %v5870_v15 = vsel %vm2775_vm1, %v2501_v14, 0  ;;  %v2366_v24 = vcombine.high %v18613_v47, %v18618_v41 }
 0x285   : > { %16078 = vmatpush3.xpose.msra.mxu0 %v18500_v11  ;;  %16081 = vmatprep.mubr.f32.mxu0 %v18485_v52  ;;  %v5428_v11 = vsub.f32 %v18580_v63, %v5427_v50  ;;  %v18629_v52 = vrot.slane %v2040_v62, %v17718_v17  ;;  %v18649_v32 = vand.u32 4294901760, %v5870_v15 }
 0x286   : > { %16079 = vmatprep.subr.mxu0 %v18514_v6  ;;  %16087 = vmatpush3.xpose.msra.mxu1 %v18473_v45  ;;  %v5437_v45 = vand.u32 4294901760, %v5436_v48  ;;  %v5867_v7 = vsel %vm2775_vm1, %v2365_v4, 0 }
 0x287   : > { %16098 = vmatprep.subr.mxu1 %v5478_v35  ;;  %v5429_v36 = vand.u32 4294901760, %v5428_v11  ;;  %v18662_v9 = vand.u32 4294901760, %v5867_v7  ;;  %v18667_v38 = vsub.f32 %v5870_v15, %v18649_v32 }
 0x288   : > { %v5438_v51 = vsub.f32 %v5436_v48, %v5437_v45 }
 0x289   : > { %16080 = vmatpush3.xpose.msra.mxu0 %v18514_v6  ;;  %16089 = vmatmul.mubr.f32.vlgmr.msra.gmra.mxu1 %v18516_v16  ;;  %v2093_v6 = vcombine.low %v18629_v52, %v18632_v12  ;;  %v18679_v8 = vand.u32 4294901760, %v18667_v38  ;;  %v18682_v18 = vsub.f32 %v5867_v7, %v18662_v9 }
 0x28a   : > { %16091 = vmatprep.subr.mxu0 %v18545_v55  ;;  %16099 = vmatpush3.xpose.msra.mxu1 %v5478_v35  ;;  %v5439_v0 = vand.u32 4294901760, %v5438_v51 }
 0x28b   : > { %16102 = vmatprep.mubr.f32.mxu1 %v18561_v2  ;;  %16100 = vmatprep.subr.mxu1 %v5485_v43  ;;  %v18693_v40 = vand.u32 4294901760, %v18682_v18 }
 0x28c   : > { %16082 = vmatmul.mubr.f32.vlgmr.msra.gmra.mxu0 %v18516_v16  ;;  %v5861_v16 = vsel %vm2775_vm1, %v2093_v6, 0  ;;  %v2767_v6 = vcombine.low %v18416_v28, %v18422_v61  ;;  %v2631_v28 = vcombine.low %v18425_v37, %v18428_v34 }
 0x28d   : > { %16092 = vmatpush3.xpose.msra.mxu0 %v18545_v55  ;;  %16095 = vmatprep.mubr.f32.mxu0 %v5429_v36  ;;  %v18670_v30 = vand.u32 4294901760, %v5861_v16  ;;  %v5998_v10 = vsub.f32 %v18682_v18, %v18693_v40 }
 0x28e   : > { %16093 = vmatprep.subr.mxu0 %v18553_v60  ;;  %16101 = vmatpush3.xpose.msra.mxu1 %v5485_v43  ;;  %v18775_v39 = vand.u32 4294901760, %v2767_v6  ;;  %v18782_v57 = vand.u32 4294901760, %v2631_v28 }
 0x28f   : > { %16112 = vmatprep.subr.mxu1 %v18545_v55  ;;  %v5940_v33 = vsub.f32 %v5861_v16, %v18670_v30 }
 0x290   : > { %v18796_v34 = vsub.f32 %v2631_v28, %v18782_v57 }
 0x291   : > { %16094 = vmatpush3.xpose.msra.mxu0 %v18553_v60  ;;  %16103 = vmatmul.mubr.f32.vlgmr.msra.gmra.mxu1 %v18595_v54 }
 0x292   : > { %16105 = vmatprep.subr.mxu0 %v18558_v5  ;;  %16113 = vmatpush3.xpose.msra.mxu1 %v18545_v55 }
 0x293   : > { %16116 = vmatprep.mubr.f32.mxu1 %v5427_v50  ;;  %16114 = vmatprep.subr.mxu1 %v18553_v60 }
 0x294   : > { %16096 = vmatmul.mubr.f32.vlgmr.msra.gmra.mxu0 %v5439_v0 }
 0x295   : > { %16106 = vmatpush3.xpose.msra.mxu0 %v18558_v5  ;;  %16109 = vmatprep.mubr.f32.mxu0 %v18580_v63  ;;  %v5991_v5 = vsub.f32 %v18667_v38, %v18679_v8  ;;  %v5941_v63 = vand.u32 4294901760, %v5940_v33 }
 0x296   : > { %16107 = vmatprep.subr.mxu0 %v18572_v3  ;;  %16115 = vmatpush3.xpose.msra.mxu1 %v18553_v60 }
 0x297   : > { %16126 = vmatprep.subr.mxu1 %v18545_v55  ;;  %v5942_v1 = vsub.f32 %v5940_v33, %v5941_v63 }
 0x299   : > { %16108 = vmatpush3.xpose.msra.mxu0 %v18572_v3  ;;  %16117 = vmatmul.mubr.f32.vlgmr.msra.gmra.mxu1 %v5437_v45  ;;  %v5992_v3 = vand.u32 4294901760, %v5991_v5  ;;  %v5943_v62 = vand.u32 4294901760, %v5942_v1 }
 0x29a   : > { %16119 = vmatprep.subr.mxu0 %v18569_v23  ;;  %16127 = vmatpush3.xpose.msra.mxu1 %v18545_v55  ;;  %v2502_v55 = vcombine.high %v18598_v49, %v18601_v44  ;;  %v6381_v44 = vsel %vm2775_vm1, %v2366_v24, 0 }
 0x29b   : > { %16130 = vmatprep.mubr.f32.mxu1 %v18561_v2  ;;  %16128 = vmatprep.subr.mxu1 %v18553_v60 }
 0x29c   : > { %16110 = vmatmul.mubr.f32.vlgmr.msra.gmra.mxu0 %v5436_v48  ;;  %v6384_v50 = vsel %vm2775_vm1, %v2502_v55, 0 }
 0x29d   : > { %16120 = vmatpush3.xpose.msra.mxu0 %v18569_v23  ;;  %16123 = vmatprep.mubr.f32.mxu0 %v18561_v2  ;;  %v5999_v2 = vand.u32 4294901760, %v5998_v10  ;;  %v5951_v23 = vand.u32 4294901760, %v5950_v53 }
 0x29e   : > { %16121 = vmatprep.subr.mxu0 %v18593_v26  ;;  %16129 = vmatpush3.xpose.msra.mxu1 %v18553_v60  ;;  %v2094_v60 = vcombine.high %v18629_v52, %v18632_v12  ;;  %v6378_v52 = vsel %vm2775_vm1, %v2230_v59, 0 }
 0x29f   : > { %16140 = vmatprep.subr.mxu1 %v5992_v3  ;;  %v5952_v49 = vsub.f32 %v5950_v53, %v5951_v23  ;;  %v18756_v43 = vand.u32 4294901760, %v6378_v52 }
 0x2a0   : > { %v6375_v19 = vsel %vm2775_vm1, %v2094_v60, 0 }
 0x2a1   : > { %16122 = vmatpush3.xpose.msra.mxu0 %v18593_v26  ;;  %16131 = vmatmul.mubr.f32.vlgmr.msra.gmra.mxu1 %v18595_v54  ;;  %v18720_v26 = vand.u32 4294901760, %v6384_v50  ;;  %v5953_v47 = vand.u32 4294901760, %v5952_v49  ;;  %v18735_v35 = vand.u32 4294901760, %v6375_v19  ;;  %v6464_v13 = vsub.f32 %v6378_v52, %v18756_v43 }
 0x2a2   : > { %16133 = vmatprep.subr.mxu0 %v18649_v32  ;;  %16141 = vmatpush3.xpose.msra.mxu1 %v5992_v3 }
 0x2a3   : > { %16144 = vmatprep.mubr.f32.mxu1 %v18670_v30  ;;  %16142 = vmatprep.subr.mxu1 %v5999_v2  ;;  %v18732_v41 = vsub.f32 %v6384_v50, %v18720_v26  ;;  %v6454_v11 = vsub.f32 %v6375_v19, %v18735_v35  ;;  %v6465_v51 = vand.u32 4294901760, %v6464_v13 }
 0x2a4   : > { %16124 = vmatmul.mubr.f32.vlgmr.msra.gmra.mxu0 %v18595_v54  ;;  %v18727_v54 = vand.u32 4294901760, %v6381_v44 }
 0x2a5   : > { %16134 = vmatpush3.xpose.msra.mxu0 %v18649_v32  ;;  %16137 = vmatprep.mubr.f32.mxu0 %v5943_v62  ;;  %v18743_v48 = vand.u32 4294901760, %v18732_v41  ;;  %v6455_v45 = vand.u32 4294901760, %v6454_v11  ;;  %v6466_v61 = vsub.f32 %v6464_v13, %v6465_v51 }
 0x2a6   : > { %16135 = vmatprep.subr.mxu0 %v18662_v9  ;;  %16143 = vmatpush3.xpose.msra.mxu1 %v5999_v2  ;;  %v6510_v14 = vsub.f32 %v6381_v44, %v18727_v54 }
 0x2a7   : > { %16154 = vmatprep.subr.mxu1 %v18649_v32  ;;  %v6505_v12 = vsub.f32 %v18732_v41, %v18743_v48  ;;  %v6456_v36 = vsub.f32 %v6454_v11, %v6455_v45  ;;  %v6467_v16 = vand.u32 4294901760, %v6466_v61 }
 0x2a8   : > { %v18754_v4 = vand.u32 4294901760, %v6510_v14 }
 0x2a9   : > { %16136 = vmatpush3.xpose.msra.mxu0 %v18662_v9  ;;  %16145 = vmatmul.mubr.f32.vlgmr.msra.gmra.mxu1 %v18695_v31  ;;  %v6506_v15 = vand.u32 4294901760, %v6505_v12  ;;  %v6457_v7 = vand.u32 4294901760, %v6456_v36 }
 0x2aa   : > { %16147 = vmatprep.subr.mxu0 %v18667_v38  ;;  %16155 = vmatpush3.xpose.msra.mxu1 %v18649_v32  ;;  %v6512_v58 = vsub.f32 %v6510_v14, %v18754_v4 }
 0x2ab   : > { %16158 = vmatprep.mubr.f32.mxu1 %v5941_v63  ;;  %16156 = vmatprep.subr.mxu1 %v18662_v9 }
 0x2ac   : > { %16138 = vmatmul.mubr.f32.vlgmr.msra.gmra.mxu0 %v5953_v47 }
 0x2ad   : > { %16148 = vmatpush3.xpose.msra.mxu0 %v18667_v38  ;;  %16151 = vmatprep.mubr.f32.mxu0 %v5940_v33  ;;  %v18804_v38 = vand.u32 4294901760, %v18796_v34 }
 0x2ae   : > { %16149 = vmatprep.subr.mxu0 %v18682_v18  ;;  %16157 = vmatpush3.xpose.msra.mxu1 %v18662_v9 }
 0x2af   : > { %16168 = vmatprep.subr.mxu1 %v18649_v32  ;;  %v7237_v25 = vsub.f32 %v18796_v34, %v18804_v38 }
 0x2b1   : > { %16150 = vmatpush3.xpose.msra.mxu0 %v18682_v18  ;;  %16159 = vmatmul.mubr.f32.vlgmr.msra.gmra.mxu1 %v5951_v23  ;;  %v7238_v33 = vand.u32 4294901760, %v7237_v25 }
 0x2b2   : > { %16161 = vmatprep.subr.mxu0 %v18679_v8  ;;  %16169 = vmatpush3.xpose.msra.mxu1 %v18649_v32  ;;  %v6513_v32 = vand.u32 4294901760, %v6512_v58 }
 0x2b3   : > { %16172 = vmatprep.mubr.f32.mxu1 %v18670_v30  ;;  %16170 = vmatprep.subr.mxu1 %v18662_v9 }
 0x2b4   : > { %16152 = vmatmul.mubr.f32.vlgmr.msra.gmra.mxu0 %v5950_v53 }
 0x2b5   : > { %16162 = vmatpush3.xpose.msra.mxu0 %v18679_v8  ;;  %16165 = vmatprep.mubr.f32.mxu0 %v18670_v30 }
 0x2b6   : > { %16163 = vmatprep.subr.mxu0 %v18693_v40  ;;  %16171 = vmatpush3.xpose.msra.mxu1 %v18662_v9  ;;  %v18787_v9 = vsub.f32 %v2767_v6, %v18775_v39 }
 0x2b7   : > { %16182 = vmatprep.subr.mxu1 %v6506_v15 }
 0x2b8   : > { %v18793_v37 = vand.u32 4294901760, %v18787_v9 }
 0x2b9   : > { %16164 = vmatpush3.xpose.msra.mxu0 %v18693_v40  ;;  %16173 = vmatmul.mubr.f32.vlgmr.msra.gmra.mxu1 %v18695_v31 }
 0x2ba   : > { %16175 = vmatprep.subr.mxu0 %v18720_v26  ;;  %16183 = vmatpush3.xpose.msra.mxu1 %v6506_v15  ;;  %v7230_v0 = vsub.f32 %v18787_v9, %v18793_v37 }
 0x2bb   : > { %16186 = vmatprep.mubr.f32.mxu1 %v18735_v35  ;;  %16184 = vmatprep.subr.mxu1 %v6513_v32 }
 0x2bc   : > { %16166 = vmatmul.mubr.f32.vlgmr.msra.gmra.mxu0 %v18695_v31  ;;  %v7231_v30 = vand.u32 4294901760, %v7230_v0 }
 0x2bd   : > { %16176 = vmatpush3.xpose.msra.mxu0 %v18720_v26  ;;  %16179 = vmatprep.mubr.f32.mxu0 %v6457_v7 }
 0x2be   : > { %16177 = vmatprep.subr.mxu0 %v18727_v54  ;;  %16185 = vmatpush3.xpose.msra.mxu1 %v6513_v32 }
 0x2bf   : > { %16196 = vmatprep.subr.mxu1 %v18720_v26 }
 0x2c1   : > { %16178 = vmatpush3.xpose.msra.mxu0 %v18727_v54  ;;  %16187 = vmatmul.mubr.f32.vlgmr.msra.gmra.mxu1 %v18756_v43 }
 0x2c2   : > { %16189 = vmatprep.subr.mxu0 %v18732_v41  ;;  %16197 = vmatpush3.xpose.msra.mxu1 %v18720_v26 }
 0x2c3   : > { %16200 = vmatprep.mubr.f32.mxu1 %v6455_v45  ;;  %16198 = vmatprep.subr.mxu1 %v18727_v54 }
 0x2c4   : > { %16180 = vmatmul.mubr.f32.vlgmr.msra.gmra.mxu0 %v6467_v16 }
 0x2c5   : > { %16190 = vmatpush3.xpose.msra.mxu0 %v18732_v41  ;;  %16193 = vmatprep.mubr.f32.mxu0 %v6454_v11 }
 0x2c6   : > { %16191 = vmatprep.subr.mxu0 %v6510_v14  ;;  %16199 = vmatpush3.xpose.msra.mxu1 %v18727_v54 }
 0x2c7   : > { %16210 = vmatprep.subr.mxu1 %v18720_v26 }
 0x2c9   : > { %16192 = vmatpush3.xpose.msra.mxu0 %v6510_v14  ;;  %16201 = vmatmul.mubr.f32.vlgmr.msra.gmra.mxu1 %v6465_v51 }
 0x2ca   : > { %16203 = vmatprep.subr.mxu0 %v18743_v48  ;;  %16211 = vmatpush3.xpose.msra.mxu1 %v18720_v26 }
 0x2cb   : > { %16214 = vmatprep.mubr.f32.mxu1 %v18735_v35  ;;  %16212 = vmatprep.subr.mxu1 %v18727_v54  ;;  %v15894_v18 = vpop.f32.mrf.mxu1 }
 0x2cc   : > { %16194 = vmatmul.mubr.f32.vlgmr.msra.gmra.mxu0 %v6464_v13 }
 0x2cd   : > { %16204 = vmatpush3.xpose.msra.mxu0 %v18743_v48  ;;  %16207 = vmatprep.mubr.f32.mxu0 %v18735_v35  ;;  %v2952_v5 = vpop.f32.mrf.mxu1 }
 0x2ce   : > { %16205 = vmatprep.subr.mxu0 %v18754_v4  ;;  %16213 = vmatpush3.xpose.msra.mxu1 %v18727_v54 }
 0x2cf   : > { %16224 = vmatprep.subr.mxu1 %v7231_v30 }
 0x2d1   : > { %16206 = vmatpush3.xpose.msra.mxu0 %v18754_v4  ;;  %16215 = vmatmul.mubr.f32.vlgmr.msra.gmra.mxu1 %v18756_v43 }
 0x2d2   : > { %16217 = vmatprep.subr.mxu0 %v18775_v39  ;;  %16225 = vmatpush3.msra.mxu1 %v7231_v30 }
 0x2d3   : > { %v15887_v8 = vpop.f32.mrf.mxu0  ;;  %16226 = vmatprep.subr.mxu1 %v7238_v33  ;;  %v15908_v31 = vpop.f32.mrf.mxu1 }
 0x2d4   : > { %16208 = vmatmul.mubr.f32.vlgmr.msra.gmra.mxu0 %v18756_v43  ;;  %16227 = vmatpush3.msra.mxu1 %v7238_v33  ;;  %v2959_v63 = vadd.f32 %v15894_v18, %v15887_v8 }
 0x2d5   : > { %v2861_v21 = vpop.f32.mrf.mxu0  ;;  %16218 = vmatpush3.msra.mxu0 %v18775_v39  ;;  %16238 = vmatprep.subr.mxu1 %v18775_v39  ;;  %v3116_v55 = vpop.f32.mrf.mxu1 }
 0x2d6   : > { %16219 = vmatprep.subr.mxu0 %v18782_v57  ;;  %v2953_v10 = vadd.f32 %v2952_v5, %v2861_v21 }
 0x2d7   : > { %16220 = vmatpush3.msra.mxu0 %v18782_v57 }
 0x2d8   : > { %16231 = vmatprep.subr.mxu0 %v18787_v9 }
 0x2db   : > { %v15901_v40 = vpop.f32.mrf.mxu0 }
 0x2dc   : > { %v3042_v53 = vadd.f32 %v15901_v40, %v2959_v63 }
 0x2dd   : > { %v3034_v3 = vpop.f32.mrf.mxu0  ;;  %v15922_v2 = vpop.f32.mrf.mxu1 }
 0x2de   : > { %v3035_v1 = vadd.f32 %v3034_v3, %v2953_v10  ;;  %v3125_v23 = vadd.f32 %v15908_v31, %v3042_v53 }
 0x2df   : > { %v3280_v26 = vpop.f32.mrf.mxu1 }
 0x2e0   : > { %v3117_v50 = vadd.f32 %v3116_v55, %v3035_v1 }
 0x2e3   : > { %v15915_v24 = vpop.f32.mrf.mxu0 }
 0x2e4   : > { %v3208_v62 = vadd.f32 %v15915_v24, %v3125_v23 }
 0x2e5   : > { %v3201_v60 = vpop.f32.mrf.mxu0 }
 0x2e6   : > { %v3287_v49 = vadd.f32 %v15922_v2, %v3208_v62  ;;  %v3202_v44 = vadd.f32 %v3201_v60, %v3117_v50 }
 0x2e8   : > { %v3281_v19 = vadd.f32 %v3280_v26, %v3202_v44  ;;  %v6890_v54 = vsel %vm6888_vm2, %v3287_v49, -inf }
 0x2ea   : > { %v6889_v47 = vsel %vm6888_vm2, %v3281_v19, -inf }
 0x2eb   : > { %v6891_v41 = vmax.f32 %v6889_v47, %v6890_v54 }
 0x2ed   : > { %v6892_v35 = vrot.slane %v6891_v41, 4 }
 0x2ef   : > { %v6893_v59 = vmax.f32 %v6891_v41, %v6892_v35  ;;  %v15936_v58 = vpop.f32.mrf.mxu1 }
 0x2f1   : > { %v6894_v48 = vrot.slane %v6893_v59, 2  ;;  %v15929_v43 = vpop.f32.mrf.mxu0  ;;  %v3466_v36 = vpop.f32.mrf.mxu1 }
 0x2f2   : > { %v3473_v32 = vadd.f32 %v15936_v58, %v15929_v43 }
 0x2f3   : > { %v6895_v14 = vmax.f32 %v6893_v59, %v6894_v48  ;;  %v3375_v13 = vpop.f32.mrf.mxu0 }
 0x2f4   : > { %v3467_v28 = vadd.f32 %v3466_v36, %v3375_v13 }
 0x2f5   : > { %v6896_v11 = vrot.slane %v6895_v14, 1 }
 0x2f7   : > { %v6897_v52 = vmax.f32 %v6895_v14, %v6896_v11  ;;  %v15950_v51 = vpop.f32.mrf.mxu1 }
 0x2f9   : > { %v6961_v12 = vsub.f32 %v3281_v19, %v6897_v52  ;;  %v6962_v4 = vsub.f32 %v3287_v49, %v6897_v52  ;;  %v15943_v6 = vpop.f32.mrf.mxu0  ;;  %v3630_v0 = vpop.f32.mrf.mxu1 }
 0x2fa   : > { %v3556_v61 = vadd.f32 %v15943_v6, %v3473_v32 }
 0x2fb   : > { %v6977_v45 = vmul.f32 1.442695, %v6961_v12  ;;  %v6979_v15 = vmul.f32 1.442695, %v6962_v4  ;;  %v3548_v7 = vpop.f32.mrf.mxu0 }
 0x2fc   : > { %v3549_v16 = vadd.f32 %v3548_v7, %v3467_v28  ;;  %v3639_v30 = vadd.f32 %v15950_v51, %v3556_v61 }
 0x2fd   : > { %16883 = vpow2.f32 %v6977_v45 }
 0x2fe   : > { %16885 = vpow2.f32 %v6979_v15  ;;  %v3631_v18 = vadd.f32 %v3630_v0, %v3549_v16 }
 0x2ff   : > { %v15964_v25 = vpop.f32.mrf.mxu1 }
 0x301   : > { %v15957_v8 = vpop.f32.mrf.mxu0  ;;  %v3794_v40 = vpop.f32.mrf.mxu1 }
 0x302   : > { %v3722_v33 = vadd.f32 %v15957_v8, %v3639_v30 }
 0x303   : > { %v3715_v5 = vpop.f32.mrf.mxu0 }
 0x304   : > { %v3801_v3 = vadd.f32 %v15964_v25, %v3722_v33  ;;  %v3716_v10 = vadd.f32 %v3715_v5, %v3631_v18  ;;  %v18831_v18 = vand.u32 4294901760, %v18464_v46 }
 0x306   : > { %v3795_v1 = vadd.f32 %v3794_v40, %v3716_v10  ;;  %v6899_v23 = vsel %vm6888_vm2, %v3801_v3, -inf  ;;  %v18842_v10 = vsub.f32 %v18464_v46, %v18831_v18 }
 0x308   : > { %v6898_v24 = vsel %vm6888_vm2, %v3795_v1, -inf  ;;  %v15978_v19 = vpop.f32.mrf.mxu1 }
 0x309   : > { %v6900_v50 = vmax.f32 %v6898_v24, %v6899_v23 }
 0x30a   : > { %v16884_v21 = vpop.eup %16883  ;;  %v3980_v48 = vpop.f32.mrf.mxu1 }
 0x30b   : > { %v16886_v31 = vpop.eup %16885  ;;  %v7009_v63 = vsel %vm6888_vm2, %v16884_v21, 0.0  ;;  %v6901_v60 = vrot.slane %v6900_v50, 4 }
 0x30c   : > { %v7010_v53 = vsel %vm6888_vm2, %v16886_v31, 0.0  ;;  %v15971_v44 = vpop.f32.mrf.mxu0 }
 0x30d   : > { %v7011_v55 = vadd.f32 %v7010_v53, %v7009_v63  ;;  %v6902_v49 = vmax.f32 %v6900_v50, %v6901_v60  ;;  %v3987_v4 = vadd.f32 %v15978_v19, %v15971_v44  ;;  %v18838_v63 = vand.u32 4294901760, %v18468_v56 }
 0x30e   : > { %v3889_v59 = vpop.f32.mrf.mxu0  ;;  %v18859_v19 = vand.u32 4294901760, %v18842_v10 }
 0x30f   : > { %v7012_v2 = vrot.slane %v7011_v55, 4  ;;  %v6903_v47 = vrot.slane %v6902_v49, 2  ;;  %v3981_v15 = vadd.f32 %v3980_v48, %v3889_v59 }
 0x311   : > { %v7013_v62 = vadd.f32 %v7012_v2, %v7011_v55  ;;  %v6904_v35 = vmax.f32 %v6902_v49, %v6903_v47  ;;  %v15992_v12 = vpop.f32.mrf.mxu1 }
 0x313   : > { %v7014_v26 = vrot.slane %v7013_v62, 2  ;;  %v6905_v11 = vrot.slane %v6904_v35, 1  ;;  %v4144_v6 = vpop.f32.mrf.mxu1 }
 0x314   : > { %v15985_v52 = vpop.f32.mrf.mxu0 }
 0x315   : > { %v7015_v54 = vadd.f32 %v7014_v26, %v7013_v62  ;;  %v6906_v43 = vmax.f32 %v6904_v35, %v6905_v11  ;;  %v4070_v58 = vadd.f32 %v15985_v52, %v3987_v4  ;;  %v18852_v62 = vsub.f32 %v18468_v56, %v18838_v63 }
 0x316   : > { %v4062_v45 = vpop.f32.mrf.mxu0  ;;  %v7738_v4 = vsub.f32 %v18842_v10, %v18859_v19 }
 0x317   : > { %v7016_v41 = vrot.slane %v7015_v54, 1  ;;  %v6963_v13 = vsub.f32 %v3795_v1, %v6906_v43  ;;  %v6964_v36 = vsub.f32 %v3801_v3, %v6906_v43  ;;  %v4063_v32 = vadd.f32 %v4062_v45, %v3981_v15 }
 0x318   : > { %v4153_v61 = vadd.f32 %v15992_v12, %v4070_v58  ;;  %v18872_v47 = vand.u32 4294901760, %v18852_v62 }
 0x319   : > { %v7017_v14 = vadd.f32 %v7016_v41, %v7015_v54  ;;  %v6981_v51 = vmul.f32 1.442695, %v6963_v13  ;;  %v6983_v7 = vmul.f32 1.442695, %v6964_v36  ;;  %v16006_v28 = vpop.f32.mrf.mxu1  ;;  %v4145_v0 = vadd.f32 %v4144_v6, %v4063_v32  ;;  %v18888_v36 = vpop.permute.xlu1 %1125 }
 0x31a   : > { %v18890_v6 = vpop.permute.xlu0 %1119 }
 0x31b   : > { %16887 = vrcp.f32 %v7017_v14  ;;  %v4308_v8 = vpop.f32.mrf.mxu1 }
 0x31c   : > { %16889 = vpow2.f32 %v6981_v51  ;;  %v15999_v16 = vpop.f32.mrf.mxu0 }
 0x31d   : > { %16891 = vpow2.f32 %v6983_v7  ;;  %v4236_v30 = vadd.f32 %v15999_v16, %v4153_v61 }
 0x31e   : > { %v4229_v25 = vpop.f32.mrf.mxu0 }
 0x31f   : > { %v18833_v33 = vadd.f32 %v16006_v28, %v4236_v30  ;;  %v4230_v5 = vadd.f32 %v4229_v25, %v4145_v0  ;;  %v7745_v0 = vsub.f32 %v18852_v62, %v18872_v47 }
 0x321   : > { %v18835_v40 = vadd.f32 %v4308_v8, %v4230_v5  ;;  %v6908_v53 = vsel %vm6888_vm2, %v18833_v33, -inf  ;;  %v16020_v26 = vpop.f32.mrf.mxu1  ;;  %v7739_v8 = vand.u32 4294901760, %v7738_v4 }
 0x323   : > { %v6907_v55 = vsel %vm6888_vm2, %v18835_v40, -inf  ;;  %v4494_v14 = vpop.f32.mrf.mxu1 }
 0x324   : > { %v6909_v23 = vmax.f32 %v6907_v55, %v6908_v53  ;;  %v16013_v46 = vpop.f32.mrf.mxu0 }
 0x325   : > { %v4501_v32 = vadd.f32 %v16020_v26, %v16013_v46  ;;  %v1122_v46 = vpop.permute.xlu0 %1121 }
 0x326   : > { %v6910_v60 = vrot.slane %v6909_v23, 4  ;;  %v4403_v48 = vpop.f32.mrf.mxu0 }
 0x327   : > { %v4495_v30 = vadd.f32 %v4494_v14, %v4403_v48 }
 0x328   : > { %v16888_v3 = vpop.eup %16887 }
 0x329   : > { %v7089_v1 = vmul.f32 %v16888_v3, %v16884_v21  ;;  %v7090_v2 = vmul.f32 %v16888_v3, %v16886_v31  ;;  %v6911_v21 = vmax.f32 %v6909_v23, %v6910_v60  ;;  %v18868_v56 = vpop.eup %16889  ;;  %v16034_v58 = vpop.f32.mrf.mxu1 }
 0x32a   : > { %v18874_v41 = vpop.eup %16891  ;;  %v7018_v35 = vsel %vm6888_vm2, %v18868_v56, 0.0  ;;  %v1128_v60 = vpop.permute.xlu1 %1127 }
 0x32b   : > { %v7106_v24 = vsel %vm6888_vm2, %v7089_v1, 0  ;;  %v7109_v50 = vsel %vm6888_vm2, %v7090_v2, 0  ;;  %v6912_v59 = vrot.slane %v6911_v21, 2  ;;  %v7019_v12 = vsel %vm6888_vm2, %v18874_v41, 0.0  ;;  %v4658_v55 = vpop.f32.mrf.mxu1 }
 0x32c   : > { %v18854_v49 = vand.u32 4294901760, %v7106_v24  ;;  %v18856_v44 = vand.u32 4294901760, %v7109_v50  ;;  %v7020_v43 = vadd.f32 %v7019_v12, %v7018_v35  ;;  %v16027_v15 = vpop.f32.mrf.mxu0  ;;  %v1134_v12 = vpop.permute.xlu0 %1133 }
 0x32d   : > { %v6913_v45 = vmax.f32 %v6911_v21, %v6912_v59  ;;  %v4584_v25 = vadd.f32 %v16027_v15, %v4501_v32 }
 0x32e   : > { %16228 = vmatprep.mubr.f32.mxu1 %v18854_v49  ;;  %v18863_v31 = vsub.f32 %v7109_v50, %v18856_v44  ;;  %v18866_v54 = vsub.f32 %v7106_v24, %v18854_v49  ;;  %v7021_v7 = vrot.slane %v7020_v43, 4  ;;  %v4576_v61 = vpop.f32.mrf.mxu0  ;;  %v7746_v50 = vand.u32 4294901760, %v7745_v0 }
 0x32f   : > { %16229 = vmatmul.mubr.f32.vlgmr.msra.gmra.mxu1 %v18856_v44  ;;  %v6914_v28 = vrot.slane %v6913_v45, 1  ;;  %v4577_v1 = vadd.f32 %v4576_v61, %v4495_v30  ;;  %v4667_v26 = vadd.f32 %v16034_v58, %v4584_v25 }
 0x330   : > { %16239 = vmatpush3.msra.mxu1 %v18775_v39  ;;  %v7180_v11 = vand.u32 4294901760, %v18866_v54  ;;  %v7190_v52 = vand.u32 4294901760, %v18863_v31  ;;  %v7022_v3 = vadd.f32 %v7021_v7, %v7020_v43  ;;  %v18932_v61 = vpop.permute.xlu0 %1131 }
 0x331   : > { %16240 = vmatprep.subr.mxu1 %v18782_v57  ;;  %v6915_v53 = vmax.f32 %v6913_v45, %v6914_v28  ;;  %v16048_v24 = vpop.f32.mrf.mxu1 }
 0x332   : > { %16241 = vmatpush3.msra.mxu1 %v18782_v57  ;;  %16242 = vmatprep.mubr.f32.mxu1 %v7180_v11  ;;  %v7181_v13 = vsub.f32 %v18866_v54, %v7180_v11  ;;  %v7191_v51 = vsub.f32 %v18863_v31, %v7190_v52 }
 0x333   : > { %16252 = vmatprep.subr.mxu1 %v18775_v39  ;;  %16243 = vmatmul.mubr.f32.vlgmr.msra.gmra.mxu1 %v7190_v52  ;;  %v6965_v2 = vsub.f32 %v18835_v40, %v6915_v53  ;;  %v6966_v23 = vsub.f32 %v18833_v33, %v6915_v53  ;;  %v4659_v33 = vadd.f32 %v4658_v55, %v4577_v1  ;;  %v4822_v14 = vpop.f32.mrf.mxu1  ;;  %v18947_v55 = vand.u32 4294901760, %v18480_v29 }
 0x334   : > { %16253 = vmatpush3.msra.mxu1 %v18775_v39  ;;  %16256 = vmatprep.mubr.f32.mxu1 %v18854_v49  ;;  %v7182_v16 = vand.u32 4294901760, %v7181_v13  ;;  %v7192_v5 = vand.u32 4294901760, %v7191_v51  ;;  %v7023_v39 = vrot.slane %v7022_v3, 2  ;;  %v16041_v59 = vpop.f32.mrf.mxu0 }
 0x335   : > { %16254 = vmatprep.subr.mxu1 %v18782_v57  ;;  %v6985_v21 = vmul.f32 1.442695, %v6965_v2  ;;  %v6987_v35 = vmul.f32 1.442695, %v6966_v23  ;;  %v4750_v40 = vadd.f32 %v16041_v59, %v4667_v26  ;;  %v1447_v2 = vcombine.low %v18890_v6, %v18932_v61 }
 0x336   : > { %16255 = vmatpush3.msra.mxu1 %v18782_v57  ;;  %16221 = vmatprep.mubr.f32.mxu0 %v7182_v16  ;;  %v7024_v57 = vadd.f32 %v7023_v39, %v7022_v3  ;;  %v4743_v48 = vpop.f32.mrf.mxu0 }
 0x337   : > { %16266 = vmatprep.subr.mxu1 %v7739_v8  ;;  %16222 = vmatmul.mubr.f32.vlgmr.msra.gmra.mxu0 %v7192_v5  ;;  %16893 = vpow2.f32 %v6985_v21  ;;  %v18909_v11 = vadd.f32 %v16048_v24, %v4750_v40  ;;  %v4744_v52 = vadd.f32 %v4743_v48, %v4659_v33  ;;  %v18958_v21 = vand.u32 4294901760, %v18489_v42 }
 0x338   : > { %16232 = vmatpush3.msra.mxu0 %v18787_v9  ;;  %16257 = vmatmul.mubr.f32.vlgmr.msra.gmra.mxu1 %v18856_v44  ;;  %v7025_v9 = vrot.slane %v7024_v57, 1  ;;  %16895 = vpow2.f32 %v6987_v35 }
 0x339   : > { %16267 = vmatpush3.msra.mxu1 %v7739_v8  ;;  %16233 = vmatprep.subr.mxu0 %v18796_v34  ;;  %v18914_v4 = vadd.f32 %v4822_v14, %v4744_v52  ;;  %v6917_v43 = vsel %vm6888_vm2, %v18909_v11, -inf  ;;  %v16062_v32 = vpop.f32.mrf.mxu1 }
 0x33a   : > { %16235 = vmatprep.mubr.f32.mxu0 %v18866_v54  ;;  %16268 = vmatprep.subr.mxu1 %v7746_v50  ;;  %v1140_v54 = vpop.permute.xlu1 %1139 }
 0x33b   : > { %16234 = vmatpush3.msra.mxu0 %v18796_v34  ;;  %16269 = vmatpush3.msra.mxu1 %v7746_v50  ;;  %v7026_v34 = vadd.f32 %v7025_v9, %v7024_v57  ;;  %v1872_v15 = vcombine.high %v1128_v60, %v1140_v54  ;;  %v5008_v8 = vpop.f32.mrf.mxu1 }
 0x33c   : > { %16245 = vmatprep.subr.mxu0 %v18793_v37  ;;  %16280 = vmatprep.subr.mxu1 %v18831_v18  ;;  %v16055_v13 = vpop.f32.mrf.mxu0 }
 0x33d   : > { %16236 = vmatmul.mubr.f32.vlgmr.msra.gmra.mxu0 %v18863_v31  ;;  %16897 = vrcp.f32 %v7026_v34  ;;  %v6916_v31 = vsel %vm6888_vm2, %v18914_v4, -inf  ;;  %v18935_v16 = vrot.slane %v1872_v15, %v17715_v22  ;;  %v5015_v57 = vadd.f32 %v16062_v32, %v16055_v13 }
 0x33e   : > { %16246 = vmatpush3.msra.mxu0 %v18793_v37  ;;  %16249 = vmatprep.mubr.f32.mxu0 %v18854_v49  ;;  %v1871_v37 = vcombine.low %v1128_v60, %v1140_v54  ;;  %v1855_v49 = vcombine.low %v1122_v46, %v1134_v12  ;;  %v6918_v45 = vmax.f32 %v6916_v31, %v6917_v43  ;;  %v18930_v7 = vpop.permute.xlu1 %1137  ;;  %v4917_v25 = vpop.f32.mrf.mxu0 }
 0x33f   : > { %16247 = vmatprep.subr.mxu0 %v18804_v38  ;;  %v1463_v3 = vcombine.low %v18888_v36, %v18930_v7  ;;  %v1464_v53 = vcombine.high %v18888_v36, %v18930_v7  ;;  %v5009_v52 = vadd.f32 %v5008_v8, %v4917_v25  ;;  %v18969_v54 = vsub.f32 %v18480_v29, %v18947_v55 }
 0x340   : > { %16248 = vmatpush3.msra.mxu0 %v18804_v38  ;;  %v1856_v38 = vcombine.high %v1122_v46, %v1134_v12  ;;  %v6919_v58 = vrot.slane %v6918_v45, 4  ;;  %v1879_v51 = vrot.slane %v1871_v37, %v17715_v22 }
 0x341   : > { %16259 = vmatprep.subr.mxu0 %v18831_v18  ;;  %16250 = vmatmul.mubr.f32.vlgmr.msra.gmra.mxu0 %v18856_v44  ;;  %v1863_v44 = vrot.slane %v1855_v49, %v17715_v22  ;;  %v16076_v60 = vpop.f32.mrf.mxu1  ;;  %v18965_v14 = vrot.slane %v1463_v3, %v17715_v22 }
 0x342   : > { %16260 = vmatpush3.msra.mxu0 %v18831_v18  ;;  %v6920_v28 = vmax.f32 %v6918_v45, %v6919_v58  ;;  %v18938_v0 = vrot.slane %v1856_v38, %v17715_v22  ;;  %v18981_v58 = vsub.f32 %v18489_v42, %v18958_v21 }
 0x343   : > { %16261 = vmatprep.subr.mxu0 %v18838_v63  ;;  %v1919_v39 = vcombine.low %v1863_v44, %v1879_v51  ;;  %v1920_v46 = vcombine.high %v1863_v44, %v1879_v51  ;;  %v5172_v31 = vpop.f32.mrf.mxu1 }
 0x344   : > { %16262 = vmatpush3.msra.mxu0 %v18838_v63  ;;  %v6921_v30 = vrot.slane %v6920_v28, 2  ;;  %v18940_v5 = vpop.eup %16893  ;;  %v16069_v50 = vpop.f32.mrf.mxu0  ;;  %v1935_v35 = vcombine.low %v18938_v0, %v18935_v16  ;;  %v1936_v59 = vcombine.high %v18938_v0, %v18935_v16 }
 0x345   : > { %16273 = vmatprep.subr.mxu0 %v18842_v10  ;;  %v18949_v1 = vpop.eup %16895  ;;  %v7027_v23 = vsel %vm6888_vm2, %v18940_v5, 0.0  ;;  %v5098_v34 = vadd.f32 %v16069_v50, %v5015_v57  ;;  %v18974_v45 = vrot.slane %v1919_v39, %v17718_v17  ;;  %v18977_v15 = vrot.slane %v1920_v46, %v17718_v17 }
 0x346   : > { %v6922_v24 = vmax.f32 %v6920_v28, %v6921_v30  ;;  %v7028_v26 = vsel %vm6888_vm2, %v18949_v1, 0.0  ;;  %v5090_v9 = vpop.f32.mrf.mxu0  ;;  %v18990_v30 = vand.u32 4294901760, %v18969_v54  ;;  %v19003_v57 = vand.u32 4294901760, %v18981_v58 }
 0x347   : > { %v7029_v33 = vadd.f32 %v7028_v26, %v7027_v23  ;;  %v5091_v38 = vadd.f32 %v5090_v9, %v5009_v52 }
 0x348   : > { %v6923_v40 = vrot.slane %v6922_v24, 1 }
 0x349   : > { %v7030_v12 = vrot.slane %v7029_v33, 4  ;;  %v16090_v51 = vpop.f32.mrf.mxu1 }
 0x34a   : > { %v16898_v48 = vpop.eup %16897  ;;  %v6924_v43 = vmax.f32 %v6922_v24, %v6923_v40 }
 0x34b   : > { %v7091_v37 = vmul.f32 %v16898_v48, %v18868_v56  ;;  %v7092_v49 = vmul.f32 %v16898_v48, %v18874_v41  ;;  %v7031_v29 = vadd.f32 %v7030_v12, %v7029_v33  ;;  %v5181_v41 = vadd.f32 %v16076_v60, %v5098_v34  ;;  %v5336_v46 = vpop.f32.mrf.mxu1 }
 0x34c   : > { %v6967_v13 = vsub.f32 %v18914_v4, %v6924_v43  ;;  %v6968_v32 = vsub.f32 %v18909_v11, %v6924_v43  ;;  %v16083_v3 = vpop.f32.mrf.mxu0  ;;  %v1448_v11 = vcombine.high %v18890_v6, %v18932_v61  ;;  %v5173_v4 = vadd.f32 %v5172_v31, %v5091_v38 }
 0x34d   : > { %v7614_v56 = vsel %vm6888_vm2, %v7091_v37, 0  ;;  %v7617_v28 = vsel %vm6888_vm2, %v7092_v49, 0  ;;  %v7032_v25 = vrot.slane %v7031_v29, 2  ;;  %v5264_v23 = vadd.f32 %v16083_v3, %v5181_v41 }
 0x34e   : > { %v18986_v44 = vand.u32 4294901760, %v7614_v56  ;;  %v6989_v8 = vmul.f32 1.442695, %v6967_v13  ;;  %v6991_v42 = vmul.f32 1.442695, %v6968_v32  ;;  %v18992_v39 = vand.u32 4294901760, %v7617_v28  ;;  %v5257_v60 = vpop.f32.mrf.mxu0 }
 0x34f   : > { %v7033_v50 = vadd.f32 %v7032_v25, %v7031_v29  ;;  %v19005_v33 = vadd.f32 %v16090_v51, %v5264_v23  ;;  %v5258_v40 = vadd.f32 %v5257_v60, %v5173_v4  ;;  %v19012_v48 = vrot.slane %v1464_v53, %v17715_v22 }
 0x350   : > { %16270 = vmatprep.mubr.f32.mxu1 %v18986_v44  ;;  %v7687_v24 = vsub.f32 %v7614_v56, %v18986_v44  ;;  %16899 = vpow2.f32 %v6989_v8  ;;  %v18999_v26 = vsub.f32 %v7617_v28, %v18992_v39  ;;  %v8246_v12 = vsub.f32 %v18969_v54, %v18990_v30 }
 0x351   : > { %16271 = vmatmul.mubr.f32.vlgmr.msra.gmra.mxu1 %v18992_v39  ;;  %16901 = vpow2.f32 %v6991_v42  ;;  %v7034_v52 = vrot.slane %v7033_v50, 1  ;;  %v1455_v43 = vrot.slane %v1447_v2, %v17715_v22  ;;  %v19022_v31 = vadd.f32 %v5336_v46, %v5258_v40  ;;  %v16104_v25 = vpop.f32.mrf.mxu1 }
 0x352   : > { %16281 = vmatpush3.msra.mxu1 %v18831_v18  ;;  %v7688_v9 = vand.u32 4294901760, %v7687_v24  ;;  %v7698_v34 = vand.u32 4294901760, %v18999_v26  ;;  %v1462_v7 = vrot.slane %v1448_v11, %v17715_v22  ;;  %v6926_v49 = vsel %vm6888_vm2, %v19005_v33, -inf }
 0x353   : > { %16282 = vmatprep.subr.mxu1 %v18838_v63  ;;  %v7035_v37 = vadd.f32 %v7034_v52, %v7033_v50  ;;  %v6925_v6 = vsel %vm6888_vm2, %v19022_v31, -inf  ;;  %v8253_v2 = vsub.f32 %v18981_v58, %v19003_v57  ;;  %v8247_v29 = vand.u32 4294901760, %v8246_v12  ;;  %v5522_v4 = vpop.f32.mrf.mxu1 }
 0x354   : > { %16283 = vmatpush3.msra.mxu1 %v18838_v63  ;;  %16284 = vmatprep.mubr.f32.mxu1 %v7688_v9  ;;  %v7689_v36 = vsub.f32 %v7687_v24, %v7688_v9  ;;  %v7699_v53 = vsub.f32 %v18999_v26, %v7698_v34  ;;  %v6927_v38 = vmax.f32 %v6925_v6, %v6926_v49  ;;  %v16097_v28 = vpop.f32.mrf.mxu0  ;;  %v19083_v12 = vand.u32 4294901760, %v18492_v27 }
 0x355   : > { %16294 = vmatprep.subr.mxu1 %v18831_v18  ;;  %16285 = vmatmul.mubr.f32.vlgmr.msra.gmra.mxu1 %v7698_v34  ;;  %16903 = vrcp.f32 %v7035_v37  ;;  %v1511_v32 = vcombine.low %v1455_v43, %v18965_v14  ;;  %v1512_v51 = vcombine.high %v1455_v43, %v18965_v14  ;;  %v1950_v56 = vrot.slane %v1936_v59, %v17718_v17 }
 0x356   : > { %16295 = vmatpush3.msra.mxu1 %v18831_v18  ;;  %16298 = vmatprep.mubr.f32.mxu1 %v18986_v44  ;;  %v7690_v61 = vand.u32 4294901760, %v7689_v36  ;;  %v7700_v13 = vand.u32 4294901760, %v7699_v53  ;;  %v1943_v18 = vrot.slane %v1935_v35, %v17718_v17  ;;  %v6928_v41 = vrot.slane %v6927_v38, 4  ;;  %v5431_v11 = vpop.f32.mrf.mxu0 }
 0x357   : > { %16296 = vmatprep.subr.mxu1 %v18838_v63  ;;  %v15338_v14 = vcombine.low %v18974_v45, %v18977_v15  ;;  %v1527_v35 = vcombine.low %v1462_v7, %v19012_v48  ;;  %v1528_v8 = vcombine.high %v1462_v7, %v19012_v48  ;;  %v1519_v16 = vrot.slane %v1511_v32, %v17718_v17 }
 0x358   : > { %16297 = vmatpush3.msra.mxu1 %v18838_v63  ;;  %16263 = vmatprep.mubr.f32.mxu0 %v7690_v61  ;;  %v8254_v63 = vand.u32 4294901760, %v8253_v2  ;;  %v6929_v42 = vmax.f32 %v6927_v38, %v6928_v41  ;;  %v1526_v0 = vrot.slane %v1512_v51, %v17718_v17  ;;  %v15342_v59 = vcombine.low %v1943_v18, %v1950_v56 }
 0x359   : > { %16308 = vmatprep.subr.mxu1 %v8247_v29  ;;  %16264 = vmatmul.mubr.f32.vlgmr.msra.gmra.mxu0 %v7700_v13  ;;  %v19063_v50 = vrot.slane %v15338_v14, %v17715_v22  ;;  %v15344_v60 = vcombine.high %v1943_v18, %v1950_v56  ;;  %v16118_v9 = vpop.f32.mrf.mxu1  ;;  %v5529_v34 = vadd.f32 %v16104_v25, %v16097_v28 }
 0x35a   : > { %16274 = vmatpush3.msra.mxu0 %v18842_v10  ;;  %16299 = vmatmul.mubr.f32.vlgmr.msra.gmra.mxu1 %v18992_v39  ;;  %v15340_v10 = vcombine.high %v18974_v45, %v18977_v15  ;;  %v6930_v3 = vrot.slane %v6929_v42, 2  ;;  %v19070_v45 = vrot.slane %v1527_v35, %v17718_v17  ;;  %v19073_v15 = vrot.slane %v1528_v8, %v17718_v17 }
 0x35b   : > { %16309 = vmatpush3.msra.mxu1 %v8247_v29  ;;  %16275 = vmatprep.subr.mxu0 %v18852_v62  ;;  %v15330_v48 = vcombine.low %v1519_v16, %v1526_v0  ;;  %v19089_v36 = vrot.slane %v15342_v59, %v17715_v22  ;;  %v15332_v37 = vcombine.high %v1519_v16, %v1526_v0  ;;  %v5686_v29 = vpop.f32.mrf.mxu1 }
 0x35c   : > { %16277 = vmatprep.mubr.f32.mxu0 %v7687_v24  ;;  %16310 = vmatprep.subr.mxu1 %v8254_v63  ;;  %v6931_v46 = vmax.f32 %v6929_v42, %v6930_v3  ;;  %v16111_v40 = vpop.f32.mrf.mxu0  ;;  %v19086_v43 = vrot.slane %v15340_v10, %v17715_v22  ;;  %v5523_v49 = vadd.f32 %v5522_v4, %v5431_v11 }
 0x35d   : > { %16276 = vmatpush3.msra.mxu0 %v18852_v62  ;;  %16311 = vmatpush3.msra.mxu1 %v8254_v63  ;;  %v19060_v23 = vpop.eup %16899  ;;  %v5612_v6 = vadd.f32 %v16111_v40, %v5529_v34  ;;  %v15334_v61 = vcombine.low %v19070_v45, %v19073_v15  ;;  %v19104_v32 = vrot.slane %v15330_v48, %v17715_v22 }
 0x35e   : > { %16287 = vmatprep.subr.mxu0 %v18859_v19  ;;  %16322 = vmatprep.subr.mxu1 %v18947_v55  ;;  %v19067_v24 = vpop.eup %16901  ;;  %v7036_v62 = vsel %vm6888_vm2, %v19060_v23, 0.0  ;;  %v6932_v7 = vrot.slane %v6931_v46, 1  ;;  %v5604_v53 = vpop.f32.mrf.mxu0  ;;  %v19111_v18 = vsub.f32 %v18492_v27, %v19083_v12  ;;  %v19118_v14 = vrot.slane %v15332_v37, %v17715_v22 }
 0x35f   : > { %16278 = vmatmul.mubr.f32.vlgmr.msra.gmra.mxu0 %v18999_v26  ;;  %v7037_v52 = vsel %vm6888_vm2, %v19067_v24, 0.0  ;;  %v5605_v51 = vadd.f32 %v5604_v53, %v5523_v49  ;;  %v5695_v63 = vadd.f32 %v16118_v9, %v5612_v6  ;;  %v2719_v48 = vcombine.low %v19063_v50, %v19086_v43 }
 0x360   : > { %16288 = vmatpush3.msra.mxu0 %v18859_v19  ;;  %16291 = vmatprep.mubr.f32.mxu0 %v18986_v44  ;;  %v7038_v26 = vadd.f32 %v7037_v52, %v7036_v62  ;;  %v19094_v19 = vand.u32 4294901760, %v18496_v20  ;;  %v19097_v44 = vrot.slane %v15344_v60, %v17715_v22  ;;  %v6933_v38 = vmax.f32 %v6931_v46, %v6932_v7 }
 0x361   : > { %16289 = vmatprep.subr.mxu0 %v18872_v47  ;;  %v5687_v16 = vadd.f32 %v5686_v29, %v5605_v51  ;;  %v19134_v4 = vand.u32 4294901760, %v19111_v18  ;;  %v19141_v62 = vrot.slane %v15334_v61, %v17715_v22  ;;  %v2583_v49 = vcombine.low %v19104_v32, %v19118_v14 }
 0x362   : > { %16290 = vmatpush3.msra.mxu0 %v18872_v47  ;;  %v7039_v2 = vrot.slane %v7038_v26, 4  ;;  %v16904_v13 = vpop.eup %16903  ;;  %v15336_v47 = vcombine.high %v19070_v45, %v19073_v15  ;;  %v6969_v41 = vsub.f32 %v19022_v31, %v6933_v38  ;;  %v6970_v28 = vsub.f32 %v19005_v33, %v6933_v38 }
 0x363   : > { %16301 = vmatprep.subr.mxu0 %v18947_v55  ;;  %16292 = vmatmul.mubr.f32.vlgmr.msra.gmra.mxu0 %v18992_v39  ;;  %v16132_v39 = vpop.f32.mrf.mxu1  ;;  %v7093_v25 = vmul.f32 %v16904_v13, %v18940_v5  ;;  %v7094_v35 = vmul.f32 %v16904_v13, %v18949_v1  ;;  %v19124_v27 = vsub.f32 %v18496_v20, %v19094_v19 }
 0x364   : > { %16302 = vmatpush3.msra.mxu0 %v18947_v55  ;;  %v7040_v56 = vadd.f32 %v7039_v2, %v7038_v26  ;;  %v6993_v8 = vmul.f32 1.442695, %v6969_v41  ;;  %v6995_v33 = vmul.f32 1.442695, %v6970_v28  ;;  %v16125_v42 = vpop.f32.mrf.mxu0  ;;  %v19144_v46 = vrot.slane %v15336_v47, %v17715_v22 }
 0x365   : > { %16303 = vmatprep.subr.mxu0 %v18958_v21  ;;  %v8122_v5 = vsel %vm6888_vm2, %v7093_v25, 0  ;;  %v5778_v0 = vadd.f32 %v16125_v42, %v5695_v63  ;;  %v8125_v59 = vsel %vm6888_vm2, %v7094_v35, 0  ;;  %v5850_v11 = vpop.f32.mrf.mxu1  ;;  %v19156_v26 = vand.u32 4294901760, %v19124_v27 }
 0x366   : > { %16304 = vmatpush3.msra.mxu0 %v18958_v21  ;;  %v7041_v31 = vrot.slane %v7040_v56, 2  ;;  %v19128_v10 = vand.u32 4294901760, %v8122_v5  ;;  %16905 = vpow2.f32 %v6993_v8  ;;  %v5771_v1 = vpop.f32.mrf.mxu0  ;;  %v19131_v20 = vand.u32 4294901760, %v8125_v59 }
 0x367   : > { %16315 = vmatprep.subr.mxu0 %v18969_v54  ;;  %16907 = vpow2.f32 %v6995_v33  ;;  %v19136_v60 = vadd.f32 %v16132_v39, %v5778_v0  ;;  %v5772_v45 = vadd.f32 %v5771_v1, %v5687_v16  ;;  %v2751_v22 = vcombine.low %v19089_v36, %v19097_v44 }
 0x368   : > { %v7042_v3 = vadd.f32 %v7041_v31, %v7040_v56  ;;  %16312 = vmatprep.mubr.f32.mxu1 %v19128_v10  ;;  %v8195_v15 = vsub.f32 %v8122_v5, %v19128_v10  ;;  %v19147_v9 = vsub.f32 %v8125_v59, %v19131_v20  ;;  %v8754_v53 = vsub.f32 %v19111_v18, %v19134_v4 }
 0x369   : > { %16313 = vmatmul.mubr.f32.vlgmr.msra.gmra.mxu1 %v19131_v20  ;;  %v19152_v52 = vadd.f32 %v5850_v11, %v5772_v45  ;;  %v6935_v6 = vsel %vm6888_vm2, %v19136_v60, -inf  ;;  %v2615_v38 = vcombine.low %v19141_v62, %v19144_v46  ;;  %v8761_v51 = vsub.f32 %v19124_v27, %v19156_v26  ;;  %v16146_v28 = vpop.f32.mrf.mxu1 }
 0x36a   : > { %v7043_v40 = vrot.slane %v7042_v3, 1  ;;  %16323 = vmatpush3.msra.mxu1 %v18947_v55  ;;  %v8196_v34 = vand.u32 4294901760, %v8195_v15  ;;  %v8206_v7 = vand.u32 4294901760, %v19147_v9  ;;  %v8755_v39 = vand.u32 4294901760, %v8754_v53 }
 0x36b   : > { %16324 = vmatprep.subr.mxu1 %v18958_v21  ;;  %v6934_v61 = vsel %vm6888_vm2, %v19152_v52, -inf  ;;  %v19181_v63 = vrot.slane %v2719_v48, %v17718_v17  ;;  %v19184_v35 = vrot.slane %v2751_v22, %v17718_v17  ;;  %v19191_v31 = vrot.slane %v2615_v38, %v17718_v17  ;;  %v6036_v16 = vpop.f32.mrf.mxu1 }
 0x36c   : > { %v7044_v37 = vadd.f32 %v7043_v40, %v7042_v3  ;;  %16325 = vmatpush3.msra.mxu1 %v18958_v21  ;;  %16326 = vmatprep.mubr.f32.mxu1 %v8196_v34  ;;  %v8197_v2 = vsub.f32 %v8195_v15, %v8196_v34  ;;  %v6936_v29 = vmax.f32 %v6934_v61, %v6935_v6  ;;  %v16139_v41 = vpop.f32.mrf.mxu0  ;;  %v8762_v33 = vand.u32 4294901760, %v8761_v51 }
 0x36d   : > { %16336 = vmatprep.subr.mxu1 %v18947_v55  ;;  %16327 = vmatmul.mubr.f32.vlgmr.msra.gmra.mxu1 %v8206_v7  ;;  %v8207_v13 = vsub.f32 %v19147_v9, %v8206_v7  ;;  %v2771_v0 = vcombine.low %v19181_v63, %v19184_v35  ;;  %v6043_v40 = vadd.f32 %v16146_v28, %v16139_v41 }
 0x36e   : > { %16909 = vrcp.f32 %v7044_v37  ;;  %16337 = vmatpush3.msra.mxu1 %v18947_v55  ;;  %16340 = vmatprep.mubr.f32.mxu1 %v19128_v10  ;;  %v8198_v47 = vand.u32 4294901760, %v8197_v2  ;;  %v6937_v56 = vrot.slane %v6936_v29, 4  ;;  %v19188_v55 = vrot.slane %v2583_v49, %v17718_v17  ;;  %v5945_v5 = vpop.f32.mrf.mxu0 }
 0x36f   : > { %16338 = vmatprep.subr.mxu1 %v18958_v21  ;;  %v8208_v25 = vand.u32 4294901760, %v8207_v13  ;;  %v19214_v53 = vand.u32 4294901760, %v2771_v0 }
 0x370   : > { %16339 = vmatpush3.msra.mxu1 %v18958_v21  ;;  %16305 = vmatprep.mubr.f32.mxu0 %v8198_v47  ;;  %v6938_v8 = vmax.f32 %v6936_v29, %v6937_v56  ;;  %v2635_v45 = vcombine.low %v19188_v55, %v19191_v31 }
 0x371   : > { %16350 = vmatprep.subr.mxu1 %v8755_v39  ;;  %16306 = vmatmul.mubr.f32.vlgmr.msra.gmra.mxu0 %v8208_v25  ;;  %v16160_v11 = vpop.f32.mrf.mxu1 }
 0x372   : > { %16316 = vmatpush3.msra.mxu0 %v18969_v54  ;;  %16341 = vmatmul.mubr.f32.vlgmr.msra.gmra.mxu1 %v19131_v20  ;;  %v6939_v42 = vrot.slane %v6938_v8, 2  ;;  %v19217_v61 = vand.u32 4294901760, %v2635_v45 }
 0x373   : > { %16351 = vmatpush3.msra.mxu1 %v8755_v39  ;;  %16317 = vmatprep.subr.mxu0 %v18981_v58  ;;  %v19196_v21 = vpop.eup %16905  ;;  %v6200_v6 = vpop.f32.mrf.mxu1 }
 0x374   : > { %16319 = vmatprep.mubr.f32.mxu0 %v8195_v15  ;;  %16352 = vmatprep.subr.mxu1 %v8762_v33  ;;  %v19200_v59 = vpop.eup %16907  ;;  %v7045_v54 = vsel %vm6888_vm2, %v19196_v21, 0.0  ;;  %v6940_v3 = vmax.f32 %v6938_v8, %v6939_v42  ;;  %v16153_v1 = vpop.f32.mrf.mxu0  ;;  %v19232_v28 = vsub.f32 %v2635_v45, %v19217_v61 }
 0x375   : > { %16318 = vmatpush3.msra.mxu0 %v18981_v58  ;;  %16353 = vmatpush3.msra.mxu1 %v8762_v33  ;;  %v7046_v15 = vsel %vm6888_vm2, %v19200_v59, 0.0  ;;  %v6037_v58 = vadd.f32 %v6036_v16, %v5945_v5  ;;  %v6126_v7 = vadd.f32 %v16153_v1, %v6043_v40 }
 0x376   : > { %16329 = vmatprep.subr.mxu0 %v18990_v30  ;;  %16364 = vmatprep.subr.mxu1 %v19083_v12  ;;  %v7047_v48 = vadd.f32 %v7046_v15, %v7045_v54  ;;  %v6941_v34 = vrot.slane %v6940_v3, 1  ;;  %v6118_v22 = vpop.f32.mrf.mxu0 }
 0x377   : > { %16320 = vmatmul.mubr.f32.vlgmr.msra.gmra.mxu0 %v19147_v9  ;;  %v6119_v9 = vadd.f32 %v6118_v22, %v6037_v58  ;;  %v6209_v13 = vadd.f32 %v16160_v11, %v6126_v7 }
 0x378   : > { %16330 = vmatpush3.msra.mxu0 %v18990_v30  ;;  %16333 = vmatprep.mubr.f32.mxu0 %v19128_v10  ;;  %v7048_v37 = vrot.slane %v7047_v48, 4  ;;  %v6942_v49 = vmax.f32 %v6940_v3, %v6941_v34 }
 0x379   : > { %16331 = vmatprep.subr.mxu0 %v19003_v57  ;;  %v16174_v10 = vpop.f32.mrf.mxu1 }
 0x37a   : > { %16332 = vmatpush3.msra.mxu0 %v19003_v57  ;;  %v7049_v38 = vadd.f32 %v7048_v37, %v7047_v48  ;;  %v6971_v29 = vsub.f32 %v19152_v52, %v6942_v49  ;;  %v6972_v30 = vsub.f32 %v19136_v60, %v6942_v49  ;;  %v19228_v57 = vsub.f32 %v2771_v0, %v19214_v53 }
 0x37b   : > { %v16910_v2 = vpop.eup %16909  ;;  %16343 = vmatprep.subr.mxu0 %v19083_v12  ;;  %16334 = vmatmul.mubr.f32.vlgmr.msra.gmra.mxu0 %v19131_v20  ;;  %v6201_v20 = vadd.f32 %v6200_v6, %v6119_v9  ;;  %v6364_v42 = vpop.f32.mrf.mxu1  ;;  %v19258_v48 = vand.u32 4294901760, %v19232_v28 }
 0x37c   : > { %16344 = vmatpush3.msra.mxu0 %v19083_v12  ;;  %v7095_v47 = vmul.f32 %v16910_v2, %v19060_v23  ;;  %v7096_v51 = vmul.f32 %v16910_v2, %v19067_v24  ;;  %v7050_v56 = vrot.slane %v7049_v38, 2  ;;  %v6997_v41 = vmul.f32 1.442695, %v6971_v29  ;;  %v16167_v60 = vpop.f32.mrf.mxu0 }
 0x37d   : > { %v6999_v52 = vmul.f32 1.442695, %v6972_v30  ;;  %16345 = vmatprep.subr.mxu0 %v19094_v19  ;;  %v6292_v39 = vadd.f32 %v16167_v60, %v6209_v13  ;;  %v19245_v54 = vand.u32 4294901760, %v19228_v57 }
 0x37e   : > { %16346 = vmatpush3.msra.mxu0 %v19094_v19  ;;  %v8630_v23 = vsel %vm6888_vm2, %v7095_v47, 0  ;;  %v8633_v24 = vsel %vm6888_vm2, %v7096_v51, 0  ;;  %v7051_v25 = vadd.f32 %v7050_v56, %v7049_v38  ;;  %16911 = vpow2.f32 %v6997_v41  ;;  %v6285_v8 = vpop.f32.mrf.mxu0 }
 0x37f   : > { %16357 = vmatprep.subr.mxu0 %v19111_v18  ;;  %v19238_v33 = vand.u32 4294901760, %v8630_v23  ;;  %v19240_v5 = vand.u32 4294901760, %v8633_v24  ;;  %16913 = vpow2.f32 %v6999_v52  ;;  %v19242_v16 = vadd.f32 %v16174_v10, %v6292_v39 }
 0x380   : > { %v6286_v0 = vadd.f32 %v6285_v8, %v6201_v20  ;;  %v7052_v3 = vrot.slane %v7051_v25, 1  ;;  %v9262_v7 = vsub.f32 %v19228_v57, %v19245_v54  ;;  %v9269_v10 = vsub.f32 %v19232_v28, %v19258_v48 }
 0x381   : > { %16354 = vmatprep.mubr.f32.mxu1 %v19238_v33  ;;  %v19249_v1 = vsub.f32 %v8633_v24, %v19240_v5  ;;  %v8703_v11 = vsub.f32 %v8630_v23, %v19238_v33  ;;  %v6944_v22 = vsel %vm6888_vm2, %v19242_v16, -inf  ;;  %v16188_v38 = vpop.f32.mrf.mxu1 }
 0x382   : > { %v19252_v45 = vadd.f32 %v6364_v42, %v6286_v0  ;;  %16355 = vmatmul.mubr.f32.vlgmr.msra.gmra.mxu1 %v19240_v5  ;;  %v7053_v34 = vadd.f32 %v7052_v3, %v7051_v25  ;;  %v9263_v13 = vand.u32 4294901760, %v9262_v7  ;;  %v9270_v52 = vand.u32 4294901760, %v9269_v10 }
 0x383   : > { %16365 = vmatpush3.msra.mxu1 %v19083_v12  ;;  %v8704_v15 = vand.u32 4294901760, %v8703_v11  ;;  %v8714_v40 = vand.u32 4294901760, %v19249_v1  ;;  %v6550_v41 = vpop.f32.mrf.mxu1 }
 0x384   : > { %v6943_v58 = vsel %vm6888_vm2, %v19252_v45, -inf  ;;  %16366 = vmatprep.subr.mxu1 %v19094_v19  ;;  %16915 = vrcp.f32 %v7053_v34  ;;  %v16181_v9 = vpop.f32.mrf.mxu0 }
 0x385   : > { %v6945_v37 = vmax.f32 %v6943_v58, %v6944_v22  ;;  %16367 = vmatpush3.msra.mxu1 %v19094_v19  ;;  %16368 = vmatprep.mubr.f32.mxu1 %v8704_v15  ;;  %v8705_v49 = vsub.f32 %v8703_v11, %v8704_v15  ;;  %v8715_v6 = vsub.f32 %v19249_v1, %v8714_v40 }
 0x386   : > { %16378 = vmatprep.subr.mxu1 %v19083_v12  ;;  %16369 = vmatmul.mubr.f32.vlgmr.msra.gmra.mxu1 %v8714_v40  ;;  %v6459_v56 = vpop.f32.mrf.mxu0  ;;  %v6557_v24 = vadd.f32 %v16188_v38, %v16181_v9 }
 0x387   : > { %v6946_v2 = vrot.slane %v6945_v37, 4  ;;  %16379 = vmatpush3.msra.mxu1 %v19083_v12  ;;  %16382 = vmatprep.mubr.f32.mxu1 %v19238_v33  ;;  %v8706_v29 = vand.u32 4294901760, %v8705_v49  ;;  %v8716_v30 = vand.u32 4294901760, %v8715_v6  ;;  %v2772_v12 = vcombine.high %v19181_v63, %v19184_v35 }
 0x388   : > { %16380 = vmatprep.subr.mxu1 %v19094_v19  ;;  %v6551_v42 = vadd.f32 %v6550_v41, %v6459_v56 }
 0x389   : > { %v6947_v47 = vmax.f32 %v6945_v37, %v6946_v2  ;;  %16381 = vmatpush3.msra.mxu1 %v19094_v19  ;;  %16347 = vmatprep.mubr.f32.mxu0 %v8706_v29  ;;  %v2636_v19 = vcombine.high %v19188_v55, %v19191_v31  ;;  %v16202_v39 = vpop.f32.mrf.mxu1  ;;  %v19292_v25 = vand.u32 4294901760, %v2772_v12 }
 0x38a   : > { %16392 = vmatprep.subr.mxu1 %v9263_v13  ;;  %16348 = vmatmul.mubr.f32.vlgmr.msra.gmra.mxu0 %v8716_v30 }
 0x38b   : > { %v6948_v51 = vrot.slane %v6947_v47, 2  ;;  %16358 = vmatpush3.msra.mxu0 %v19111_v18  ;;  %16383 = vmatmul.mubr.f32.vlgmr.msra.gmra.mxu1 %v19240_v5  ;;  %v19280_v60 = vpop.eup %16911  ;;  %v19297_v3 = vand.u32 4294901760, %v2636_v19  ;;  %v19303_v22 = vsub.f32 %v2772_v12, %v19292_v25 }
 0x38c   : > { %16393 = vmatpush3.msra.mxu1 %v9263_v13  ;;  %16359 = vmatprep.subr.mxu0 %v19124_v27  ;;  %v19285_v20 = vpop.eup %16913  ;;  %v7054_v63 = vsel %vm6888_vm2, %v19280_v60, 0.0  ;;  %v16195_v18 = vpop.f32.mrf.mxu0 }
 0x38d   : > { %v6949_v35 = vmax.f32 %v6947_v47, %v6948_v51  ;;  %16361 = vmatprep.mubr.f32.mxu0 %v8703_v11  ;;  %16394 = vmatprep.subr.mxu1 %v9270_v52  ;;  %v7055_v23 = vsel %vm6888_vm2, %v19285_v20, 0.0  ;;  %v6640_v0 = vadd.f32 %v16195_v18, %v6557_v24  ;;  %v19313_v6 = vsub.f32 %v2636_v19, %v19297_v3 }
 0x38e   : > { %16360 = vmatpush3.msra.mxu0 %v19124_v27  ;;  %16395 = vmatpush3.msra.mxu1 %v9270_v52  ;;  %v7056_v55 = vadd.f32 %v7055_v23, %v7054_v63  ;;  %v6632_v8 = vpop.f32.mrf.mxu0  ;;  %v6714_v27 = vpop.f32.mrf.mxu1  ;;  %v19325_v47 = vand.u32 4294901760, %v19303_v22  ;;  %v2720_v18 = vcombine.high %v19063_v50, %v19086_v43 }
 0x38f   : > { %v6950_v31 = vrot.slane %v6949_v35, 1  ;;  %16371 = vmatprep.subr.mxu0 %v19134_v4  ;;  %16406 = vmatprep.subr.mxu1 %v19214_v53  ;;  %v6633_v34 = vadd.f32 %v6632_v8, %v6551_v42  ;;  %v6723_v49 = vadd.f32 %v16202_v39, %v6640_v0  ;;  %v2584_v0 = vcombine.high %v19104_v32, %v19118_v14 }
 0x390   : > { %16362 = vmatmul.mubr.f32.vlgmr.msra.gmra.mxu0 %v19249_v1  ;;  %v7057_v11 = vrot.slane %v7056_v55, 4  ;;  %v9770_v24 = vsub.f32 %v19303_v22, %v19325_v47 }
 0x391   : > { %v6951_v15 = vmax.f32 %v6949_v35, %v6950_v31  ;;  %16372 = vmatpush3.msra.mxu0 %v19134_v4  ;;  %16375 = vmatprep.mubr.f32.mxu0 %v19238_v33  ;;  %v16916_v40 = vpop.eup %16915  ;;  %v16216_v37 = vpop.f32.mrf.mxu1  ;;  %v6715_v38 = vadd.f32 %v6714_v27, %v6633_v34  ;;  %v19338_v35 = vand.u32 4294901760, %v19313_v6  ;;  %v19363_v34 = vrot.slane %v2720_v18, %v17718_v17 }
 0x392   : > { %16373 = vmatprep.subr.mxu0 %v19156_v26  ;;  %v7058_v58 = vadd.f32 %v7057_v11, %v7056_v55  ;;  %v7097_v4 = vmul.f32 %v16916_v40, %v19196_v21  ;;  %v7098_v33 = vmul.f32 %v16916_v40, %v19200_v59  ;;  %v2752_v55 = vcombine.high %v19089_v36, %v19097_v44 }
 0x393   : > { %v6973_v1 = vsub.f32 %v19252_v45, %v6951_v15  ;;  %v6974_v7 = vsub.f32 %v19242_v16, %v6951_v15  ;;  %16374 = vmatpush3.msra.mxu0 %v19156_v26  ;;  %v6878_v10 = vpop.f32.mrf.mxu1  ;;  %v2616_v36 = vcombine.high %v19141_v62, %v19144_v46  ;;  %v9777_v11 = vsub.f32 %v19313_v6, %v19338_v35 }
 0x394   : > { %16385 = vmatprep.subr.mxu0 %v19214_v53  ;;  %16376 = vmatmul.mubr.f32.vlgmr.msra.gmra.mxu0 %v19240_v5  ;;  %v7059_v2 = vrot.slane %v7058_v58, 2  ;;  %v16209_v16 = vpop.f32.mrf.mxu0  ;;  %v9138_v26 = vsel %vm6888_vm2, %v7097_v4, 0  ;;  %v9141_v5 = vsel %vm6888_vm2, %v7098_v33, 0  ;;  %v9771_v27 = vand.u32 4294901760, %v9770_v24 }
 0x395   : > { %v7001_v9 = vmul.f32 1.442695, %v6973_v1  ;;  %v7003_v45 = vmul.f32 1.442695, %v6974_v7  ;;  %16386 = vmatpush3.msra.mxu0 %v19214_v53  ;;  %v6806_v21 = vadd.f32 %v16209_v16, %v6723_v49  ;;  %v19318_v29 = vand.u32 4294901760, %v9138_v26 }
 0x396   : > { %16387 = vmatprep.subr.mxu0 %v19217_v61  ;;  %v7060_v59 = vadd.f32 %v7059_v2, %v7058_v58  ;;  %v6799_v30 = vpop.f32.mrf.mxu0  ;;  %v19322_v13 = vand.u32 4294901760, %v9141_v5  ;;  %v19366_v32 = vrot.slane %v2752_v55, %v17718_v17  ;;  %v19370_v62 = vrot.slane %v2584_v0, %v17718_v17 }
 0x397   : > { %16917 = vpow2.f32 %v7001_v9  ;;  %16388 = vmatpush3.msra.mxu0 %v19217_v61  ;;  %v19328_v12 = vadd.f32 %v16216_v37, %v6806_v21  ;;  %v6800_v51 = vadd.f32 %v6799_v30, %v6715_v38  ;;  %16396 = vmatprep.mubr.f32.mxu1 %v19318_v29  ;;  %v9211_v56 = vsub.f32 %v9138_v26, %v19318_v29 }
 0x398   : > { %16919 = vpow2.f32 %v7003_v45  ;;  %16399 = vmatprep.subr.mxu0 %v19228_v57  ;;  %v7061_v41 = vrot.slane %v7060_v59, 1  ;;  %v9221_v52 = vsub.f32 %v9141_v5, %v19322_v13  ;;  %16397 = vmatmul.mubr.f32.vlgmr.msra.gmra.mxu1 %v19322_v13  ;;  %v19373_v46 = vrot.slane %v2616_v36, %v17718_v17 }
 0x399   : > { %v19334_v19 = vadd.f32 %v6878_v10, %v6800_v51  ;;  %16407 = vmatpush3.msra.mxu1 %v19214_v53  ;;  %v9212_v63 = vand.u32 4294901760, %v9211_v56  ;;  %v6953_v31 = vsel %vm6888_vm2, %v19328_v12, -inf  ;;  %v2773_v1 = vcombine.low %v19363_v34, %v19366_v32 }
 0x39a   : > { %v7062_v39 = vadd.f32 %v7061_v41, %v7060_v59  ;;  %16408 = vmatprep.subr.mxu1 %v19217_v61  ;;  %v9222_v23 = vand.u32 4294901760, %v9221_v52  ;;  %v2637_v4 = vcombine.low %v19370_v62, %v19373_v46 }
 0x39b   : > { %v6952_v8 = vsel %vm6888_vm2, %v19334_v19, -inf  ;;  %16409 = vmatpush3.msra.mxu1 %v19217_v61  ;;  %16410 = vmatprep.mubr.f32.mxu1 %v9212_v63  ;;  %v9213_v50 = vsub.f32 %v9211_v56, %v9212_v63  ;;  %v19395_v2 = vand.u32 4294901760, %v2773_v1 }
 0x39c   : > { %v6954_v43 = vmax.f32 %v6952_v8, %v6953_v31  ;;  %16420 = vmatprep.subr.mxu1 %v19214_v53  ;;  %16411 = vmatmul.mubr.f32.vlgmr.msra.gmra.mxu1 %v9222_v23  ;;  %v9223_v42 = vsub.f32 %v9221_v52, %v9222_v23  ;;  %16921 = vrcp.f32 %v7062_v39  ;;  %v19399_v16 = vand.u32 4294901760, %v2637_v4 }
 0x39d   : > { %16421 = vmatpush3.msra.mxu1 %v19214_v53  ;;  %16424 = vmatprep.mubr.f32.mxu1 %v19318_v29  ;;  %v9214_v44 = vand.u32 4294901760, %v9213_v50  ;;  %v9778_v53 = vand.u32 4294901760, %v9777_v11  ;;  %v19409_v5 = vsub.f32 %v2773_v1, %v19395_v2  ;;  %v2638_v11 = vcombine.high %v19370_v62, %v19373_v46 }
 0x39e   : > { %v6955_v15 = vrot.slane %v6954_v43, 4  ;;  %16422 = vmatprep.subr.mxu1 %v19217_v61  ;;  %v9224_v40 = vand.u32 4294901760, %v9223_v42 }
 0x39f   : > { %16423 = vmatpush3.msra.mxu1 %v19217_v61  ;;  %16389 = vmatprep.mubr.f32.mxu0 %v9214_v44 }
 0x3a0   : > { %v6956_v14 = vmax.f32 %v6954_v43, %v6955_v15  ;;  %16434 = vmatprep.subr.mxu1 %v9771_v27  ;;  %16390 = vmatmul.mubr.f32.vlgmr.msra.gmra.mxu0 %v9224_v40 }
 0x3a1   : > { %16400 = vmatpush3.msra.mxu0 %v19228_v57  ;;  %16425 = vmatmul.mubr.f32.vlgmr.msra.gmra.mxu1 %v19322_v13 }
 0x3a2   : > { %v6957_v58 = vrot.slane %v6956_v14, 2  ;;  %16435 = vmatpush3.msra.mxu1 %v9771_v27  ;;  %16401 = vmatprep.subr.mxu0 %v19232_v28 }
 0x3a3   : > { %16403 = vmatprep.mubr.f32.mxu0 %v9211_v56  ;;  %16436 = vmatprep.subr.mxu1 %v9778_v53  ;;  %v19422_v56 = vand.u32 4294901760, %v19409_v5 }
 0x3a4   : > { %v19378_v61 = vpop.eup %16917  ;;  %v6958_v57 = vmax.f32 %v6956_v14, %v6957_v58  ;;  %16402 = vmatpush3.msra.mxu0 %v19232_v28  ;;  %16437 = vmatpush3.msra.mxu1 %v9778_v53 }
 0x3a5   : > { %v19382_v7 = vpop.eup %16919  ;;  %v7063_v17 = vsel %vm6888_vm2, %v19378_v61, 0.0  ;;  %16413 = vmatprep.subr.mxu0 %v19245_v54  ;;  %16448 = vmatprep.subr.mxu1 %v19292_v25  ;;  %v10278_v24 = vsub.f32 %v19409_v5, %v19422_v56 }
 0x3a6   : > { %v7064_v37 = vsel %vm6888_vm2, %v19382_v7, 0.0  ;;  %v6959_v33 = vrot.slane %v6958_v57, 1  ;;  %16404 = vmatmul.mubr.f32.vlgmr.msra.gmra.mxu0 %v9221_v52 }
 0x3a7   : > { %v7065_v49 = vadd.f32 %v7064_v37, %v7063_v17  ;;  %16414 = vmatpush3.msra.mxu0 %v19245_v54  ;;  %16417 = vmatprep.mubr.f32.mxu0 %v19318_v29  ;;  %v10279_v42 = vand.u32 4294901760, %v10278_v24 }
 0x3a8   : > { %v6960_v9 = vmax.f32 %v6958_v57, %v6959_v33  ;;  %16415 = vmatprep.subr.mxu0 %v19258_v48 }
 0x3a9   : > { %v7066_v28 = vrot.slane %v7065_v49, 4  ;;  %v16922_v45 = vpop.eup %16921  ;;  %16416 = vmatpush3.msra.mxu0 %v19258_v48 }
 0x3aa   : > { %v6975_v38 = vsub.f32 %v19334_v19, %v6960_v9  ;;  %v6976_v21 = vsub.f32 %v19328_v12, %v6960_v9  ;;  %16427 = vmatprep.subr.mxu0 %v19292_v25  ;;  %16418 = vmatmul.mubr.f32.vlgmr.msra.gmra.mxu0 %v19322_v13  ;;  %v7099_v54 = vmul.f32 %v16922_v45, %v19280_v60 }
 0x3ab   : > { %v7067_v26 = vadd.f32 %v7066_v28, %v7065_v49  ;;  %16428 = vmatpush3.msra.mxu0 %v19292_v25  ;;  %v7100_v29 = vmul.f32 %v16922_v45, %v19285_v20  ;;  %v19416_v12 = vsub.f32 %v2637_v4, %v19399_v16 }
 0x3ac   : > { %v7005_v59 = vmul.f32 1.442695, %v6975_v38  ;;  %v7007_v30 = vmul.f32 1.442695, %v6976_v21  ;;  %16429 = vmatprep.subr.mxu0 %v19297_v3  ;;  %v9646_v10 = vsel %vm6888_vm2, %v7099_v54, 0 }
 0x3ad   : > { %v7068_v48 = vrot.slane %v7067_v26, 2  ;;  %16430 = vmatpush3.msra.mxu0 %v19297_v3  ;;  %v9649_v13 = vsel %vm6888_vm2, %v7100_v29, 0  ;;  %v9718_v20 = vand.u32 4294901760, %v9646_v10  ;;  %v19428_v23 = vand.u32 4294901760, %v19416_v12 }
 0x3ae   : > { %16923 = vpow2.f32 %v7005_v59  ;;  %16441 = vmatprep.subr.mxu0 %v19303_v22  ;;  %v19419_v51 = vand.u32 4294901760, %v9649_v13 }
 0x3af   : > { %v7069_v60 = vadd.f32 %v7068_v48, %v7067_v26  ;;  %16925 = vpow2.f32 %v7007_v30  ;;  %16438 = vmatprep.mubr.f32.mxu1 %v9718_v20  ;;  %v9719_v19 = vsub.f32 %v9646_v10, %v9718_v20  ;;  %v10285_v43 = vsub.f32 %v19416_v12, %v19428_v23 }
 0x3b0   : > { %v9729_v52 = vsub.f32 %v9649_v13, %v19419_v51  ;;  %16439 = vmatmul.mubr.f32.vlgmr.msra.gmra.mxu1 %v19419_v51 }
 0x3b1   : > { %v7070_v41 = vrot.slane %v7069_v60, 1  ;;  %16449 = vmatpush3.msra.mxu1 %v19292_v25  ;;  %v9720_v18 = vand.u32 4294901760, %v9719_v19  ;;  %v10286_v0 = vand.u32 4294901760, %v10285_v43 }
 0x3b2   : > { %v9730_v39 = vand.u32 4294901760, %v9729_v52  ;;  %16450 = vmatprep.subr.mxu1 %v19297_v3 }
 0x3b3   : > { %v7071_v63 = vadd.f32 %v7070_v41, %v7069_v60  ;;  %16451 = vmatpush3.msra.mxu1 %v19297_v3  ;;  %16452 = vmatprep.mubr.f32.mxu1 %v9720_v18  ;;  %v9721_v55 = vsub.f32 %v9719_v19, %v9720_v18 }
 0x3b4   : > { %v9731_v31 = vsub.f32 %v9729_v52, %v9730_v39  ;;  %16462 = vmatprep.subr.mxu1 %v19292_v25  ;;  %16453 = vmatmul.mubr.f32.vlgmr.msra.gmra.mxu1 %v9730_v39 }
 0x3b5   : > { %16927 = vrcp.f32 %v7071_v63  ;;  %16463 = vmatpush3.msra.mxu1 %v19292_v25  ;;  %16466 = vmatprep.mubr.f32.mxu1 %v9718_v20  ;;  %v9722_v8 = vand.u32 4294901760, %v9721_v55  ;;  %v2774_v25 = vcombine.high %v19363_v34, %v19366_v32 }
 0x3b6   : > { %v9732_v50 = vand.u32 4294901760, %v9731_v31  ;;  %16464 = vmatprep.subr.mxu1 %v19297_v3 }
 0x3b7   : > { %16465 = vmatpush3.msra.mxu1 %v19297_v3  ;;  %16431 = vmatprep.mubr.f32.mxu0 %v9722_v8  ;;  %v19458_v27 = vand.u32 4294901760, %v2774_v25 }
 0x3b8   : > { %16476 = vmatprep.subr.mxu1 %v10279_v42  ;;  %16432 = vmatmul.mubr.f32.vlgmr.msra.gmra.mxu0 %v9732_v50 }
 0x3b9   : > { %16442 = vmatpush3.msra.mxu0 %v19303_v22  ;;  %16467 = vmatmul.mubr.f32.vlgmr.msra.gmra.mxu1 %v19419_v51  ;;  %v19468_v46 = vsub.f32 %v2774_v25, %v19458_v27  ;;  %v11170_v25 = vld [vmem:[#allocation7 + $0x8] sm:$0xff] }
 0x3ba   : > { %16477 = vmatpush3.msra.mxu1 %v10279_v42  ;;  %16443 = vmatprep.subr.mxu0 %v19313_v6 }
 0x3bb   : > { %v19444_v36 = vpop.eup %16923  ;;  %16445 = vmatprep.mubr.f32.mxu0 %v9719_v19  ;;  %16478 = vmatprep.subr.mxu1 %v10286_v0  ;;  %v19481_v17 = vand.u32 4294901760, %v19468_v46 }
 0x3bc   : > { %v19447_v44 = vpop.eup %16925  ;;  %v7072_v3 = vsel %vm6888_vm2, %v19444_v36, 0.0  ;;  %16444 = vmatpush3.msra.mxu0 %v19313_v6  ;;  %16479 = vmatpush3.msra.mxu1 %v10286_v0  ;;  %v19462_v6 = vand.u32 4294901760, %v2638_v11 }
 0x3bd   : > { %v7073_v22 = vsel %vm6888_vm2, %v19447_v44, 0.0  ;;  %16455 = vmatprep.subr.mxu0 %v19325_v47  ;;  %16490 = vmatprep.subr.mxu1 %v19395_v2  ;;  %v10786_v45 = vsub.f32 %v19468_v46, %v19481_v17 }
 0x3be   : > { %v7074_v15 = vadd.f32 %v7073_v22, %v7072_v3  ;;  %16446 = vmatmul.mubr.f32.vlgmr.msra.gmra.mxu0 %v9729_v52  ;;  %v19477_v1 = vsub.f32 %v2638_v11, %v19462_v6 }
 0x3bf   : > { %16456 = vmatpush3.msra.mxu0 %v19325_v47  ;;  %16459 = vmatprep.mubr.f32.mxu0 %v9718_v20  ;;  %v10787_v48 = vand.u32 4294901760, %v10786_v45 }
 0x3c0   : > { %v7075_v40 = vrot.slane %v7074_v15, 4  ;;  %16457 = vmatprep.subr.mxu0 %v19338_v35  ;;  %v19486_v28 = vand.u32 4294901760, %v19477_v1 }
 0x3c1   : > { %16458 = vmatpush3.msra.mxu0 %v19338_v35 }
 0x3c2   : > { %v16928_v34 = vpop.eup %16927  ;;  %v7076_v32 = vadd.f32 %v7075_v40, %v7074_v15  ;;  %16469 = vmatprep.subr.mxu0 %v19395_v2  ;;  %16460 = vmatmul.mubr.f32.vlgmr.msra.gmra.mxu0 %v19419_v51  ;;  %v10793_v29 = vsub.f32 %v19477_v1, %v19486_v28  ;;  %v19543_v15 = vand.u32 4294901760, %v11170_v25 }
 0x3c3   : > { %v7101_v14 = vmul.f32 %v16928_v34, %v19378_v61  ;;  %v7102_v62 = vmul.f32 %v16928_v34, %v19382_v7  ;;  %16470 = vmatpush3.msra.mxu0 %v19395_v2 }
 0x3c4   : > { %v7077_v47 = vrot.slane %v7076_v32, 2  ;;  %16471 = vmatprep.subr.mxu0 %v19399_v16  ;;  %v10794_v59 = vand.u32 4294901760, %v10793_v29 }
 0x3c5   : > { %v10154_v53 = vsel %vm6888_vm2, %v7101_v14, 0  ;;  %v10157_v58 = vsel %vm6888_vm2, %v7102_v62, 0  ;;  %16472 = vmatpush3.msra.mxu0 %v19399_v16 }
 0x3c6   : > { %v10226_v35 = vand.u32 4294901760, %v10154_v53  ;;  %v10236_v61 = vand.u32 4294901760, %v10157_v58  ;;  %v7078_v7 = vadd.f32 %v7077_v47, %v7076_v32  ;;  %16483 = vmatprep.subr.mxu0 %v19409_v5 }
 0x3c8   : > { %16480 = vmatprep.mubr.f32.mxu1 %v10226_v35  ;;  %v10237_v57 = vsub.f32 %v10157_v58, %v10236_v61  ;;  %v10227_v37 = vsub.f32 %v10154_v53, %v10226_v35  ;;  %v7079_v4 = vrot.slane %v7078_v7, 1 }
 0x3c9   : > { %16481 = vmatmul.mubr.f32.vlgmr.msra.gmra.mxu1 %v10236_v61 }
 0x3ca   : > { %16491 = vmatpush3.msra.mxu1 %v19395_v2  ;;  %v10228_v49 = vand.u32 4294901760, %v10227_v37  ;;  %v10238_v33 = vand.u32 4294901760, %v10237_v57  ;;  %v7080_v9 = vadd.f32 %v7079_v4, %v7078_v7 }
 0x3cb   : > { %16492 = vmatprep.subr.mxu1 %v19399_v16 }
 0x3cc   : > { %16493 = vmatpush3.msra.mxu1 %v19399_v16  ;;  %16494 = vmatprep.mubr.f32.mxu1 %v10228_v49  ;;  %v10229_v26 = vsub.f32 %v10227_v37, %v10228_v49  ;;  %v10239_v38 = vsub.f32 %v10237_v57, %v10238_v33  ;;  %16929 = vrcp.f32 %v7080_v9 }
 0x3cd   : > { %16504 = vmatprep.subr.mxu1 %v19395_v2  ;;  %16495 = vmatmul.mubr.f32.vlgmr.msra.gmra.mxu1 %v10238_v33 }
 0x3ce   : > { %16505 = vmatpush3.msra.mxu1 %v19395_v2  ;;  %16508 = vmatprep.mubr.f32.mxu1 %v10226_v35  ;;  %v10230_v21 = vand.u32 4294901760, %v10229_v26  ;;  %v10240_v54 = vand.u32 4294901760, %v10239_v38  ;;  %v11169_v2 = vld [vmem:[#allocation7] sm:$0xff] }
 0x3cf   : > { %16506 = vmatprep.subr.mxu1 %v19399_v16 }
 0x3d0   : > { %16507 = vmatpush3.msra.mxu1 %v19399_v16  ;;  %16473 = vmatprep.mubr.f32.mxu0 %v10230_v21  ;;  %v19503_v16 = vand.u32 4294901760, %v11169_v2 }
 0x3d1   : > { %16518 = vmatprep.subr.mxu1 %v10787_v48  ;;  %16474 = vmatmul.mubr.f32.vlgmr.msra.gmra.mxu0 %v10240_v54 }
 0x3d2   : > { %16484 = vmatpush3.msra.mxu0 %v19409_v5  ;;  %16509 = vmatmul.mubr.f32.vlgmr.msra.gmra.mxu1 %v10236_v61  ;;  %v19512_v13 = vsub.f32 %v11169_v2, %v19503_v16 }
 0x3d3   : > { %16519 = vmatpush3.msra.mxu1 %v10787_v48  ;;  %16485 = vmatprep.subr.mxu0 %v19416_v12 }
 0x3d4   : > { %16487 = vmatprep.mubr.f32.mxu0 %v10227_v37  ;;  %16520 = vmatprep.subr.mxu1 %v10794_v59 }
 0x3d5   : > { %16486 = vmatpush3.msra.mxu0 %v19416_v12  ;;  %16521 = vmatpush3.msra.mxu1 %v10794_v59 }
 0x3d6   : > { %16497 = vmatprep.subr.mxu0 %v19422_v56  ;;  %16532 = vmatprep.subr.mxu1 %v19458_v27 }
 0x3d7   : > { %16488 = vmatmul.mubr.f32.vlgmr.msra.gmra.mxu0 %v10237_v57 }
 0x3d8   : > { %16498 = vmatpush3.msra.mxu0 %v19422_v56  ;;  %16501 = vmatprep.mubr.f32.mxu0 %v10226_v35  ;;  %v19521_v56 = vand.u32 4294901760, %v19512_v13 }
 0x3d9   : > { %16499 = vmatprep.subr.mxu0 %v19428_v23  ;;  %v16930_v5 = vpop.eup %16929 }
 0x3da   : > { %16500 = vmatpush3.msra.mxu0 %v19428_v23  ;;  %v7103_v30 = vmul.f32 %v16930_v5, %v19444_v36  ;;  %v7104_v10 = vmul.f32 %v16930_v5, %v19447_v44  ;;  %v11303_v18 = vsub.f32 %v19512_v13, %v19521_v56  ;;  %v11171_v5 = vld [vmem:[#allocation7 + $0x10] sm:$0xff] }
 0x3db   : > { %16511 = vmatprep.subr.mxu0 %v19458_v27  ;;  %16502 = vmatmul.mubr.f32.vlgmr.msra.gmra.mxu0 %v10236_v61 }
 0x3dc   : > { %16512 = vmatpush3.msra.mxu0 %v19458_v27  ;;  %v10662_v12 = vsel %vm6888_vm2, %v7103_v30, 0  ;;  %v10665_v60 = vsel %vm6888_vm2, %v7104_v10, 0  ;;  %v11304_v31 = vand.u32 4294901760, %v11303_v18 }
 0x3dd   : > { %16513 = vmatprep.subr.mxu0 %v19462_v6  ;;  %v10734_v20 = vand.u32 4294901760, %v10662_v12  ;;  %v10744_v51 = vand.u32 4294901760, %v10665_v60 }
 0x3de   : > { %16514 = vmatpush3.msra.mxu0 %v19462_v6 }
 0x3df   : > { %16525 = vmatprep.subr.mxu0 %v19468_v46  ;;  %16522 = vmatprep.mubr.f32.mxu1 %v10734_v20  ;;  %v10745_v41 = vsub.f32 %v10665_v60, %v10744_v51  ;;  %v10735_v52 = vsub.f32 %v10662_v12, %v10734_v20 }
 0x3e0   : > { %16523 = vmatmul.mubr.f32.vlgmr.msra.gmra.mxu1 %v10744_v51 }
 0x3e1   : > { %16533 = vmatpush3.msra.mxu1 %v19458_v27  ;;  %v10736_v19 = vand.u32 4294901760, %v10735_v52  ;;  %v10746_v63 = vand.u32 4294901760, %v10745_v41 }
 0x3e2   : > { %16534 = vmatprep.subr.mxu1 %v19462_v6 }
 0x3e3   : > { %16535 = vmatpush3.msra.mxu1 %v19462_v6  ;;  %16536 = vmatprep.mubr.f32.mxu1 %v10736_v19  ;;  %v10737_v39 = vsub.f32 %v10735_v52, %v10736_v19  ;;  %v10747_v23 = vsub.f32 %v10745_v41, %v10746_v63 }
 0x3e4   : > { %16546 = vmatprep.subr.mxu1 %v19458_v27  ;;  %16537 = vmatmul.mubr.f32.vlgmr.msra.gmra.mxu1 %v10746_v63 }
 0x3e5   : > { %16547 = vmatpush3.msra.mxu1 %v19458_v27  ;;  %16550 = vmatprep.mubr.f32.mxu1 %v10734_v20  ;;  %v10738_v24 = vand.u32 4294901760, %v10737_v39  ;;  %v10748_v55 = vand.u32 4294901760, %v10747_v23 }
 0x3e6   : > { %16548 = vmatprep.subr.mxu1 %v19462_v6 }
 0x3e7   : > { %16549 = vmatpush3.msra.mxu1 %v19462_v6  ;;  %16515 = vmatprep.mubr.f32.mxu0 %v10738_v24 }
 0x3e8   : > { %16516 = vmatmul.mubr.f32.vlgmr.msra.gmra.mxu0 %v10748_v55  ;;  %16551 = vmatmul.mubr.f32.vlgmr.msra.gmra.mxu1 %v10744_v51 }
 0x3e9   : > { %16526 = vmatpush3.msra.mxu0 %v19468_v46  ;;  %16529 = vmatprep.mubr.f32.mxu0 %v10735_v52  ;;  %v19546_v46 = vsub.f32 %v11170_v25, %v19543_v15 }
 0x3ea   : > { %16527 = vmatprep.subr.mxu0 %v19477_v1  ;;  %16558 = vmatprep.subr.mxu1 %v11304_v31 }
 0x3eb   : > { %16528 = vmatpush3.msra.mxu0 %v19477_v1  ;;  %16559 = vmatpush3.msra.mxu1 %v11304_v31  ;;  %v19550_v7 = vand.u32 4294901760, %v19546_v46 }
 0x3ec   : > { %16539 = vmatprep.subr.mxu0 %v19481_v17  ;;  %16530 = vmatmul.mubr.f32.vlgmr.msra.gmra.mxu0 %v10745_v41 }
 0x3ed   : > { %16540 = vmatpush3.msra.mxu0 %v19481_v17  ;;  %16543 = vmatprep.mubr.f32.mxu0 %v10734_v20  ;;  %v11798_v49 = vsub.f32 %v19546_v46, %v19550_v7  ;;  %v19565_v20 = vand.u32 4294901760, %v11171_v5 }
 0x3ee   : > { %16541 = vmatprep.subr.mxu0 %v19486_v28  ;;  %16568 = vmatprep.subr.mxu1 %v19503_v16 }
 0x3ef   : > { %v16230_v8 = vpop.f32.mrf.mxu1  ;;  %16542 = vmatpush3.msra.mxu0 %v19486_v28  ;;  %v11799_v26 = vand.u32 4294901760, %v11798_v49  ;;  %v19568_v39 = vsub.f32 %v11171_v5, %v19565_v20 }
 0x3f0   : > { %16544 = vmatmul.mubr.f32.vlgmr.msra.gmra.mxu0 %v10744_v51  ;;  %16553 = vmatprep.subr.mxu0 %v19503_v16 }
 0x3f1   : > { %v7275_v50 = vpop.f32.mrf.mxu1  ;;  %16554 = vmatpush3.msra.mxu0 %v19503_v16 }
 0x3f2   : > { %16563 = vmatprep.subr.mxu0 %v19512_v13 }
 0x3f3   : > { %v16244_v42 = vpop.f32.mrf.mxu1 }
 0x3f5   : > { %v7439_v44 = vpop.f32.mrf.mxu1 }
 0x3f7   : > { %v16223_v43 = vpop.f32.mrf.mxu0 }
 0x3f8   : > { %v7282_v36 = vadd.f32 %v16230_v8, %v16223_v43  ;;  %v16258_v6 = vpop.f32.mrf.mxu1  ;;  %v19572_v43 = vand.u32 4294901760, %v19568_v39 }
 0x3f9   : > { %v7184_v0 = vpop.f32.mrf.mxu0 }
 0x3fa   : > { %v7276_v22 = vadd.f32 %v7275_v50, %v7184_v0  ;;  %v7603_v35 = vpop.f32.mrf.mxu1 }
 0x3fd   : > { %v16237_v3 = vpop.f32.mrf.mxu0 }
 0x3fe   : > { %v7365_v11 = vadd.f32 %v16237_v3, %v7282_v36 }
 0x3ff   : > { %v7357_v27 = vpop.f32.mrf.mxu0 }
 0x400   : > { %v7358_v40 = vadd.f32 %v7357_v27, %v7276_v22  ;;  %v7448_v34 = vadd.f32 %v16244_v42, %v7365_v11 }
 0x401   : > { %v16251_v32 = vpop.f32.mrf.mxu0 }
 0x402   : > { %v7531_v14 = vadd.f32 %v16251_v32, %v7448_v34  ;;  %v7440_v62 = vadd.f32 %v7439_v44, %v7358_v40  ;;  %v12293_v44 = vsub.f32 %v19568_v39, %v19572_v43 }
 0x403   : > { %v7524_v47 = vpop.f32.mrf.mxu0 }
 0x404   : > { %v7610_v53 = vadd.f32 %v16258_v6, %v7531_v14  ;;  %v7525_v58 = vadd.f32 %v7524_v47, %v7440_v62  ;;  %v12294_v34 = vand.u32 4294901760, %v12293_v44 }
 0x406   : > { %v11181_v61 = vsel %vm2775_vm1, %v7610_v53, 0  ;;  %v7604_v1 = vadd.f32 %v7603_v35, %v7525_v58  ;;  %v11172_v35 = vld [vmem:[#allocation7 + $0x18] sm:$0xff] }
 0x407   : > { %v11259_v17 = vand.u32 4294901760, %v11181_v61 }
 0x408   : > { %v11178_v57 = vsel %vm2775_vm1, %v7604_v1, 0 }
 0x409   : > { %v11260_v37 = vsub.f32 %v11181_v61, %v11259_v17  ;;  %v11249_v4 = vand.u32 4294901760, %v11178_v57 }
 0x40b   : > { %v11250_v33 = vsub.f32 %v11178_v57, %v11249_v4  ;;  %16560 = vmatprep.mubr.f32.mxu1 %v11249_v4  ;;  %v11261_v28 = vand.u32 4294901760, %v11260_v37 }
 0x40c   : > { %16561 = vmatmul.mubr.f32.vlgmr.msra.gmra.mxu1 %v11259_v17 }
 0x40d   : > { %16569 = vmatpush3.msra.mxu1 %v19503_v16  ;;  %v11251_v9 = vand.u32 4294901760, %v11250_v33  ;;  %v11262_v45 = vsub.f32 %v11260_v37, %v11261_v28 }
 0x40e   : > { %16578 = vmatprep.subr.mxu1 %v19503_v16 }
 0x40f   : > { %16570 = vmatprep.mubr.f32.mxu1 %v11251_v9  ;;  %v11252_v38 = vsub.f32 %v11250_v33, %v11251_v9  ;;  %v11263_v54 = vand.u32 4294901760, %v11262_v45 }
 0x410   : > { %16571 = vmatmul.mubr.f32.vlgmr.msra.gmra.mxu1 %v11261_v28 }
 0x411   : > { %16580 = vmatprep.mubr.f32.mxu1 %v11249_v4  ;;  %v11253_v21 = vand.u32 4294901760, %v11252_v38  ;;  %16579 = vmatpush3.msra.mxu1 %v19503_v16  ;;  %v16272_v29 = vpop.f32.mrf.mxu1 }
 0x412   : > { %16588 = vmatprep.subr.mxu1 %v11799_v26 }
 0x413   : > { %16555 = vmatprep.mubr.f32.mxu0 %v11253_v21  ;;  %v7783_v48 = vpop.f32.mrf.mxu1 }
 0x414   : > { %16556 = vmatmul.mubr.f32.vlgmr.msra.gmra.mxu0 %v11263_v54  ;;  %16581 = vmatmul.mubr.f32.vlgmr.msra.gmra.mxu1 %v11259_v17 }
 0x415   : > { %16565 = vmatprep.mubr.f32.mxu0 %v11250_v33  ;;  %16564 = vmatpush3.msra.mxu0 %v19512_v13  ;;  %v16286_v2 = vpop.f32.mrf.mxu1 }
 0x416   : > { %16573 = vmatprep.subr.mxu0 %v19521_v56  ;;  %16589 = vmatpush3.msra.mxu1 %v11799_v26 }
 0x417   : > { %16598 = vmatprep.subr.mxu1 %v19543_v15  ;;  %v7947_v10 = vpop.f32.mrf.mxu1 }
 0x418   : > { %16566 = vmatmul.mubr.f32.vlgmr.msra.gmra.mxu0 %v11260_v37  ;;  %v19583_v37 = vand.u32 4294901760, %v11172_v35 }
 0x419   : > { %16575 = vmatprep.mubr.f32.mxu0 %v11249_v4  ;;  %16574 = vmatpush3.msra.mxu0 %v19521_v56  ;;  %v16265_v59 = vpop.f32.mrf.mxu0 }
 0x41a   : > { %16583 = vmatprep.subr.mxu0 %v19543_v15  ;;  %v7790_v30 = vadd.f32 %v16272_v29, %v16265_v59  ;;  %v16300_v52 = vpop.f32.mrf.mxu1  ;;  %v19588_v26 = vsub.f32 %v11172_v35, %v19583_v37 }
 0x41b   : > { %v7692_v16 = vpop.f32.mrf.mxu0 }
 0x41c   : > { %16576 = vmatmul.mubr.f32.vlgmr.msra.gmra.mxu0 %v11259_v17  ;;  %v7784_v12 = vadd.f32 %v7783_v48, %v7692_v16  ;;  %v8111_v31 = vpop.f32.mrf.mxu1  ;;  %v19594_v59 = vand.u32 4294901760, %v19588_v26 }
 0x41d   : > { %16584 = vmatpush3.msra.mxu0 %v19543_v15 }
 0x41e   : > { %16593 = vmatprep.subr.mxu0 %v19546_v46 }
 0x41f   : > { %v16279_v13 = vpop.f32.mrf.mxu0 }
 0x420   : > { %v7873_v60 = vadd.f32 %v16279_v13, %v7790_v30  ;;  %v12788_v13 = vsub.f32 %v19588_v26, %v19594_v59 }
 0x421   : > { %v7865_v51 = vpop.f32.mrf.mxu0 }
 0x422   : > { %v7866_v56 = vadd.f32 %v7865_v51, %v7784_v12  ;;  %v7956_v41 = vadd.f32 %v16286_v2, %v7873_v60 }
 0x423   : > { %v16293_v19 = vpop.f32.mrf.mxu0 }
 0x424   : > { %v8039_v63 = vadd.f32 %v16293_v19, %v7956_v41  ;;  %v7948_v18 = vadd.f32 %v7947_v10, %v7866_v56 }
 0x425   : > { %v8032_v23 = vpop.f32.mrf.mxu0 }
 0x426   : > { %v8118_v24 = vadd.f32 %v16300_v52, %v8039_v63  ;;  %v8033_v55 = vadd.f32 %v8032_v23, %v7948_v18  ;;  %v12789_v52 = vand.u32 4294901760, %v12788_v13 }
 0x428   : > { %v11676_v8 = vsel %vm2775_vm1, %v8118_v24, 0  ;;  %v8112_v50 = vadd.f32 %v8111_v31, %v8033_v55  ;;  %v11173_v31 = vld [vmem:[#allocation7 + $0x20] sm:$0xff] }
 0x429   : > { %v11754_v42 = vand.u32 4294901760, %v11676_v8  ;;  %v16314_v11 = vpop.f32.mrf.mxu1 }
 0x42a   : > { %v11673_v0 = vsel %vm2775_vm1, %v8112_v50, 0 }
 0x42b   : > { %v11755_v25 = vsub.f32 %v11676_v8, %v11754_v42  ;;  %v11744_v36 = vand.u32 4294901760, %v11673_v0  ;;  %v8291_v6 = vpop.f32.mrf.mxu1 }
 0x42d   : > { %v11756_v3 = vand.u32 4294901760, %v11755_v25  ;;  %v11745_v22 = vsub.f32 %v11673_v0, %v11744_v36  ;;  %16590 = vmatprep.mubr.f32.mxu1 %v11744_v36  ;;  %v16328_v53 = vpop.f32.mrf.mxu1 }
 0x42e   : > { %16591 = vmatmul.mubr.f32.vlgmr.msra.gmra.mxu1 %v11754_v42 }
 0x42f   : > { %16599 = vmatpush3.msra.mxu1 %v19543_v15  ;;  %v11746_v27 = vand.u32 4294901760, %v11745_v22  ;;  %v11757_v40 = vsub.f32 %v11755_v25, %v11756_v3  ;;  %v8455_v1 = vpop.f32.mrf.mxu1 }
 0x430   : > { %16608 = vmatprep.subr.mxu1 %v19543_v15 }
 0x431   : > { %16600 = vmatprep.mubr.f32.mxu1 %v11746_v27  ;;  %v11747_v32 = vsub.f32 %v11745_v22, %v11746_v27  ;;  %v16307_v14 = vpop.f32.mrf.mxu0  ;;  %v11758_v47 = vand.u32 4294901760, %v11757_v40 }
 0x432   : > { %16601 = vmatmul.mubr.f32.vlgmr.msra.gmra.mxu1 %v11756_v3  ;;  %v8298_v61 = vadd.f32 %v16314_v11, %v16307_v14  ;;  %v16342_v33 = vpop.f32.mrf.mxu1 }
 0x433   : > { %16610 = vmatprep.mubr.f32.mxu1 %v11744_v36  ;;  %v11748_v62 = vand.u32 4294901760, %v11747_v32  ;;  %16609 = vmatpush3.msra.mxu1 %v19543_v15  ;;  %v8200_v58 = vpop.f32.mrf.mxu0 }
 0x434   : > { %16618 = vmatprep.subr.mxu1 %v12294_v34  ;;  %v8292_v15 = vadd.f32 %v8291_v6, %v8200_v58 }
 0x435   : > { %16585 = vmatprep.mubr.f32.mxu0 %v11748_v62 }
 0x436   : > { %16586 = vmatmul.mubr.f32.vlgmr.msra.gmra.mxu0 %v11758_v47  ;;  %16611 = vmatmul.mubr.f32.vlgmr.msra.gmra.mxu1 %v11754_v42 }
 0x437   : > { %16595 = vmatprep.mubr.f32.mxu0 %v11745_v22  ;;  %16594 = vmatpush3.msra.mxu0 %v19546_v46  ;;  %v16321_v17 = vpop.f32.mrf.mxu0 }
 0x438   : > { %16603 = vmatprep.subr.mxu0 %v19550_v7  ;;  %16619 = vmatpush3.msra.mxu1 %v12294_v34  ;;  %v8381_v57 = vadd.f32 %v16321_v17, %v8298_v61 }
 0x439   : > { %16628 = vmatprep.subr.mxu1 %v19565_v20  ;;  %v8373_v4 = vpop.f32.mrf.mxu0 }
 0x43a   : > { %16596 = vmatmul.mubr.f32.vlgmr.msra.gmra.mxu0 %v11755_v25  ;;  %v8374_v49 = vadd.f32 %v8373_v4, %v8292_v15  ;;  %v8464_v46 = vadd.f32 %v16328_v53, %v8381_v57 }
 0x43b   : > { %16605 = vmatprep.mubr.f32.mxu0 %v11744_v36  ;;  %16604 = vmatpush3.msra.mxu0 %v19550_v7  ;;  %v16335_v28 = vpop.f32.mrf.mxu0  ;;  %v8619_v7 = vpop.f32.mrf.mxu1 }
 0x43c   : > { %16613 = vmatprep.subr.mxu0 %v19565_v20  ;;  %v8547_v9 = vadd.f32 %v16335_v28, %v8464_v46  ;;  %v8456_v45 = vadd.f32 %v8455_v1, %v8374_v49 }
 0x43d   : > { %v8540_v38 = vpop.f32.mrf.mxu0 }
 0x43e   : > { %16606 = vmatmul.mubr.f32.vlgmr.msra.gmra.mxu0 %v11754_v42  ;;  %v8626_v21 = vadd.f32 %v16342_v33, %v8547_v9  ;;  %v8541_v54 = vadd.f32 %v8540_v38, %v8456_v45 }
 0x43f   : > { %16614 = vmatpush3.msra.mxu0 %v19565_v20 }
 0x440   : > { %16623 = vmatprep.subr.mxu0 %v19568_v39  ;;  %v12171_v29 = vsel %vm2775_vm1, %v8626_v21, 0  ;;  %v8620_v48 = vadd.f32 %v8619_v7, %v8541_v54  ;;  %v11174_v7 = vld [vmem:[#allocation7 + $0x28] sm:$0xff] }
 0x441   : > { %v12249_v2 = vand.u32 4294901760, %v12171_v29 }
 0x442   : > { %v12168_v16 = vsel %vm2775_vm1, %v8620_v48, 0  ;;  %v16356_v10 = vpop.f32.mrf.mxu1 }
 0x443   : > { %v12250_v5 = vsub.f32 %v12171_v29, %v12249_v2  ;;  %v12239_v30 = vand.u32 4294901760, %v12168_v16 }
 0x444   : > { %v8799_v41 = vpop.f32.mrf.mxu1 }
 0x445   : > { %v12251_v12 = vand.u32 4294901760, %v12250_v5  ;;  %v12240_v60 = vsub.f32 %v12168_v16, %v12239_v30  ;;  %16620 = vmatprep.mubr.f32.mxu1 %v12239_v30 }
 0x446   : > { %16621 = vmatmul.mubr.f32.vlgmr.msra.gmra.mxu1 %v12249_v2  ;;  %v16370_v24 = vpop.f32.mrf.mxu1 }
 0x447   : > { %16629 = vmatpush3.msra.mxu1 %v19565_v20  ;;  %v12241_v51 = vand.u32 4294901760, %v12240_v60  ;;  %v12252_v56 = vsub.f32 %v12250_v5, %v12251_v12 }
 0x448   : > { %16638 = vmatprep.subr.mxu1 %v19565_v20  ;;  %v8963_v50 = vpop.f32.mrf.mxu1 }
 0x449   : > { %16630 = vmatprep.mubr.f32.mxu1 %v12241_v51  ;;  %v12242_v19 = vsub.f32 %v12240_v60, %v12241_v51  ;;  %v12253_v23 = vand.u32 4294901760, %v12252_v56 }
 0x44a   : > { %16631 = vmatmul.mubr.f32.vlgmr.msra.gmra.mxu1 %v12251_v12  ;;  %v16349_v63 = vpop.f32.mrf.mxu0 }
 0x44b   : > { %16640 = vmatprep.mubr.f32.mxu1 %v12239_v30  ;;  %v12243_v18 = vand.u32 4294901760, %v12242_v19  ;;  %16639 = vmatpush3.msra.mxu1 %v19565_v20  ;;  %v8806_v8 = vadd.f32 %v16356_v10, %v16349_v63  ;;  %v19605_v20 = vand.u32 4294901760, %v11173_v31  ;;  %v16384_v22 = vpop.f32.mrf.mxu1 }
 0x44c   : > { %v8708_v55 = vpop.f32.mrf.mxu0  ;;  %16648 = vmatprep.subr.mxu1 %v12789_v52 }
 0x44d   : > { %16615 = vmatprep.mubr.f32.mxu0 %v12243_v18  ;;  %v8800_v0 = vadd.f32 %v8799_v41, %v8708_v55  ;;  %v19610_v40 = vsub.f32 %v11173_v31, %v19605_v20  ;;  %v9127_v14 = vpop.f32.mrf.mxu1 }
 0x44e   : > { %16616 = vmatmul.mubr.f32.vlgmr.msra.gmra.mxu0 %v12253_v23  ;;  %16641 = vmatmul.mubr.f32.vlgmr.msra.gmra.mxu1 %v12249_v2 }
 0x44f   : > { %16625 = vmatprep.mubr.f32.mxu0 %v12240_v60  ;;  %16624 = vmatpush3.msra.mxu0 %v19568_v39  ;;  %v19616_v47 = vand.u32 4294901760, %v19610_v40 }
 0x450   : > { %v16363_v42 = vpop.f32.mrf.mxu0  ;;  %16633 = vmatprep.subr.mxu0 %v19572_v43  ;;  %16649 = vmatpush3.msra.mxu1 %v12789_v52 }
 0x451   : > { %v8889_v25 = vadd.f32 %v16363_v42, %v8806_v8  ;;  %16658 = vmatprep.subr.mxu1 %v19583_v37  ;;  %v13283_v17 = vsub.f32 %v19610_v40, %v19616_v47 }
 0x452   : > { %v8881_v36 = vpop.f32.mrf.mxu0  ;;  %16626 = vmatmul.mubr.f32.vlgmr.msra.gmra.mxu0 %v12250_v5 }
 0x453   : > { %v8882_v44 = vadd.f32 %v8881_v36, %v8800_v0  ;;  %v8972_v3 = vadd.f32 %v16370_v24, %v8889_v25  ;;  %16635 = vmatprep.mubr.f32.mxu0 %v12239_v30  ;;  %16634 = vmatpush3.msra.mxu0 %v19572_v43  ;;  %v13284_v28 = vand.u32 4294901760, %v13283_v17  ;;  %v19625_v30 = vand.u32 4294901760, %v11174_v7 }
 0x454   : > { %v16377_v39 = vpop.f32.mrf.mxu0  ;;  %16643 = vmatprep.subr.mxu0 %v19583_v37 }
 0x455   : > { %v9055_v11 = vadd.f32 %v16377_v39, %v8972_v3  ;;  %v8964_v27 = vadd.f32 %v8963_v50, %v8882_v44 }
 0x456   : > { %v9048_v34 = vpop.f32.mrf.mxu0  ;;  %16636 = vmatmul.mubr.f32.vlgmr.msra.gmra.mxu0 %v12249_v2 }
 0x457   : > { %v9134_v6 = vadd.f32 %v16384_v22, %v9055_v11  ;;  %v9049_v32 = vadd.f32 %v9048_v34, %v8964_v27  ;;  %16644 = vmatpush3.msra.mxu0 %v19583_v37 }
 0x458   : > { %16653 = vmatprep.subr.mxu0 %v19588_v26  ;;  %v16398_v35 = vpop.f32.mrf.mxu1 }
 0x459   : > { %v12666_v43 = vsel %vm2775_vm1, %v9134_v6, 0  ;;  %v9128_v62 = vadd.f32 %v9127_v14, %v9049_v32  ;;  %v11175_v14 = vld [vmem:[#allocation7 + $0x30] sm:$0xff] }
 0x45a   : > { %v12744_v53 = vand.u32 4294901760, %v12666_v43  ;;  %v9307_v4 = vpop.f32.mrf.mxu1 }
 0x45b   : > { %v12663_v58 = vsel %vm2775_vm1, %v9128_v62, 0 }
 0x45c   : > { %v12745_v61 = vsub.f32 %v12666_v43, %v12744_v53  ;;  %v12734_v1 = vand.u32 4294901760, %v12663_v58  ;;  %v16412_v45 = vpop.f32.mrf.mxu1 }
 0x45e   : > { %v12746_v15 = vand.u32 4294901760, %v12745_v61  ;;  %v12735_v57 = vsub.f32 %v12663_v58, %v12734_v1  ;;  %16650 = vmatprep.mubr.f32.mxu1 %v12734_v1  ;;  %v9471_v48 = vpop.f32.mrf.mxu1 }
 0x45f   : > { %16651 = vmatmul.mubr.f32.vlgmr.msra.gmra.mxu1 %v12744_v53 }
 0x460   : > { %16659 = vmatpush3.msra.mxu1 %v19583_v37  ;;  %v12736_v49 = vand.u32 4294901760, %v12735_v57  ;;  %v12747_v46 = vsub.f32 %v12745_v61, %v12746_v15  ;;  %v16391_v33 = vpop.f32.mrf.mxu0 }
 0x461   : > { %16668 = vmatprep.subr.mxu1 %v19583_v37  ;;  %v9314_v29 = vadd.f32 %v16398_v35, %v16391_v33  ;;  %v16426_v12 = vpop.f32.mrf.mxu1 }
 0x462   : > { %16660 = vmatprep.mubr.f32.mxu1 %v12736_v49  ;;  %v12737_v9 = vsub.f32 %v12735_v57, %v12736_v49  ;;  %v9216_v38 = vpop.f32.mrf.mxu0  ;;  %v12748_v54 = vand.u32 4294901760, %v12747_v46 }
 0x463   : > { %16661 = vmatmul.mubr.f32.vlgmr.msra.gmra.mxu1 %v12746_v15  ;;  %v9308_v16 = vadd.f32 %v9307_v4, %v9216_v38  ;;  %v9635_v63 = vpop.f32.mrf.mxu1 }
 0x464   : > { %16670 = vmatprep.mubr.f32.mxu1 %v12734_v1  ;;  %v12738_v21 = vand.u32 4294901760, %v12737_v9  ;;  %16669 = vmatpush3.msra.mxu1 %v19583_v37 }
 0x465   : > { %16678 = vmatprep.subr.mxu1 %v13284_v28 }
 0x466   : > { %16645 = vmatprep.mubr.f32.mxu0 %v12738_v21  ;;  %v16405_v2 = vpop.f32.mrf.mxu0 }
 0x467   : > { %16646 = vmatmul.mubr.f32.vlgmr.msra.gmra.mxu0 %v12748_v54  ;;  %16671 = vmatmul.mubr.f32.vlgmr.msra.gmra.mxu1 %v12744_v53  ;;  %v9397_v5 = vadd.f32 %v16405_v2, %v9314_v29 }
 0x468   : > { %16655 = vmatprep.mubr.f32.mxu0 %v12735_v57  ;;  %16654 = vmatpush3.msra.mxu0 %v19588_v26  ;;  %v9389_v10 = vpop.f32.mrf.mxu0  ;;  %v19631_v26 = vsub.f32 %v11174_v7, %v19625_v30 }
 0x469   : > { %16663 = vmatprep.subr.mxu0 %v19594_v59  ;;  %16679 = vmatpush3.msra.mxu1 %v13284_v28  ;;  %v9390_v37 = vadd.f32 %v9389_v10, %v9308_v16  ;;  %v9480_v13 = vadd.f32 %v16412_v45, %v9397_v5 }
 0x46a   : > { %16688 = vmatprep.subr.mxu1 %v19605_v20  ;;  %v16419_v60 = vpop.f32.mrf.mxu0  ;;  %v19637_v24 = vand.u32 4294901760, %v19631_v26 }
 0x46b   : > { %16656 = vmatmul.mubr.f32.vlgmr.msra.gmra.mxu0 %v12745_v61  ;;  %v9563_v51 = vadd.f32 %v16419_v60, %v9480_v13  ;;  %v9472_v56 = vadd.f32 %v9471_v48, %v9390_v37 }
 0x46c   : > { %16665 = vmatprep.mubr.f32.mxu0 %v12734_v1  ;;  %16664 = vmatpush3.msra.mxu0 %v19594_v59  ;;  %v9556_v41 = vpop.f32.mrf.mxu0  ;;  %v13778_v42 = vsub.f32 %v19631_v26, %v19637_v24 }
 0x46d   : > { %16673 = vmatprep.subr.mxu0 %v19605_v20  ;;  %v9642_v52 = vadd.f32 %v16426_v12, %v9563_v51  ;;  %v9557_v19 = vadd.f32 %v9556_v41, %v9472_v56 }
 0x46e   : > { %v13779_v22 = vand.u32 4294901760, %v13778_v42 }
 0x46f   : > { %16666 = vmatmul.mubr.f32.vlgmr.msra.gmra.mxu0 %v12744_v53  ;;  %v13161_v18 = vsel %vm2775_vm1, %v9642_v52, 0  ;;  %v9636_v23 = vadd.f32 %v9635_v63, %v9557_v19  ;;  %v11176_v63 = vld [vmem:[#allocation7 + $0x38] sm:$0xff] }
 0x470   : > { %16674 = vmatpush3.msra.mxu0 %v19605_v20  ;;  %v13239_v55 = vand.u32 4294901760, %v13161_v18  ;;  %v16440_v50 = vpop.f32.mrf.mxu1 }
 0x471   : > { %16683 = vmatprep.subr.mxu0 %v19610_v40  ;;  %v13158_v59 = vsel %vm2775_vm1, %v9636_v23, 0 }
 0x472   : > { %v13240_v31 = vsub.f32 %v13161_v18, %v13239_v55  ;;  %v13229_v8 = vand.u32 4294901760, %v13158_v59  ;;  %v9815_v3 = vpop.f32.mrf.mxu1 }
 0x474   : > { %v13241_v0 = vand.u32 4294901760, %v13240_v31  ;;  %v13230_v25 = vsub.f32 %v13158_v59, %v13229_v8  ;;  %16680 = vmatprep.mubr.f32.mxu1 %v13229_v8  ;;  %v16454_v6 = vpop.f32.mrf.mxu1 }
 0x475   : > { %16681 = vmatmul.mubr.f32.vlgmr.msra.gmra.mxu1 %v13239_v55 }
 0x476   : > { %16689 = vmatpush3.msra.mxu1 %v19605_v20  ;;  %v13231_v36 = vand.u32 4294901760, %v13230_v25  ;;  %v13242_v44 = vsub.f32 %v13240_v31, %v13241_v0  ;;  %v9979_v62 = vpop.f32.mrf.mxu1 }
 0x477   : > { %16698 = vmatprep.subr.mxu1 %v19605_v20 }
 0x478   : > { %16690 = vmatprep.mubr.f32.mxu1 %v13231_v36  ;;  %v13232_v39 = vsub.f32 %v13230_v25, %v13231_v36  ;;  %v16433_v11 = vpop.f32.mrf.mxu0  ;;  %v13243_v34 = vand.u32 4294901760, %v13242_v44 }
 0x479   : > { %16691 = vmatmul.mubr.f32.vlgmr.msra.gmra.mxu1 %v13241_v0  ;;  %v9822_v43 = vadd.f32 %v16440_v50, %v16433_v11  ;;  %v16468_v15 = vpop.f32.mrf.mxu1 }
 0x47a   : > { %16700 = vmatprep.mubr.f32.mxu1 %v13229_v8  ;;  %v13233_v27 = vand.u32 4294901760, %v13232_v39  ;;  %16699 = vmatpush3.msra.mxu1 %v19605_v20  ;;  %v9724_v32 = vpop.f32.mrf.mxu0  ;;  %v19649_v20 = vand.u32 4294901760, %v11175_v14 }
 0x47b   : > { %16708 = vmatprep.subr.mxu1 %v13779_v22  ;;  %v9816_v58 = vadd.f32 %v9815_v3, %v9724_v32  ;;  %v10143_v9 = vpop.f32.mrf.mxu1 }
 0x47c   : > { %16675 = vmatprep.mubr.f32.mxu0 %v13233_v27  ;;  %v19654_v49 = vsub.f32 %v11175_v14, %v19649_v20 }
 0x47d   : > { %16676 = vmatmul.mubr.f32.vlgmr.msra.gmra.mxu0 %v13243_v34  ;;  %16701 = vmatmul.mubr.f32.vlgmr.msra.gmra.mxu1 %v13239_v55 }
 0x47e   : > { %16685 = vmatprep.mubr.f32.mxu0 %v13230_v25  ;;  %16684 = vmatpush3.msra.mxu0 %v19610_v40  ;;  %v16447_v53 = vpop.f32.mrf.mxu0  ;;  %v19660_v38 = vand.u32 4294901760, %v19654_v49 }
 0x47f   : > { %16693 = vmatprep.subr.mxu0 %v19616_v47  ;;  %16709 = vmatpush3.msra.mxu1 %v13779_v22  ;;  %v9905_v35 = vadd.f32 %v16447_v53, %v9822_v43 }
 0x480   : > { %16718 = vmatprep.subr.mxu1 %v19625_v30  ;;  %v9897_v61 = vpop.f32.mrf.mxu0  ;;  %v14273_v2 = vsub.f32 %v19654_v49, %v19660_v38 }
 0x481   : > { %16686 = vmatmul.mubr.f32.vlgmr.msra.gmra.mxu0 %v13240_v31  ;;  %v9898_v1 = vadd.f32 %v9897_v61, %v9816_v58  ;;  %v9988_v17 = vadd.f32 %v16454_v6, %v9905_v35 }
 0x482   : > { %16695 = vmatprep.mubr.f32.mxu0 %v13229_v8  ;;  %16694 = vmatpush3.msra.mxu0 %v19616_v47  ;;  %v16461_v40 = vpop.f32.mrf.mxu0  ;;  %v14274_v60 = vand.u32 4294901760, %v14273_v2  ;;  %v19669_v8 = vand.u32 4294901760, %v11176_v63 }
 0x483   : > { %16703 = vmatprep.subr.mxu0 %v19625_v30  ;;  %v10071_v57 = vadd.f32 %v16461_v40, %v9988_v17  ;;  %v9980_v4 = vadd.f32 %v9979_v62, %v9898_v1 }
 0x484   : > { %v10064_v46 = vpop.f32.mrf.mxu0 }
 0x485   : > { %16696 = vmatmul.mubr.f32.vlgmr.msra.gmra.mxu0 %v13239_v55  ;;  %v10150_v33 = vadd.f32 %v16468_v15, %v10071_v57  ;;  %v10065_v28 = vadd.f32 %v10064_v46, %v9980_v4 }
 0x486   : > { %16704 = vmatpush3.msra.mxu0 %v19625_v30 }
 0x487   : > { %16713 = vmatprep.subr.mxu0 %v19631_v26  ;;  %v13656_v47 = vsel %vm2775_vm1, %v10150_v33, 0  ;;  %v10144_v45 = vadd.f32 %v10143_v9, %v10065_v28 }
 0x488   : > { %v13734_v21 = vand.u32 4294901760, %v13656_v47 }
 0x489   : > { %v13653_v54 = vsel %vm2775_vm1, %v10144_v45, 0  ;;  %v16482_v7 = vpop.f32.mrf.mxu1 }
 0x48a   : > { %v13735_v29 = vsub.f32 %v13656_v47, %v13734_v21  ;;  %v13724_v48 = vand.u32 4294901760, %v13653_v54 }
 0x48b   : > { %v10323_v10 = vpop.f32.mrf.mxu1 }
 0x48c   : > { %v13736_v16 = vand.u32 4294901760, %v13735_v29  ;;  %v13725_v5 = vsub.f32 %v13653_v54, %v13724_v48  ;;  %16710 = vmatprep.mubr.f32.mxu1 %v13724_v48 }
 0x48d   : > { %16711 = vmatmul.mubr.f32.vlgmr.msra.gmra.mxu1 %v13734_v21  ;;  %v16496_v56 = vpop.f32.mrf.mxu1 }
 0x48e   : > { %16719 = vmatpush3.msra.mxu1 %v19625_v30  ;;  %v13726_v37 = vand.u32 4294901760, %v13725_v5  ;;  %v13737_v13 = vsub.f32 %v13735_v29, %v13736_v16 }
 0x48f   : > { %16728 = vmatprep.subr.mxu1 %v19625_v30  ;;  %v10487_v23 = vpop.f32.mrf.mxu1 }
 0x490   : > { %16720 = vmatprep.mubr.f32.mxu1 %v13726_v37  ;;  %v13727_v51 = vsub.f32 %v13725_v5, %v13726_v37  ;;  %v13738_v19 = vand.u32 4294901760, %v13737_v13 }
 0x491   : > { %v16475_v12 = vpop.f32.mrf.mxu0  ;;  %16721 = vmatmul.mubr.f32.vlgmr.msra.gmra.mxu1 %v13736_v16 }
 0x492   : > { %16730 = vmatprep.mubr.f32.mxu1 %v13724_v48  ;;  %v13728_v52 = vand.u32 4294901760, %v13727_v51  ;;  %16729 = vmatpush3.msra.mxu1 %v19625_v30  ;;  %v10330_v18 = vadd.f32 %v16482_v7, %v16475_v12  ;;  %v16510_v0 = vpop.f32.mrf.mxu1 }
 0x493   : > { %v10232_v41 = vpop.f32.mrf.mxu0  ;;  %16738 = vmatprep.subr.mxu1 %v14274_v60 }
 0x494   : > { %16705 = vmatprep.mubr.f32.mxu0 %v13728_v52  ;;  %v10324_v59 = vadd.f32 %v10323_v10, %v10232_v41  ;;  %v10651_v11 = vpop.f32.mrf.mxu1 }
 0x495   : > { %16706 = vmatmul.mubr.f32.vlgmr.msra.gmra.mxu0 %v13738_v19  ;;  %16731 = vmatmul.mubr.f32.vlgmr.msra.gmra.mxu1 %v13734_v21 }
 0x496   : > { %16715 = vmatprep.mubr.f32.mxu0 %v13725_v5  ;;  %16714 = vmatpush3.msra.mxu0 %v19631_v26  ;;  %v19675_v26 = vsub.f32 %v11176_v63, %v19669_v8 }
 0x497   : > { %v16489_v55 = vpop.f32.mrf.mxu0  ;;  %16723 = vmatprep.subr.mxu0 %v19637_v24  ;;  %16739 = vmatpush3.msra.mxu1 %v14274_v60 }
 0x498   : > { %v10413_v31 = vadd.f32 %v16489_v55, %v10330_v18  ;;  %16748 = vmatprep.subr.mxu1 %v19649_v20  ;;  %v19681_v6 = vand.u32 4294901760, %v19675_v26 }
 0x499   : > { %v10405_v50 = vpop.f32.mrf.mxu0  ;;  %16716 = vmatmul.mubr.f32.vlgmr.msra.gmra.mxu0 %v13735_v29 }
 0x49a   : > { %v10406_v30 = vadd.f32 %v10405_v50, %v10324_v59  ;;  %v10496_v42 = vadd.f32 %v16496_v56, %v10413_v31  ;;  %16725 = vmatprep.mubr.f32.mxu0 %v13724_v48  ;;  %16724 = vmatpush3.msra.mxu0 %v19637_v24  ;;  %v14768_v53 = vsub.f32 %v19675_v26, %v19681_v6 }
 0x49b   : > { %v16503_v25 = vpop.f32.mrf.mxu0  ;;  %16733 = vmatprep.subr.mxu0 %v19649_v20 }
 0x49c   : > { %v10579_v36 = vadd.f32 %v16503_v25, %v10496_v42  ;;  %v10488_v44 = vadd.f32 %v10487_v23, %v10406_v30  ;;  %v14769_v15 = vand.u32 4294901760, %v14768_v53 }
 0x49d   : > { %v10572_v3 = vpop.f32.mrf.mxu0  ;;  %16726 = vmatmul.mubr.f32.vlgmr.msra.gmra.mxu0 %v13734_v21 }
 0x49e   : > { %v10658_v22 = vadd.f32 %v16510_v0, %v10579_v36  ;;  %v10573_v39 = vadd.f32 %v10572_v3, %v10488_v44  ;;  %16734 = vmatpush3.msra.mxu0 %v19649_v20 }
 0x49f   : > { %16743 = vmatprep.subr.mxu0 %v19654_v49 }
 0x4a0   : > { %v14151_v27 = vsel %vm2775_vm1, %v10658_v22, 0  ;;  %v10652_v34 = vadd.f32 %v10651_v11, %v10573_v39  ;;  %v16524_v24 = vpop.f32.mrf.mxu1 }
 0x4a1   : > { %v14229_v32 = vand.u32 4294901760, %v14151_v27 }
 0x4a2   : > { %v14148_v14 = vsel %vm2775_vm1, %v10652_v34, 0  ;;  %v10831_v61 = vpop.f32.mrf.mxu1 }
 0x4a3   : > { %v14230_v43 = vsub.f32 %v14151_v27, %v14229_v32  ;;  %v14219_v62 = vand.u32 4294901760, %v14148_v14 }
 0x4a4   : > { %v16538_v40 = vpop.f32.mrf.mxu1 }
 0x4a5   : > { %v14231_v58 = vand.u32 4294901760, %v14230_v43  ;;  %v14220_v35 = vsub.f32 %v14148_v14, %v14219_v62  ;;  %16740 = vmatprep.mubr.f32.mxu1 %v14219_v62 }
 0x4a6   : > { %16741 = vmatmul.mubr.f32.vlgmr.msra.gmra.mxu1 %v14229_v32  ;;  %v10995_v47 = vpop.f32.mrf.mxu1 }
 0x4a7   : > { %16749 = vmatpush3.msra.mxu1 %v19649_v20  ;;  %v14221_v1 = vand.u32 4294901760, %v14220_v35  ;;  %v14232_v17 = vsub.f32 %v14230_v43, %v14231_v58 }
 0x4a8   : > { %16758 = vmatprep.subr.mxu1 %v19649_v20  ;;  %v16517_v57 = vpop.f32.mrf.mxu0 }
 0x4a9   : > { %16750 = vmatprep.mubr.f32.mxu1 %v14221_v1  ;;  %v14222_v4 = vsub.f32 %v14220_v35, %v14221_v1  ;;  %v14233_v28 = vand.u32 4294901760, %v14232_v17  ;;  %v10838_v9 = vadd.f32 %v16524_v24, %v16517_v57 }
 0x4aa   : > { %16751 = vmatmul.mubr.f32.vlgmr.msra.gmra.mxu1 %v14231_v58  ;;  %v10740_v46 = vpop.f32.mrf.mxu0 }
 0x4ab   : > { %16760 = vmatprep.mubr.f32.mxu1 %v14219_v62  ;;  %v14223_v33 = vand.u32 4294901760, %v14222_v4  ;;  %16759 = vmatpush3.msra.mxu1 %v19649_v20  ;;  %v10832_v21 = vadd.f32 %v10831_v61, %v10740_v46  ;;  %v16552_v20 = vpop.f32.mrf.mxu1 }
 0x4ac   : > { %16768 = vmatprep.subr.mxu1 %v14769_v15  ;;  %v16531_v45 = vpop.f32.mrf.mxu0 }
 0x4ad   : > { %16735 = vmatprep.mubr.f32.mxu0 %v14223_v33  ;;  %v10921_v54 = vadd.f32 %v16531_v45, %v10838_v9 }
 0x4ae   : > { %16736 = vmatmul.mubr.f32.vlgmr.msra.gmra.mxu0 %v14233_v28  ;;  %16761 = vmatmul.mubr.f32.vlgmr.msra.gmra.mxu1 %v14229_v32  ;;  %v10913_v7 = vpop.f32.mrf.mxu0 }
 0x4af   : > { %16745 = vmatprep.mubr.f32.mxu0 %v14220_v35  ;;  %16744 = vmatpush3.msra.mxu0 %v19654_v49  ;;  %v10914_v29 = vadd.f32 %v10913_v7, %v10832_v21  ;;  %v11004_v48 = vadd.f32 %v16538_v40, %v10921_v54  ;;  %v11159_v49 = vpop.f32.mrf.mxu1 }
 0x4b0   : > { %16753 = vmatprep.subr.mxu0 %v19660_v38  ;;  %16769 = vmatpush3.msra.mxu1 %v14769_v15  ;;  %v16545_v2 = vpop.f32.mrf.mxu0 }
 0x4b1   : > { %16778 = vmatprep.subr.mxu1 %v19669_v8  ;;  %v11087_v16 = vadd.f32 %v16545_v2, %v11004_v48  ;;  %v10996_v5 = vadd.f32 %v10995_v47, %v10914_v29 }
 0x4b2   : > { %16746 = vmatmul.mubr.f32.vlgmr.msra.gmra.mxu0 %v14230_v43  ;;  %v11080_v10 = vpop.f32.mrf.mxu0 }
 0x4b3   : > { %16755 = vmatprep.mubr.f32.mxu0 %v14219_v62  ;;  %16754 = vmatpush3.msra.mxu0 %v19660_v38  ;;  %v11166_v37 = vadd.f32 %v16552_v20, %v11087_v16  ;;  %v11081_v13 = vadd.f32 %v11080_v10, %v10996_v5 }
 0x4b4   : > { %16763 = vmatprep.subr.mxu0 %v19669_v8 }
 0x4b5   : > { %v14646_v12 = vsel %vm2775_vm1, %v11166_v37, 0  ;;  %v11160_v60 = vadd.f32 %v11159_v49, %v11081_v13 }
 0x4b6   : > { %16756 = vmatmul.mubr.f32.vlgmr.msra.gmra.mxu0 %v14229_v32  ;;  %v14724_v51 = vand.u32 4294901760, %v14646_v12 }
 0x4b7   : > { %16764 = vmatpush3.msra.mxu0 %v19669_v8  ;;  %v14643_v56 = vsel %vm2775_vm1, %v11160_v60, 0 }
 0x4b8   : > { %16773 = vmatprep.subr.mxu0 %v19675_v26  ;;  %v14725_v41 = vsub.f32 %v14646_v12, %v14724_v51  ;;  %v14714_v52 = vand.u32 4294901760, %v14643_v56 }
 0x4ba   : > { %v14726_v19 = vand.u32 4294901760, %v14725_v41  ;;  %v14715_v38 = vsub.f32 %v14643_v56, %v14714_v52  ;;  %16770 = vmatprep.mubr.f32.mxu1 %v14714_v52 }
 0x4bb   : > { %16771 = vmatmul.mubr.f32.vlgmr.msra.gmra.mxu1 %v14724_v51 }
 0x4bc   : > { %16779 = vmatpush3.msra.mxu1 %v19669_v8  ;;  %v14716_v63 = vand.u32 4294901760, %v14715_v38  ;;  %v14727_v18 = vsub.f32 %v14725_v41, %v14726_v19 }
 0x4bd   : > { %16788 = vmatprep.subr.mxu1 %v19669_v8 }
 0x4be   : > { %16780 = vmatprep.mubr.f32.mxu1 %v14716_v63  ;;  %v14717_v23 = vsub.f32 %v14715_v38, %v14716_v63  ;;  %v14728_v59 = vand.u32 4294901760, %v14727_v18 }
 0x4bf   : > { %16781 = vmatmul.mubr.f32.vlgmr.msra.gmra.mxu1 %v14726_v19 }
 0x4c0   : > { %16790 = vmatprep.mubr.f32.mxu1 %v14714_v52  ;;  %v14718_v55 = vand.u32 4294901760, %v14717_v23  ;;  %16789 = vmatpush3.msra.mxu1 %v19669_v8 }
 0x4c2   : > { %16765 = vmatprep.mubr.f32.mxu0 %v14718_v55 }
 0x4c3   : > { %16766 = vmatmul.mubr.f32.vlgmr.msra.gmra.mxu0 %v14728_v59  ;;  %16791 = vmatmul.mubr.f32.vlgmr.msra.gmra.mxu1 %v14724_v51 }
 0x4c4   : > { %16774 = vmatpush3.msra.mxu0 %v19675_v26  ;;  %16775 = vmatprep.mubr.f32.mxu0 %v14715_v38 }
 0x4c5   : > { %16783 = vmatprep.subr.mxu0 %v19681_v6 }
 0x4c7   : > { %16776 = vmatmul.mubr.f32.vlgmr.msra.gmra.mxu0 %v14725_v41 }
 0x4c8   : > { %16784 = vmatpush3.msra.mxu0 %v19681_v6  ;;  %16785 = vmatprep.mubr.f32.mxu0 %v14714_v52 }
 0x4cb   : > { %16786 = vmatmul.mubr.f32.vlgmr.msra.gmra.mxu0 %v14724_v51 }
 0x4cc   : > { %v16562_v31 = vpop.f32.mrf.mxu1 }
 0x4ce   : > { %v11341_v50 = vpop.f32.mrf.mxu1 }
 0x4d0   : > { %v16572_v30 = vpop.f32.mrf.mxu1 }
 0x4d2   : > { %v11502_v36 = vpop.f32.mrf.mxu1 }
 0x4d4   : > { %v16557_v42 = vpop.f32.mrf.mxu0  ;;  %v16582_v11 = vpop.f32.mrf.mxu1 }
 0x4d5   : > { %v11348_v0 = vadd.f32 %v16562_v31, %v16557_v42 }
 0x4d6   : > { %v11255_v8 = vpop.f32.mrf.mxu0  ;;  %v11662_v43 = vpop.f32.mrf.mxu1 }
 0x4d7   : > { %v11342_v25 = vadd.f32 %v11341_v50, %v11255_v8 }
 0x4d8   : > { %v16567_v44 = vpop.f32.mrf.mxu0 }
 0x4d9   : > { %v11429_v3 = vadd.f32 %v16567_v44, %v11348_v0 }
 0x4da   : > { %v11421_v22 = vpop.f32.mrf.mxu0 }
 0x4db   : > { %v11422_v26 = vadd.f32 %v11421_v22, %v11342_v25  ;;  %v11511_v39 = vadd.f32 %v16572_v30, %v11429_v3 }
 0x4dc   : > { %v16577_v27 = vpop.f32.mrf.mxu0 }
 0x4dd   : > { %v11591_v34 = vadd.f32 %v16577_v27, %v11511_v39  ;;  %v11503_v32 = vadd.f32 %v11502_v36, %v11422_v26 }
 0x4de   : > { %v11584_v24 = vpop.f32.mrf.mxu0 }
 0x4df   : > { %v19705_v6 = vadd.f32 %v16582_v11, %v11591_v34  ;;  %v11585_v14 = vadd.f32 %v11584_v24, %v11503_v32 }
 0x4e1   : > { %19912 = vst [vmem:[#allocation12_spill] sm:$0xff] %v19705_v6  ;;  %v19707_v62 = vadd.f32 %v11662_v43, %v11585_v14 }
 0x4e3   : > { %19913 = vst [vmem:[#allocation13_spill] sm:$0xff] %v19707_v62 }
 0x4ee   : > { %v19709_v53 = vpop.f32.mrf.mxu1 }
 0x4f0   : > { %v19711_v58 = vpop.f32.mrf.mxu1 }
 0x4f2   : > { %v19713_v35 = vpop.f32.mrf.mxu1 }
 0x4f4   : > { %v19715_v1 = vpop.f32.mrf.mxu1 }
 0x4f6   : > { %v16587_v61 = vpop.f32.mrf.mxu0  ;;  %v19717_v15 = vpop.f32.mrf.mxu1 }
 0x4f7   : > { %19914 = vst [vmem:[#allocation14_spill] sm:$0xff] %v19717_v15 }
 0x4f8   : > { %v11750_v17 = vpop.f32.mrf.mxu0  ;;  %v19719_v57 = vpop.f32.mrf.mxu1 }
 0x4f9   : > { %19915 = vst [vmem:[#allocation15_spill] sm:$0xff] %v19719_v57 }
 0x4fa   : > { %v16597_v40 = vpop.f32.mrf.mxu0 }
 0x4fc   : > { %v11916_v4 = vpop.f32.mrf.mxu0 }
 0x4fe   : > { %v19721_v33 = vpop.f32.mrf.mxu0 }
 0x500   : > { %v19723_v9 = vpop.f32.mrf.mxu0 }
 0x506   : > { %v16622_v46 = vpop.f32.mrf.mxu1 }
 0x508   : > { %v12331_v28 = vpop.f32.mrf.mxu1 }
 0x50a   : > { %v19725_v47 = vpop.f32.mrf.mxu1 }
 0x50c   : > { %v19727_v21 = vpop.f32.mrf.mxu1 }
 0x50e   : > { %v16617_v45 = vpop.f32.mrf.mxu0  ;;  %v19729_v7 = vpop.f32.mrf.mxu1 }
 0x50f   : > { %19916 = vst [vmem:[#allocation16_spill] sm:$0xff] %v19729_v7 }
 0x510   : > { %v12245_v54 = vpop.f32.mrf.mxu0  ;;  %v19731_v48 = vpop.f32.mrf.mxu1 }
 0x511   : > { %19917 = vst [vmem:[#allocation17_spill] sm:$0xff] %v19731_v48 }
 0x512   : > { %v16627_v29 = vpop.f32.mrf.mxu0 }
 0x514   : > { %v12411_v20 = vpop.f32.mrf.mxu0 }
 0x516   : > { %v19733_v16 = vpop.f32.mrf.mxu0 }
 0x518   : > { %v19735_v10 = vpop.f32.mrf.mxu0 }
 0x51f   : > { %v16652_v2 = vpop.f32.mrf.mxu1 }
 0x521   : > { %v12826_v5 = vpop.f32.mrf.mxu1 }
 0x523   : > { %v19737_v37 = vpop.f32.mrf.mxu1 }
 0x525   : > { %v19739_v49 = vpop.f32.mrf.mxu1 }
 0x527   : > { %v16647_v13 = vpop.f32.mrf.mxu0  ;;  %v19741_v60 = vpop.f32.mrf.mxu1 }
 0x528   : > { %19918 = vst [vmem:[#allocation18_spill] sm:$0xff] %v19741_v60  ;;  %v12833_v7 = vadd.f32 %v16652_v2, %v16647_v13 }
 0x529   : > { %v12740_v12 = vpop.f32.mrf.mxu0  ;;  %v19743_v56 = vpop.f32.mrf.mxu1 }
 0x52a   : > { %19919 = vst [vmem:[#allocation19_spill] sm:$0xff] %v19743_v56  ;;  %v11837_v56 = vadd.f32 %v19711_v58, %v11750_v17 }
 0x52b   : > { %v16657_v51 = vpop.f32.mrf.mxu0 }
 0x52c   : > { %v11917_v48 = vadd.f32 %v11916_v4, %v11837_v56  ;;  %v12914_v15 = vadd.f32 %v16657_v51, %v12833_v7 }
 0x52d   : > { %v12906_v41 = vpop.f32.mrf.mxu0 }
 0x52f   : > { %v19745_v19 = vpop.f32.mrf.mxu0 }
 0x530   : > { %19920 = vst [vmem:[#allocation20_spill] sm:$0xff] %v19745_v19 }
 0x531   : > { %v19747_v63 = vpop.f32.mrf.mxu0 }
 0x532   : > { %19921 = vst [vmem:[#allocation21_spill] sm:$0xff] %v19747_v63 }
 0x535   : > { %v16682_v52 = vpop.f32.mrf.mxu1 }
 0x537   : > { %v13321_v38 = vpop.f32.mrf.mxu1  ;;  %v19932_v56 = vld [vmem:[#allocation20_spill] sm:$0xff] }
 0x539   : > { %v16692_v18 = vpop.f32.mrf.mxu1 }
 0x53b   : > { %v19749_v55 = vpop.f32.mrf.mxu1 }
 0x53d   : > { %v16677_v23 = vpop.f32.mrf.mxu0  ;;  %v19751_v31 = vpop.f32.mrf.mxu1 }
 0x53e   : > { %19922 = vst [vmem:[#allocation22_spill] sm:$0xff] %v19751_v31  ;;  %v11843_v31 = vadd.f32 %v19709_v53, %v16587_v61  ;;  %v13328_v63 = vadd.f32 %v16682_v52, %v16677_v23  ;;  %v11998_v53 = vadd.f32 %v19715_v1, %v11917_v48  ;;  %v19933_v52 = vld [vmem:[#allocation21_spill] sm:$0xff] }
 0x53f   : > { %v13235_v59 = vpop.f32.mrf.mxu0  ;;  %v19753_v30 = vpop.f32.mrf.mxu1 }
 0x540   : > { %19923 = vst [vmem:[#allocation23_spill] sm:$0xff] %v19753_v30  ;;  %v11924_v6 = vadd.f32 %v16597_v40, %v11843_v31  ;;  %v13322_v61 = vadd.f32 %v13321_v38, %v13235_v59  ;;  %v12080_v1 = vadd.f32 %v19723_v9, %v11998_v53  ;;  %v19936_v59 = vld [vmem:[#allocation16_spill] sm:$0xff] }
 0x541   : > { %v16687_v50 = vpop.f32.mrf.mxu0 }
 0x542   : > { %v12006_v57 = vadd.f32 %v19713_v35, %v11924_v6  ;;  %v13409_v17 = vadd.f32 %v16687_v50, %v13328_v63 }
 0x543   : > { %v13401_v42 = vpop.f32.mrf.mxu0 }
 0x544   : > { %v13402_v6 = vadd.f32 %v13401_v42, %v13322_v61  ;;  %v13491_v2 = vadd.f32 %v16692_v18, %v13409_v17 }
 0x545   : > { %v19755_v8 = vpop.f32.mrf.mxu0 }
 0x546   : > { %19924 = vst [vmem:[#allocation24_spill] sm:$0xff] %v19755_v8  ;;  %v12827_v8 = vadd.f32 %v12826_v5, %v12740_v12  ;;  %v13483_v12 = vadd.f32 %v19749_v55, %v13402_v6  ;;  %v19938_v55 = vld [vmem:[#allocation17_spill] sm:$0xff] }
 0x547   : > { %v19757_v36 = vpop.f32.mrf.mxu0 }
 0x548   : > { %19925 = vst [vmem:[#allocation25_spill] sm:$0xff] %v19757_v36  ;;  %v12907_v58 = vadd.f32 %v12906_v41, %v12827_v8 }
 0x54a   : > { %v12988_v48 = vadd.f32 %v19739_v49, %v12907_v58 }
 0x54c   : > { %v13070_v49 = vadd.f32 %v19933_v52, %v12988_v48 }
 0x54d   : > { %v16712_v0 = vpop.f32.mrf.mxu1  ;;  %v19934_v38 = vld [vmem:[#allocation24_spill] sm:$0xff] }
 0x54e   : > { %v13571_v63 = vadd.f32 %v19934_v38, %v13491_v2 }
 0x54f   : > { %v13816_v25 = vpop.f32.mrf.mxu1 }
 0x551   : > { %v16722_v44 = vpop.f32.mrf.mxu1 }
 0x553   : > { %v19759_v22 = vpop.f32.mrf.mxu1 }
 0x554   : > { %19926 = vst [vmem:[#allocation26_spill] sm:$0xff] %v19759_v22  ;;  %v12332_v22 = vadd.f32 %v12331_v28, %v12245_v54  ;;  %v12996_v54 = vadd.f32 %v19737_v37, %v12914_v15  ;;  %v19931_v15 = vld [vmem:[#allocation14_spill] sm:$0xff] }
 0x555   : > { %v16707_v3 = vpop.f32.mrf.mxu0  ;;  %v19761_v39 = vpop.f32.mrf.mxu1 }
 0x556   : > { %19927 = vst [vmem:[#allocation27_spill] sm:$0xff] %v19761_v39  ;;  %v12338_v39 = vadd.f32 %v16622_v46, %v16617_v45  ;;  %v13823_v4 = vadd.f32 %v16712_v0, %v16707_v3  ;;  %v12086_v46 = vadd.f32 %v19721_v33, %v12006_v57  ;;  %v19939_v0 = vld [vmem:[#allocation25_spill] sm:$0xff] }
 0x557   : > { %v13730_v26 = vpop.f32.mrf.mxu0  ;;  %v19763_v27 = vpop.f32.mrf.mxu1  ;;  %v13565_v8 = vadd.f32 %v19939_v0, %v13483_v12 }
 0x558   : > { %19928 = vst [vmem:[#allocation28_spill] sm:$0xff] %v19763_v27  ;;  %v12419_v27 = vadd.f32 %v16627_v29, %v12338_v39  ;;  %v13817_v29 = vadd.f32 %v13816_v25, %v13730_v26  ;;  %v12164_v37 = vadd.f32 %v19931_v15, %v12086_v46  ;;  %v19946_v46 = vld [vmem:[#allocation13_spill] sm:$0xff] }
 0x559   : > { %v16717_v11 = vpop.f32.mrf.mxu0 }
 0x55a   : > { %v12501_v40 = vadd.f32 %v19725_v47, %v12419_v27  ;;  %v13904_v7 = vadd.f32 %v16717_v11, %v13823_v4  ;;  %v19942_v11 = vld [vmem:[#allocation12_spill] sm:$0xff] }
 0x55b   : > { %v13896_v34 = vpop.f32.mrf.mxu0  ;;  %v19937_v31 = vld [vmem:[#allocation26_spill] sm:$0xff]  ;;  %v15152_v27 = vsel %vm304_vm0, %v19942_v11, 0.0 }
 0x55c   : > { %v12581_v5 = vadd.f32 %v19733_v16, %v12501_v40  ;;  %v13897_v57 = vadd.f32 %v13896_v34, %v13817_v29  ;;  %v13986_v41 = vadd.f32 %v16722_v44, %v13904_v7  ;;  %v19935_v16 = vld [vmem:[#allocation15_spill] sm:$0xff]  ;;  %v19940_v44 = vld [vmem:[#allocation18_spill] sm:$0xff] }
 0x55d   : > { %v19765_v24 = vpop.f32.mrf.mxu0  ;;  %v12158_v23 = vadd.f32 %v19935_v16, %v12080_v1  ;;  %v19943_v34 = vld [vmem:[#allocation19_spill] sm:$0xff] }
 0x55e   : > { %19929 = vst [vmem:[#allocation29_spill] sm:$0xff] %v19765_v24  ;;  %v12412_v24 = vadd.f32 %v12411_v20, %v12332_v22 }
 0x55f   : > { %v19767_v43 = vpop.f32.mrf.mxu0  ;;  %v15138_v58 = vsel %vm304_vm0, %v12158_v23, 0.0 }
 0x560   : > { %19930 = vst [vmem:[#allocation30_spill] sm:$0xff] %v19767_v43  ;;  %v12493_v28 = vadd.f32 %v19727_v21, %v12412_v24  ;;  %v19944_v24 = vld [vmem:[#allocation22_spill] sm:$0xff] }
 0x562   : > { %v12575_v13 = vadd.f32 %v19735_v10, %v12493_v28  ;;  %v13978_v10 = vadd.f32 %v19937_v31, %v13897_v57  ;;  %v15137_v28 = vsel %vm304_vm0, %v19946_v46, 0.0 }
 0x564   : > { %v12653_v42 = vadd.f32 %v19938_v55, %v12575_v13 }
 0x565   : > { %v19941_v22 = vld [vmem:[#allocation29_spill] sm:$0xff] }
 0x566   : > { %v16742_v32 = vpop.f32.mrf.mxu1  ;;  %v14066_v26 = vadd.f32 %v19941_v22, %v13986_v41  ;;  %v15140_v6 = vsel %vm304_vm0, %v12653_v42, 0.0 }
 0x567   : > { %v19945_v17 = vld [vmem:[#allocation30_spill] sm:$0xff] }
 0x568   : > { %v14311_v14 = vpop.f32.mrf.mxu1  ;;  %v14060_v40 = vadd.f32 %v19945_v17, %v13978_v10 }
 0x56a   : > { %v16752_v30 = vpop.f32.mrf.mxu1 }
 0x56c   : > { %v14472_v60 = vpop.f32.mrf.mxu1 }
 0x56e   : > { %v16737_v62 = vpop.f32.mrf.mxu0  ;;  %v19772_v43 = vpop.f32.mrf.mxu1 }
 0x56f   : > { %v14318_v20 = vadd.f32 %v16742_v32, %v16737_v62  ;;  %v13076_v62 = vadd.f32 %v19932_v56, %v12996_v54  ;;  %v13148_v32 = vadd.f32 %v19943_v34, %v13070_v49 }
 0x570   : > { %v14225_v36 = vpop.f32.mrf.mxu0  ;;  %v19778_v35 = vpop.f32.mrf.mxu1 }
 0x571   : > { %v14312_v33 = vadd.f32 %v14311_v14, %v14225_v36  ;;  %v15153_v36 = vsel %vm304_vm0, %v12164_v37, 0.0  ;;  %v13154_v3 = vadd.f32 %v19940_v44, %v13076_v62  ;;  %v13649_v14 = vadd.f32 %v19944_v24, %v13571_v63 }
 0x572   : > { %v16747_v19 = vpop.f32.mrf.mxu0 }
 0x573   : > { %v14399_v21 = vadd.f32 %v16747_v19, %v14318_v20  ;;  %v12659_v19 = vadd.f32 %v19936_v59, %v12581_v5  ;;  %v15157_v7 = vsel %vm304_vm0, %v13154_v3, 0.0  ;;  %v19948_v20 = vld [vmem:[#allocation27_spill] sm:$0xff]  ;;  %v15139_v5 = vadd.f32 %v15138_v58, %v15137_v28 }
 0x574   : > { %v14391_v45 = vpop.f32.mrf.mxu0  ;;  %v14144_v1 = vadd.f32 %v19948_v20, %v14066_v26  ;;  %v15345_v26 = vld [vmem:[%s19884_s4] ss:$0 sm:$0xff] }
 0x575   : > { %v14392_v9 = vadd.f32 %v14391_v45, %v14312_v33  ;;  %v14481_v50 = vadd.f32 %v16752_v30, %v14399_v21  ;;  %v15155_v61 = vsel %vm304_vm0, %v12659_v19, 0.0  ;;  %v19947_v45 = vld [vmem:[#allocation23_spill] sm:$0xff]  ;;  %v15142_v33 = vsel %vm304_vm0, %v13148_v32, 0.0 }
 0x576   : > { %v16757_v51 = vpop.f32.mrf.mxu0  ;;  %v13643_v54 = vadd.f32 %v19947_v45, %v13565_v8  ;;  %v15159_v21 = vsel %vm304_vm0, %v13649_v14, 0.0  ;;  %v15141_v41 = vadd.f32 %v15140_v6, %v15139_v5 }
 0x577   : > { %v14473_v39 = vadd.f32 %v14472_v60, %v14392_v9  ;;  %v14561_v4 = vadd.f32 %v16757_v51, %v14481_v50  ;;  %v15154_v60 = vadd.f32 %v15153_v36, %v15152_v27  ;;  %v19949_v51 = vld [vmem:[#allocation28_spill] sm:$0xff] }
 0x578   : > { %v14554_v25 = vpop.f32.mrf.mxu0  ;;  %v14138_v15 = vadd.f32 %v19949_v51, %v14060_v40  ;;  %v15144_v52 = vsel %vm304_vm0, %v13643_v54, 0.0  ;;  %v15143_v23 = vadd.f32 %v15142_v33, %v15141_v41 }
 0x579   : > { %v14555_v48 = vadd.f32 %v14554_v25, %v14473_v39  ;;  %v15156_v57 = vadd.f32 %v15155_v61, %v15154_v60  ;;  %v14639_v37 = vadd.f32 %v19772_v43, %v14561_v4 }
 0x57a   : > { %v15146_v10 = vsel %vm304_vm0, %v14138_v15, 0.0  ;;  %v15145_v55 = vadd.f32 %v15144_v52, %v15143_v23 }
 0x57b   : > { %v16772_v47 = vpop.f32.mrf.mxu1  ;;  %v15158_v9 = vadd.f32 %v15157_v7, %v15156_v57  ;;  %v14633_v38 = vadd.f32 %v19778_v35, %v14555_v48  ;;  %v15163_v43 = vsel %vm304_vm0, %v14639_v37, 0.0 }
 0x57c   : > { %v15147_v36 = vadd.f32 %v15146_v10, %v15145_v55 }
 0x57d   : > { %v14806_v18 = vpop.f32.mrf.mxu1  ;;  %v15160_v59 = vadd.f32 %v15159_v21, %v15158_v9  ;;  %v15148_v8 = vsel %vm304_vm0, %v14633_v38, 0.0 }
 0x57e   : > { %v15149_v11 = vadd.f32 %v15148_v8, %v15147_v36 }
 0x57f   : > { %v16782_v30 = vpop.f32.mrf.mxu1 }
 0x581   : > { %v14967_v13 = vpop.f32.mrf.mxu1 }
 0x583   : > { %v16767_v53 = vpop.f32.mrf.mxu0  ;;  %v16792_v19 = vpop.f32.mrf.mxu1 }
 0x584   : > { %v14813_v2 = vadd.f32 %v16772_v47, %v16767_v53  ;;  %v15161_v47 = vsel %vm304_vm0, %v14144_v1, 0.0 }
 0x585   : > { %v14720_v29 = vpop.f32.mrf.mxu0  ;;  %v15162_v42 = vadd.f32 %v15161_v47, %v15160_v59  ;;  %v15127_v3 = vpop.f32.mrf.mxu1 }
 0x586   : > { %v14807_v56 = vadd.f32 %v14806_v18, %v14720_v29 }
 0x587   : > { %v16777_v12 = vpop.f32.mrf.mxu0  ;;  %v15164_v44 = vadd.f32 %v15163_v43, %v15162_v42 }
 0x588   : > { %v14894_v62 = vadd.f32 %v16777_v12, %v14813_v2 }
 0x589   : > { %v14886_v49 = vpop.f32.mrf.mxu0 }
 0x58a   : > { %v14887_v63 = vadd.f32 %v14886_v49, %v14807_v56  ;;  %v14976_v16 = vadd.f32 %v16782_v30, %v14894_v62 }
 0x58b   : > { %v16787_v31 = vpop.f32.mrf.mxu0 }
 0x58c   : > { %v15056_v18 = vadd.f32 %v16787_v31, %v14976_v16  ;;  %v14968_v50 = vadd.f32 %v14967_v13, %v14887_v63 }
 0x58d   : > { %v15049_v0 = vpop.f32.mrf.mxu0 }
 0x58e   : > { %v15134_v35 = vadd.f32 %v16792_v19, %v15056_v18  ;;  %v15050_v25 = vadd.f32 %v15049_v0, %v14968_v50 }
 0x590   : > { %v15165_v22 = vsel %vm304_vm0, %v15134_v35, 0.0  ;;  %v15128_v39 = vadd.f32 %v15127_v3, %v15050_v25 }
 0x591   : > { %v15166_v27 = vadd.f32 %v15165_v22, %v15164_v44 }
 0x592   : > { %v15150_v34 = vsel %vm304_vm0, %v15128_v39, 0.0 }
 0x593   : > { %v15175_v32 = vadd.f32 %v15345_v26, %v15166_v27  ;;  %v15151_v24 = vadd.f32 %v15150_v34, %v15149_v11 }
 0x595   : > { %v15174_v14 = vadd.f32 %v15345_v26, %v15151_v24  ;;  %15177 = vst.msk [vmem:[%s271_s8 + $0x8] sm:$0xff] %vm304_vm0, %v15175_v32 }
 0x597   : > { %15176 = vst.msk [vmem:[%s271_s8] sm:$0xff] %vm304_vm0, %v15174_v14 }
 0x598   : > { %17024 = shalt.err (!%p17021_p9)
}
 0x599   : > { %s17025_s26 = scalar_lea.hbm %s19832_s27, 256  ;;  %s17029_s12 = scalar_lea.hbm %s19885_s5, 512 }
 0x59a   : > { %p17026_p13 = scmp.ne.s32.totalorder %s19832_s27, %s17025_s26  ;;  %p17030_p4 = scmp.lt.s32.totalorder %s19832_s27, %s19885_s5 }
 0x59b   : > { %p17031_p8 = scmp.lt.s32.totalorder %s17029_s12, %s17025_s26 }
 0x59c   : > { %p17027_p5 = pnand %p17026_p13, %p19950_p10 }
 0x59d   : > { %p17032_p7 = por %p17031_p8, %p17030_p4 }
 0x59e   : > { %p17028_p0 = pneg %p17027_p5 }
 0x5a0   : > { %p17033_p11 = pnand %p17032_p7, %p17028_p0 }
 0x5a2   : > { %17036 = shalt.err (!%p17033_p11)
}
 0x5a3   : > { %s17107_s30 = smov 128  }
 0x5a4   : > { %16803 = dma.vmem_to_hbm [thread:$0]  (%p19950_p10), %s19835_s9, 256, %s19832_s27, %s15179_s22, %s17107_s30, %s17107_s30, %s17098_s23  }
 0x5a5 PF: > { %s15207_s11 = sand.u32 1, %s17067_s18   ;;  %p19951_p1 = scmp.ne.s32.totalorder %s19892_s25, 0 }
 0x5a6   : > { %p19952_p2 = scmp.ge.s32.totalorder %s17079_s21, 2  ;;  %s15208_s13 = scalar_lea.sflag [#allocation4], %s15207_s11 }
 0x5a8   : > { %p16817_p6 = pnand %p19952_p2, %p19951_p1 }
 0x5aa   : > { %p16818_p12 = pneg %p16817_p6 }
 0x5ac   : > { %17062 = dma.done.wait (%p16818_p12), %s15208_s13, 256  }
 0x5ad   : > { %17064 = vsyncadd (%p16818_p12), %s15208_s13, 4294967040  ;;  %p19_p3 = scmp.ge.s32.totalorder %s17213_s17, 4   ;;  %s19953_s18 = smov %s17071_s19 }
 0x5ae   : > { %s19954_s19 = smov %s17075_s20  ;;  %s19955_s20 = smov %s17222_s28 }
 0x5af   : > { %s19956_s21 = smov %s17213_s17  ;;  %21 = sbr.rel (!%p19_p3) target bundleno = 6 (0x6), region = 93 }
 0x5b4   :  { %15213 = vsyncpa [#allocation3], 1 }
 0x5b5   :  { %15215 = vsyncpa [#allocation3 + $0x1], 1 }
 0x5b6   :  { %15216 = vsyncpa [#allocation6], 1 }
 0x5b7   :  { %15217 = vsyncpa [#allocation4], 1 }
 0x5b8   :  { %15219 = vsyncpa [#allocation4 + $0x1], 1 }

</bundles_post_ra>
